<compile_context>
chip_gen: v7x
topology: tpu7x:2x2x1
jax: 0.10.0
libtpu: 0.0.40
codegen_flags: <defaults>
</compile_context>

<pallas_src>
import functools

import jax
import jax.numpy as jnp
from jax.experimental import pallas as pl
from jax.experimental.pallas import tpu as pltpu

LANE = 128


def _residual_kernel(x_ref, w1_ref, w2_ref, b1_ref, b2_ref, *args,
                     k, p, stride, Ho, Wo, TH, cin_p, cout_p, has_skip_conv):
    """One (batch, output-row-tile) step of the fused residual block.

    x_ref    : (1, Hp, Wp, cin_p)  whole spatially+channel padded input image
               (bf16 when the skip branch has a conv, f32 for identity skip).
    w1_ref   : (k*k*cin_p,  cout_p) bf16, BN1 scale folded in, (kh, kw, ci) order.
    w2_ref   : (k*k*cout_p, cout_p) bf16, BN2 scale folded in.
    b1/b2    : (1, cout_p) f32 BN shifts.
    ws/bs    : (cin_p, cout_p) bf16 / (1, cout_p) f32 (only when has_skip_conv).
    out_ref  : (1, TH, Wo, cout_p) f32 output row tile.
    rpad_ref : (1, TH+2p, Wo+2p, cout_p) bf16 scratch with the relu1 rows
               (+ conv2 halo) needed by this tile.
    """
    if has_skip_conv:
        ws_ref, bs_ref, out_ref, rpad_ref = args
    else:
        out_ref, rpad_ref = args

    r = pl.program_id(1)
    r0 = r * TH                              # first output row of this tile

    # ------------- conv1 (BN1 scale folded) + shift + ReLU -------------
    # kh-grouped im2col: k dots of K = k*cin_p accumulating into one f32 acc.
    if stride == 1:
        nrow1 = TH + 2 * p                   # relu1 rows (with conv2 halo)
        m1 = nrow1 * Wo
        acc1 = jnp.zeros((m1, cout_p), jnp.float32)
        for kh in range(k):
            taps = [
                x_ref[:, pl.ds(r0 + kh, nrow1), pl.ds(kw, Wo), :]
                .astype(jnp.bfloat16)
                for kw in range(k)
            ]
            patch = jnp.concatenate(taps, axis=-1).reshape(m1, k * cin_p)
            acc1 = acc1 + jnp.dot(
                patch, w1_ref[pl.ds(kh * k * cin_p, k * cin_p), :],
                preferred_element_type=jnp.float32)
    else:
        # TODO(synk): strided fallback uses value slicing (single whole-image tile).
        nrow1 = Ho
        m1 = nrow1 * Wo
        x_all = x_ref[...]
        acc1 = jnp.zeros((m1, cout_p), jnp.float32)
        for kh in range(k):
            taps = [
                x_all[:, kh:kh + (Ho - 1) * stride + 1:stride,
                      kw:kw + (Wo - 1) * stride + 1:stride, :].astype(jnp.bfloat16)
                for kw in range(k)
            ]
            patch = jnp.concatenate(taps, axis=-1).reshape(m1, k * cin_p)
            acc1 = acc1 + jnp.dot(
                patch, w1_ref[pl.ds(kh * k * cin_p, k * cin_p), :],
                preferred_element_type=jnp.float32)

    y1 = jnp.maximum(acc1 + b1_ref[...], 0.0)

    # ---- stage relu1 (+zero halo) into the conv2 scratch ----
    # Each step fully writes / zeroes everything conv2 reads this step, so this
    # stays correct under megacore grid sharding.
    zrow = jnp.zeros((1, p, Wo + 2 * p, cout_p), rpad_ref.dtype)
    zcol = jnp.zeros((1, TH + 2 * p, p, cout_p), rpad_ref.dtype)
    if stride == 1:
        rpad_ref[:, :, p:p + Wo, :] = (
            y1.reshape(1, nrow1, Wo, cout_p).astype(rpad_ref.dtype))
        rpad_ref[:, :, 0:p, :] = zcol
        rpad_ref[:, :, Wo + p:Wo + 2 * p, :] = zcol

        @pl.when(r == 0)                     # image top boundary tile
        def _():
            rpad_ref[:, 0:p, :, :] = zrow

        @pl.when(r == pl.num_programs(1) - 1)  # image bottom boundary tile
        def _():
            rpad_ref[:, TH + p:TH + 2 * p, :, :] = zrow
    else:
        rpad_ref[:, p:p + Ho, p:p + Wo, :] = (
            y1.reshape(1, Ho, Wo, cout_p).astype(rpad_ref.dtype))
        rpad_ref[:, 0:p, :, :] = zrow
        rpad_ref[:, Ho + p:Ho + 2 * p, :, :] = zrow
        rpad_ref[:, :, 0:p, :] = zcol
        rpad_ref[:, :, Wo + p:Wo + 2 * p, :] = zcol

    # ------------- conv2 (BN2 scale folded) + shift -------------
    m2 = TH * Wo
    acc2 = jnp.zeros((m2, cout_p), jnp.float32)
    for kh in range(k):
        taps = [rpad_ref[:, kh:kh + TH, kw:kw + Wo, :] for kw in range(k)]
        patch = jnp.concatenate(taps, axis=-1).reshape(m2, k * cout_p)
        acc2 = acc2 + jnp.dot(
            patch, w2_ref[pl.ds(kh * k * cout_p, k * cout_p), :],
            preferred_element_type=jnp.float32)
    y2 = acc2 + b2_ref[...]

    # ------------- skip branch -------------
    if stride == 1:
        xs = x_ref[:, pl.ds(r0 + 2 * p, TH), pl.ds(p, Wo), :]
    else:
        xs = x_all[:, p:p + (Ho - 1) * stride + 1:stride,
                   p:p + (Wo - 1) * stride + 1:stride, :]
    xs = xs.reshape(m2, cin_p)
    if has_skip_conv:
        skip = jnp.dot(xs.astype(jnp.bfloat16), ws_ref[...],
                       preferred_element_type=jnp.float32) + bs_ref[...]
    else:
        # identity skip: x was kept in f32 so the residual add is exact.
        skip = xs.astype(jnp.float32)

    out = jnp.maximum(y2 + skip, 0.0)
    out_ref[...] = out.reshape(1, TH, Wo, cout_p).astype(out_ref.dtype)


def _fold_bn(bn, eps=1e-5):
    gamma, beta, mean, var = bn
    scale = (gamma / jnp.sqrt(var + eps)).astype(jnp.float32)
    shift = (beta - mean * scale).astype(jnp.float32)
    return scale, shift


def _prep_w(w_oihw, scale, ci_p, co_p):
    # OIHW -> HWIO, fold BN scale into output channels, pad channels, flatten
    # to im2col layout (kh, kw, ci) x co, cast to bf16.
    w = jnp.transpose(w_oihw, (2, 3, 1, 0)).astype(jnp.float32)
    w = w * scale[None, None, None, :]
    kh, kw, ci, co = w.shape
    w = jnp.pad(w, ((0, 0), (0, 0), (0, ci_p - ci), (0, co_p - co)))
    return w.reshape(kh * kw * ci_p, co_p).astype(jnp.bfloat16)


def _prep_b(shift, co_p):
    co = shift.shape[0]
    return jnp.pad(shift, (0, co_p - co)).reshape(1, co_p).astype(jnp.float32)


def _pick_row_tile(Ho, est_fn, budget_bytes):
    divs = [d for d in range(Ho, 0, -1) if Ho % d == 0]
    fitting = [d for d in divs if est_fn(d) <= budget_bytes]
    if not fitting:
        return divs[-1]                      # best effort (smallest tile)
    th = fitting[0]
    # Prefer >= 2 row tiles (feeds both v7x TensorCores even at batch 1) as
    # long as the tiles stay reasonably tall.
    if th == Ho and Ho >= 16:
        smaller = [d for d in fitting if d <= Ho // 2 and d >= 8]
        if smaller:
            th = smaller[0]
    return th


def residual_forward(x_nchw, params, *, k=3, stride=1):
    N, inp_dim, H, W = x_nchw.shape
    out_dim = params["w1"].shape[0]
    p = (k - 1) // 2
    Ho = (H + 2 * p - k) // stride + 1
    Wo = (W + 2 * p - k) // stride + 1
    has_skip_conv = (stride != 1) or (inp_dim != out_dim)

    cin_p = -(-inp_dim // LANE) * LANE
    cout_p = -(-out_dim // LANE) * LANE

    # ---- layout glue: NCHW -> NHWC, zero-pad rows/cols/channels, cast ----
    # Rows are padded by 2p for stride 1 so every row tile can recompute its
    # conv1 halo without boundary special-casing inside the kernel.
    row_pad = 2 * p if stride == 1 else p
    x_dtype = jnp.bfloat16 if has_skip_conv else jnp.float32
    x = jnp.transpose(x_nchw, (0, 2, 3, 1)).astype(jnp.float32)
    x = jnp.pad(x, ((0, 0), (row_pad, row_pad), (p, p), (0, cin_p - inp_dim)))
    x = x.astype(x_dtype)
    Hp, Wp = H + 2 * row_pad, W + 2 * p

    sc1, sh1 = _fold_bn(params["bn1"])
    sc2, sh2 = _fold_bn(params["bn2"])
    w1 = _prep_w(params["w1"], sc1, cin_p, cout_p)
    w2 = _prep_w(params["w2"], sc2, cout_p, cout_p)
    b1 = _prep_b(sh1, cout_p)
    b2 = _prep_b(sh2, cout_p)

    # ---- VMEM-budgeted output-row tile ----
    x_bytes = 2 if has_skip_conv else 4

    def est_vmem(th):
        nrow1 = th + 2 * p if stride == 1 else Ho
        b = 2 * Hp * Wp * cin_p * x_bytes                         # input block x2
        b += 2 * th * Wo * cout_p * 4                             # output block x2
        b += (th + 2 * p) * (Wo + 2 * p) * cout_p * 2             # relu1 scratch
        b += (k * k * cin_p + k * k * cout_p + cin_p) * cout_p * 2  # weights (x1)
        b += nrow1 * Wo * (k * cin_p * 2 + 2 * cout_p * 4)        # conv1 patch+acc
        b += th * Wo * (k * cout_p * 2 + 2 * cout_p * 4)          # conv2 patch+acc
        b += th * Wo * cin_p * 4                                  # skip slice
        return b

    if stride == 1:
        TH = _pick_row_tile(Ho, est_vmem, budget_bytes=40 * 2**20)
    else:
        TH = Ho
    R = Ho // TH

    const_spec = lambda shape: pl.BlockSpec(
        shape, lambda n, r: (0, 0), pipeline_mode=pl.Buffered(1))

    operands = [x, w1, w2, b1, b2]
    in_specs = [
        pl.BlockSpec((1, Hp, Wp, cin_p), lambda n, r: (n, 0, 0, 0)),
        const_spec(w1.shape), const_spec(w2.shape),
        const_spec(b1.shape), const_spec(b2.shape),
    ]
    if has_skip_conv:
        scs, shs = _fold_bn(params["bns"])
        ws = _prep_w(params["ws"], scs, cin_p, cout_p)   # (cin_p, cout_p)
        bs = _prep_b(shs, cout_p)
        operands += [ws, bs]
        in_specs += [const_spec(ws.shape), const_spec(bs.shape)]

    kernel = functools.partial(
        _residual_kernel, k=k, p=p, stride=stride, Ho=Ho, Wo=Wo, TH=TH,
        cin_p=cin_p, cout_p=cout_p, has_skip_conv=has_skip_conv)

    # Advisory cost hint for XLA's scheduler.
    flops = 2 * N * Ho * Wo * cout_p * (k * k * cin_p + k * k * cout_p)
    if has_skip_conv:
        flops += 2 * N * Ho * Wo * cin_p * cout_p
    bytes_accessed = sum(int(a.size) * a.dtype.itemsize for a in operands)
    bytes_accessed += N * Ho * Wo * cout_p * 4
    cost = pl.CostEstimate(flops=flops, transcendentals=0,
                           bytes_accessed=bytes_accessed)

    cp_kwargs = dict(dimension_semantics=("parallel", "parallel"))
    est = est_vmem(TH)
    if est > 24 * 2**20:
        # Large feature maps exceed the 32 MiB scoped default; stay below
        # v7x's 64 MiB physical VMEM.
        cp_kwargs["vmem_limit_bytes"] = int(min(56 * 2**20, 2 * est))

    out_nhwc = pl.pallas_call(
        kernel,
        out_shape=jax.ShapeDtypeStruct((N, Ho, Wo, cout_p), jnp.float32),
        grid=(N, R),
        in_specs=in_specs,
        out_specs=pl.BlockSpec((1, TH, Wo, cout_p), lambda n, r: (n, r, 0, 0)),
        scratch_shapes=[
            pltpu.VMEM((1, TH + 2 * p, Wo + 2 * p, cout_p), jnp.bfloat16),
        ],
        compiler_params=pltpu.CompilerParams(**cp_kwargs),
        cost_estimate=cost,
    )(*operands)

    # un-pad channels, NHWC -> NCHW (glue)
    out = out_nhwc[..., :out_dim]
    return jnp.transpose(out, (0, 3, 1, 2))


# ---------------- plain-JAX reference (for a sanity check) ----------------
def residual_reference(x, params, *, k=3, stride=1):
    p = (k - 1) // 2

    def conv(x_, w_, s_, pad_):
        return jax.lax.conv_general_dilated(
            x_, w_, (s_, s_), ((pad_, pad_), (pad_, pad_)),
            dimension_numbers=("NCHW", "OIHW", "NCHW"))

    def bn(x_, bnp, eps=1e-5):
        g, b, m, v = (a.reshape(1, -1, 1, 1) for a in bnp)
        return (x_ - m) / jnp.sqrt(v + eps) * g + b

    inp_dim = x.shape[1]
    out_dim = params["w1"].shape[0]
    y = jax.nn.relu(bn(conv(x, params["w1"], stride, p), params["bn1"]))
    y = bn(conv(y, params["w2"], 1, p), params["bn2"])
    if stride != 1 or inp_dim != out_dim:
        skip = bn(conv(x, params["ws"], stride, 0), params["bns"])
    else:
        skip = x
    return jax.nn.relu(y + skip)


if __name__ == "__main__":
    # small shapes: batch=2, inp_dim=4, out_dim=8, spatial=16, k=3, stride=1
    N, inp_dim, out_dim, H, W, k, stride = 2, 4, 8, 16, 16, 3, 1

    key = jax.random.PRNGKey(0)
    keys = jax.random.split(key, 16)

    def bn_params(k1, k2, k3, k4, c):
        gamma = 1.0 + 0.1 * jax.random.normal(k1, (c,), jnp.float32)
        beta = 0.1 * jax.random.normal(k2, (c,), jnp.float32)
        mean = 0.1 * jax.random.normal(k3, (c,), jnp.float32)
        var = jax.random.uniform(k4, (c,), jnp.float32, 0.5, 1.5)
        return (gamma, beta, mean, var)

    params = {
        "w1": 0.2 * jax.random.normal(keys[0], (out_dim, inp_dim, k, k), jnp.float32),
        "w2": 0.2 * jax.random.normal(keys[1], (out_dim, out_dim, k, k), jnp.float32),
        "ws": 0.2 * jax.random.normal(keys[2], (out_dim, inp_dim, 1, 1), jnp.float32),
        "bn1": bn_params(keys[3], keys[4], keys[5], keys[6], out_dim),
        "bn2": bn_params(keys[7], keys[8], keys[9], keys[10], out_dim),
        "bns": bn_params(keys[11], keys[12], keys[13], keys[14], out_dim),
    }
    x = jax.random.normal(keys[15], (N, inp_dim, H, W), jnp.float32)

    out = residual_forward(x, params, k=k, stride=stride)
    out = jax.block_until_ready(out)

    ref = jax.block_until_ready(residual_reference(x, params, k=k, stride=stride))
    assert out.shape == ref.shape, (out.shape, ref.shape)
    # bf16 matmuls (f32 accumulation) -> slightly looser tolerance than pure f32.
    max_diff = float(jnp.max(jnp.abs(out - ref)))
    assert jnp.allclose(out, ref, atol=6e-2, rtol=6e-2), max_diff

    print("KERNEL_OK")
</pallas_src>

<mosaic_0001>
module attributes {stable_mosaic.version = 11 : i64} {
  func.func @_residual_kernel(%arg0: i32, %arg1: i32, %arg2: memref<1x20x18x128xbf16, #tpu.memory_space<vmem>>, %arg3: memref<1152x128xbf16, #tpu.memory_space<vmem>>, %arg4: memref<1152x128xbf16, #tpu.memory_space<vmem>>, %arg5: memref<1x128xf32, #tpu.memory_space<vmem>>, %arg6: memref<1x128xf32, #tpu.memory_space<vmem>>, %arg7: memref<128x128xbf16, #tpu.memory_space<vmem>>, %arg8: memref<1x128xf32, #tpu.memory_space<vmem>>, %arg9: memref<1x8x16x128xf32, #tpu.memory_space<vmem>>, %arg10: memref<1x10x18x128xbf16, #tpu.memory_space<vmem>>) attributes {dimension_semantics = [#tpu.dimension_semantics<parallel>, #tpu.dimension_semantics<parallel>], iteration_bounds = array<i64: 2, 2>, scalar_prefetch = 0 : i64, scratch_operands = 1 : i64, tpu.core_type = #tpu.core_type<tc>, window_params = [{transform_indices = @transform_0, window_bounds = array<i64: 1, 20, 18, 128>}, {pipeline_mode = #tpu.pipeline_mode<synchronous>, transform_indices = @transform_1, window_bounds = array<i64: 1152, 128>}, {pipeline_mode = #tpu.pipeline_mode<synchronous>, transform_indices = @transform_2, window_bounds = array<i64: 1152, 128>}, {pipeline_mode = #tpu.pipeline_mode<synchronous>, transform_indices = @transform_3, window_bounds = array<i64: 1, 128>}, {pipeline_mode = #tpu.pipeline_mode<synchronous>, transform_indices = @transform_4, window_bounds = array<i64: 1, 128>}, {pipeline_mode = #tpu.pipeline_mode<synchronous>, transform_indices = @transform_5, window_bounds = array<i64: 128, 128>}, {pipeline_mode = #tpu.pipeline_mode<synchronous>, transform_indices = @transform_6, window_bounds = array<i64: 1, 128>}, {transform_indices = @transform_7, window_bounds = array<i64: 1, 8, 16, 128>}]} {
    %c8_i32 = arith.constant 8 : i32
    %0 = arith.muli %arg1, %c8_i32 : i32
    %cst = arith.constant 0.000000e+00 : f32
    %1 = vector.broadcast %cst : f32 to vector<160x128xf32>
    %c0_i32 = arith.constant 0 : i32
    %2 = arith.addi %0, %c0_i32 : i32
    %c0 = arith.constant 0 : index
    %3 = arith.index_cast %2 : i32 to index
    %c0_0 = arith.constant 0 : index
    %c0_1 = arith.constant 0 : index
    %4 = vector.load %arg2[%c0, %3, %c0_0, %c0_1] : memref<1x20x18x128xbf16, #tpu.memory_space<vmem>>, vector<1x10x16x128xbf16>
    %c0_i32_2 = arith.constant 0 : i32
    %5 = arith.addi %0, %c0_i32_2 : i32
    %c0_3 = arith.constant 0 : index
    %6 = arith.index_cast %5 : i32 to index
    %c1 = arith.constant 1 : index
    %c0_4 = arith.constant 0 : index
    %7 = vector.load %arg2[%c0_3, %6, %c1, %c0_4] : memref<1x20x18x128xbf16, #tpu.memory_space<vmem>>, vector<1x10x16x128xbf16>
    %c0_i32_5 = arith.constant 0 : i32
    %8 = arith.addi %0, %c0_i32_5 : i32
    %c0_6 = arith.constant 0 : index
    %9 = arith.index_cast %8 : i32 to index
    %c2 = arith.constant 2 : index
    %c0_7 = arith.constant 0 : index
    %10 = vector.load %arg2[%c0_6, %9, %c2, %c0_7] : memref<1x20x18x128xbf16, #tpu.memory_space<vmem>>, vector<1x10x16x128xbf16>
    %11 = tpu.concatenate %4, %7, %10 in 3 : vector<1x10x16x128xbf16>, vector<1x10x16x128xbf16>, vector<1x10x16x128xbf16> -> vector<1x10x16x384xbf16>
    %12 = vector.shape_cast %11 : vector<1x10x16x384xbf16> to vector<160x384xbf16>
    %c0_8 = arith.constant 0 : index
    %c0_9 = arith.constant 0 : index
    %13 = vector.load %arg3[%c0_8, %c0_9] : memref<1152x128xbf16, #tpu.memory_space<vmem>>, vector<384x128xbf16>
    %cst_10 = arith.constant dense<0.000000e+00> : vector<160x128xf32>
    %14 = tpu.matmul %12, %13, %cst_10 {dimension_numbers = #tpu.dot_dimension_numbers<[1], [0], [0], [1], [0, 0, 1, 1], [], []>} : vector<160x384xbf16>, vector<384x128xbf16>, vector<160x128xf32> -> vector<160x128xf32>
    %15 = arith.addf %1, %14 : vector<160x128xf32>
    %c1_i32 = arith.constant 1 : i32
    %16 = arith.addi %0, %c1_i32 : i32
    %c0_11 = arith.constant 0 : index
    %17 = arith.index_cast %16 : i32 to index
    %c0_12 = arith.constant 0 : index
    %c0_13 = arith.constant 0 : index
    %18 = vector.load %arg2[%c0_11, %17, %c0_12, %c0_13] : memref<1x20x18x128xbf16, #tpu.memory_space<vmem>>, vector<1x10x16x128xbf16>
    %c1_i32_14 = arith.constant 1 : i32
    %19 = arith.addi %0, %c1_i32_14 : i32
    %c0_15 = arith.constant 0 : index
    %20 = arith.index_cast %19 : i32 to index
    %c1_16 = arith.constant 1 : index
    %c0_17 = arith.constant 0 : index
    %21 = vector.load %arg2[%c0_15, %20, %c1_16, %c0_17] : memref<1x20x18x128xbf16, #tpu.memory_space<vmem>>, vector<1x10x16x128xbf16>
    %c1_i32_18 = arith.constant 1 : i32
    %22 = arith.addi %0, %c1_i32_18 : i32
    %c0_19 = arith.constant 0 : index
    %23 = arith.index_cast %22 : i32 to index
    %c2_20 = arith.constant 2 : index
    %c0_21 = arith.constant 0 : index
    %24 = vector.load %arg2[%c0_19, %23, %c2_20, %c0_21] : memref<1x20x18x128xbf16, #tpu.memory_space<vmem>>, vector<1x10x16x128xbf16>
    %25 = tpu.concatenate %18, %21, %24 in 3 : vector<1x10x16x128xbf16>, vector<1x10x16x128xbf16>, vector<1x10x16x128xbf16> -> vector<1x10x16x384xbf16>
    %26 = vector.shape_cast %25 : vector<1x10x16x384xbf16> to vector<160x384xbf16>
    %c384 = arith.constant 384 : index
    %c0_22 = arith.constant 0 : index
    %27 = vector.load %arg3[%c384, %c0_22] : memref<1152x128xbf16, #tpu.memory_space<vmem>>, vector<384x128xbf16>
    %cst_23 = arith.constant dense<0.000000e+00> : vector<160x128xf32>
    %28 = tpu.matmul %26, %27, %cst_23 {dimension_numbers = #tpu.dot_dimension_numbers<[1], [0], [0], [1], [0, 0, 1, 1], [], []>} : vector<160x384xbf16>, vector<384x128xbf16>, vector<160x128xf32> -> vector<160x128xf32>
    %29 = arith.addf %15, %28 : vector<160x128xf32>
    %c2_i32 = arith.constant 2 : i32
    %30 = arith.addi %0, %c2_i32 : i32
    %c0_24 = arith.constant 0 : index
    %31 = arith.index_cast %30 : i32 to index
    %c0_25 = arith.constant 0 : index
    %c0_26 = arith.constant 0 : index
    %32 = vector.load %arg2[%c0_24, %31, %c0_25, %c0_26] : memref<1x20x18x128xbf16, #tpu.memory_space<vmem>>, vector<1x10x16x128xbf16>
    %c2_i32_27 = arith.constant 2 : i32
    %33 = arith.addi %0, %c2_i32_27 : i32
    %c0_28 = arith.constant 0 : index
    %34 = arith.index_cast %33 : i32 to index
    %c1_29 = arith.constant 1 : index
    %c0_30 = arith.constant 0 : index
    %35 = vector.load %arg2[%c0_28, %34, %c1_29, %c0_30] : memref<1x20x18x128xbf16, #tpu.memory_space<vmem>>, vector<1x10x16x128xbf16>
    %c2_i32_31 = arith.constant 2 : i32
    %36 = arith.addi %0, %c2_i32_31 : i32
    %c0_32 = arith.constant 0 : index
    %37 = arith.index_cast %36 : i32 to index
    %c2_33 = arith.constant 2 : index
    %c0_34 = arith.constant 0 : index
    %38 = vector.load %arg2[%c0_32, %37, %c2_33, %c0_34] : memref<1x20x18x128xbf16, #tpu.memory_space<vmem>>, vector<1x10x16x128xbf16>
    %39 = tpu.concatenate %32, %35, %38 in 3 : vector<1x10x16x128xbf16>, vector<1x10x16x128xbf16>, vector<1x10x16x128xbf16> -> vector<1x10x16x384xbf16>
    %40 = vector.shape_cast %39 : vector<1x10x16x384xbf16> to vector<160x384xbf16>
    %c768 = arith.constant 768 : index
    %c0_35 = arith.constant 0 : index
    %41 = vector.load %arg3[%c768, %c0_35] : memref<1152x128xbf16, #tpu.memory_space<vmem>>, vector<384x128xbf16>
    %cst_36 = arith.constant dense<0.000000e+00> : vector<160x128xf32>
    %42 = tpu.matmul %40, %41, %cst_36 {dimension_numbers = #tpu.dot_dimension_numbers<[1], [0], [0], [1], [0, 0, 1, 1], [], []>} : vector<160x384xbf16>, vector<384x128xbf16>, vector<160x128xf32> -> vector<160x128xf32>
    %43 = arith.addf %29, %42 : vector<160x128xf32>
    %c0_37 = arith.constant 0 : index
    %c0_38 = arith.constant 0 : index
    %44 = vector.load %arg5[%c0_37, %c0_38] : memref<1x128xf32, #tpu.memory_space<vmem>>, vector<1x128xf32>
    %45 = vector.broadcast %44 : vector<1x128xf32> to vector<160x128xf32>
    %46 = arith.addf %43, %45 : vector<160x128xf32>
    %cst_39 = arith.constant 0.000000e+00 : f32
    %47 = vector.broadcast %cst_39 : f32 to vector<160x128xf32>
    %48 = arith.maximumf %46, %47 : vector<160x128xf32>
    %cst_40 = arith.constant 0.000000e+00 : bf16
    %49 = vector.broadcast %cst_40 : bf16 to vector<1x1x18x128xbf16>
    %cst_41 = arith.constant 0.000000e+00 : bf16
    %50 = vector.broadcast %cst_41 : bf16 to vector<1x10x1x128xbf16>
    %51 = vector.shape_cast %48 : vector<160x128xf32> to vector<1x10x16x128xf32>
    %52 = arith.truncf %51 : vector<1x10x16x128xf32> to vector<1x10x16x128xbf16>
    %c0_42 = arith.constant 0 : index
    %c0_43 = arith.constant 0 : index
    %c1_44 = arith.constant 1 : index
    %c0_45 = arith.constant 0 : index
    %53 = vector.load %arg10[%c0_42, %c0_43, %c1_44, %c0_45] : memref<1x10x18x128xbf16, #tpu.memory_space<vmem>>, vector<1x10x16x128xbf16>
    tpu.vector_store %arg10[%c0_42, %c0_43, %c1_44, %c0_45], %52 {strides = array<i32>} : memref<1x10x18x128xbf16, #tpu.memory_space<vmem>>, vector<1x10x16x128xbf16>,
    %c0_46 = arith.constant 0 : index
    %c0_47 = arith.constant 0 : index
    %c0_48 = arith.constant 0 : index
    %c0_49 = arith.constant 0 : index
    %54 = vector.load %arg10[%c0_46, %c0_47, %c0_48, %c0_49] : memref<1x10x18x128xbf16, #tpu.memory_space<vmem>>, vector<1x10x1x128xbf16>
    tpu.vector_store %arg10[%c0_46, %c0_47, %c0_48, %c0_49], %50 {strides = array<i32>} : memref<1x10x18x128xbf16, #tpu.memory_space<vmem>>, vector<1x10x1x128xbf16>,
    %c0_50 = arith.constant 0 : index
    %c0_51 = arith.constant 0 : index
    %c17 = arith.constant 17 : index
    %c0_52 = arith.constant 0 : index
    %55 = vector.load %arg10[%c0_50, %c0_51, %c17, %c0_52] : memref<1x10x18x128xbf16, #tpu.memory_space<vmem>>, vector<1x10x1x128xbf16>
    tpu.vector_store %arg10[%c0_50, %c0_51, %c17, %c0_52], %50 {strides = array<i32>} : memref<1x10x18x128xbf16, #tpu.memory_space<vmem>>, vector<1x10x1x128xbf16>,
    %c0_i32_53 = arith.constant 0 : i32
    %56 = arith.cmpi eq, %arg1, %c0_i32_53 : i32
    %57 = arith.extui %56 : i1 to i32
    %c0_i32_54 = arith.constant 0 : i32
    %58 = arith.cmpi ne, %57, %c0_i32_54 : i32
    scf.if %58 {
      %c0_119 = arith.constant 0 : index
      %c0_120 = arith.constant 0 : index
      %c0_121 = arith.constant 0 : index
      %c0_122 = arith.constant 0 : index
      %104 = vector.load %arg10[%c0_119, %c0_120, %c0_121, %c0_122] : memref<1x10x18x128xbf16, #tpu.memory_space<vmem>>, vector<1x1x18x128xbf16>
      tpu.vector_store %arg10[%c0_119, %c0_120, %c0_121, %c0_122], %49 {strides = array<i32>} : memref<1x10x18x128xbf16, #tpu.memory_space<vmem>>, vector<1x1x18x128xbf16>,
    } else {
    }
    %c1_i32_55 = arith.constant 1 : i32
    %59 = arith.cmpi eq, %arg1, %c1_i32_55 : i32
    %60 = arith.extui %59 : i1 to i32
    %c0_i32_56 = arith.constant 0 : i32
    %61 = arith.cmpi ne, %60, %c0_i32_56 : i32
    scf.if %61 {
      %c0_119 = arith.constant 0 : index
      %c9 = arith.constant 9 : index
      %c0_120 = arith.constant 0 : index
      %c0_121 = arith.constant 0 : index
      %104 = vector.load %arg10[%c0_119, %c9, %c0_120, %c0_121] : memref<1x10x18x128xbf16, #tpu.memory_space<vmem>>, vector<1x1x18x128xbf16>
      tpu.vector_store %arg10[%c0_119, %c9, %c0_120, %c0_121], %49 {strides = array<i32>} : memref<1x10x18x128xbf16, #tpu.memory_space<vmem>>, vector<1x1x18x128xbf16>,
    } else {
    }
    %cst_57 = arith.constant 0.000000e+00 : f32
    %62 = vector.broadcast %cst_57 : f32 to vector<128x128xf32>
    %c0_58 = arith.constant 0 : index
    %c0_59 = arith.constant 0 : index
    %c0_60 = arith.constant 0 : index
    %c0_61 = arith.constant 0 : index
    %63 = vector.load %arg10[%c0_58, %c0_59, %c0_60, %c0_61] : memref<1x10x18x128xbf16, #tpu.memory_space<vmem>>, vector<1x8x16x128xbf16>
    %c0_62 = arith.constant 0 : index
    %c0_63 = arith.constant 0 : index
    %c1_64 = arith.constant 1 : index
    %c0_65 = arith.constant 0 : index
    %64 = vector.load %arg10[%c0_62, %c0_63, %c1_64, %c0_65] : memref<1x10x18x128xbf16, #tpu.memory_space<vmem>>, vector<1x8x16x128xbf16>
    %c0_66 = arith.constant 0 : index
    %c0_67 = arith.constant 0 : index
    %c2_68 = arith.constant 2 : index
    %c0_69 = arith.constant 0 : index
    %65 = vector.load %arg10[%c0_66, %c0_67, %c2_68, %c0_69] : memref<1x10x18x128xbf16, #tpu.memory_space<vmem>>, vector<1x8x16x128xbf16>
    %66 = tpu.concatenate %63, %64, %65 in 3 : vector<1x8x16x128xbf16>, vector<1x8x16x128xbf16>, vector<1x8x16x128xbf16> -> vector<1x8x16x384xbf16>
    %67 = vector.shape_cast %66 : vector<1x8x16x384xbf16> to vector<128x384xbf16>
    %c0_70 = arith.constant 0 : index
    %c0_71 = arith.constant 0 : index
    %68 = vector.load %arg4[%c0_70, %c0_71] : memref<1152x128xbf16, #tpu.memory_space<vmem>>, vector<384x128xbf16>
    %cst_72 = arith.constant dense<0.000000e+00> : vector<128x128xf32>
    %69 = tpu.matmul %67, %68, %cst_72 {dimension_numbers = #tpu.dot_dimension_numbers<[1], [0], [0], [1], [0, 0, 1, 1], [], []>} : vector<128x384xbf16>, vector<384x128xbf16>, vector<128x128xf32> -> vector<128x128xf32>
    %70 = arith.addf %62, %69 : vector<128x128xf32>
    %c0_73 = arith.constant 0 : index
    %c1_74 = arith.constant 1 : index
    %c0_75 = arith.constant 0 : index
    %c0_76 = arith.constant 0 : index
    %71 = vector.load %arg10[%c0_73, %c1_74, %c0_75, %c0_76] : memref<1x10x18x128xbf16, #tpu.memory_space<vmem>>, vector<1x8x16x128xbf16>
    %c0_77 = arith.constant 0 : index
    %c1_78 = arith.constant 1 : index
    %c1_79 = arith.constant 1 : index
    %c0_80 = arith.constant 0 : index
    %72 = vector.load %arg10[%c0_77, %c1_78, %c1_79, %c0_80] : memref<1x10x18x128xbf16, #tpu.memory_space<vmem>>, vector<1x8x16x128xbf16>
    %c0_81 = arith.constant 0 : index
    %c1_82 = arith.constant 1 : index
    %c2_83 = arith.constant 2 : index
    %c0_84 = arith.constant 0 : index
    %73 = vector.load %arg10[%c0_81, %c1_82, %c2_83, %c0_84] : memref<1x10x18x128xbf16, #tpu.memory_space<vmem>>, vector<1x8x16x128xbf16>
    %74 = tpu.concatenate %71, %72, %73 in 3 : vector<1x8x16x128xbf16>, vector<1x8x16x128xbf16>, vector<1x8x16x128xbf16> -> vector<1x8x16x384xbf16>
    %75 = vector.shape_cast %74 : vector<1x8x16x384xbf16> to vector<128x384xbf16>
    %c384_85 = arith.constant 384 : index
    %c0_86 = arith.constant 0 : index
    %76 = vector.load %arg4[%c384_85, %c0_86] : memref<1152x128xbf16, #tpu.memory_space<vmem>>, vector<384x128xbf16>
    %cst_87 = arith.constant dense<0.000000e+00> : vector<128x128xf32>
    %77 = tpu.matmul %75, %76, %cst_87 {dimension_numbers = #tpu.dot_dimension_numbers<[1], [0], [0], [1], [0, 0, 1, 1], [], []>} : vector<128x384xbf16>, vector<384x128xbf16>, vector<128x128xf32> -> vector<128x128xf32>
    %78 = arith.addf %70, %77 : vector<128x128xf32>
    %c0_88 = arith.constant 0 : index
    %c2_89 = arith.constant 2 : index
    %c0_90 = arith.constant 0 : index
    %c0_91 = arith.constant 0 : index
    %79 = vector.load %arg10[%c0_88, %c2_89, %c0_90, %c0_91] : memref<1x10x18x128xbf16, #tpu.memory_space<vmem>>, vector<1x8x16x128xbf16>
    %c0_92 = arith.constant 0 : index
    %c2_93 = arith.constant 2 : index
    %c1_94 = arith.constant 1 : index
    %c0_95 = arith.constant 0 : index
    %80 = vector.load %arg10[%c0_92, %c2_93, %c1_94, %c0_95] : memref<1x10x18x128xbf16, #tpu.memory_space<vmem>>, vector<1x8x16x128xbf16>
    %c0_96 = arith.constant 0 : index
    %c2_97 = arith.constant 2 : index
    %c2_98 = arith.constant 2 : index
    %c0_99 = arith.constant 0 : index
    %81 = vector.load %arg10[%c0_96, %c2_97, %c2_98, %c0_99] : memref<1x10x18x128xbf16, #tpu.memory_space<vmem>>, vector<1x8x16x128xbf16>
    %82 = tpu.concatenate %79, %80, %81 in 3 : vector<1x8x16x128xbf16>, vector<1x8x16x128xbf16>, vector<1x8x16x128xbf16> -> vector<1x8x16x384xbf16>
    %83 = vector.shape_cast %82 : vector<1x8x16x384xbf16> to vector<128x384xbf16>
    %c768_100 = arith.constant 768 : index
    %c0_101 = arith.constant 0 : index
    %84 = vector.load %arg4[%c768_100, %c0_101] : memref<1152x128xbf16, #tpu.memory_space<vmem>>, vector<384x128xbf16>
    %cst_102 = arith.constant dense<0.000000e+00> : vector<128x128xf32>
    %85 = tpu.matmul %83, %84, %cst_102 {dimension_numbers = #tpu.dot_dimension_numbers<[1], [0], [0], [1], [0, 0, 1, 1], [], []>} : vector<128x384xbf16>, vector<384x128xbf16>, vector<128x128xf32> -> vector<128x128xf32>
    %86 = arith.addf %78, %85 : vector<128x128xf32>
    %c0_103 = arith.constant 0 : index
    %c0_104 = arith.constant 0 : index
    %87 = vector.load %arg6[%c0_103, %c0_104] : memref<1x128xf32, #tpu.memory_space<vmem>>, vector<1x128xf32>
    %88 = vector.broadcast %87 : vector<1x128xf32> to vector<128x128xf32>
    %89 = arith.addf %86, %88 : vector<128x128xf32>
    %c2_i32_105 = arith.constant 2 : i32
    %90 = arith.addi %0, %c2_i32_105 : i32
    %c0_106 = arith.constant 0 : index
    %91 = arith.index_cast %90 : i32 to index
    %c1_107 = arith.constant 1 : index
    %c0_108 = arith.constant 0 : index
    %92 = vector.load %arg2[%c0_106, %91, %c1_107, %c0_108] : memref<1x20x18x128xbf16, #tpu.memory_space<vmem>>, vector<1x8x16x128xbf16>
    %93 = vector.shape_cast %92 : vector<1x8x16x128xbf16> to vector<128x128xbf16>
    %c0_109 = arith.constant 0 : index
    %c0_110 = arith.constant 0 : index
    %94 = vector.load %arg7[%c0_109, %c0_110] : memref<128x128xbf16, #tpu.memory_space<vmem>>, vector<128x128xbf16>
    %cst_111 = arith.constant dense<0.000000e+00> : vector<128x128xf32>
    %95 = tpu.matmul %93, %94, %cst_111 {dimension_numbers = #tpu.dot_dimension_numbers<[1], [0], [0], [1], [0, 0, 1, 1], [], []>} : vector<128x128xbf16>, vector<128x128xbf16>, vector<128x128xf32> -> vector<128x128xf32>
    %c0_112 = arith.constant 0 : index
    %c0_113 = arith.constant 0 : index
    %96 = vector.load %arg8[%c0_112, %c0_113] : memref<1x128xf32, #tpu.memory_space<vmem>>, vector<1x128xf32>
    %97 = vector.broadcast %96 : vector<1x128xf32> to vector<128x128xf32>
    %98 = arith.addf %95, %97 : vector<128x128xf32>
    %99 = arith.addf %89, %98 : vector<128x128xf32>
    %cst_114 = arith.constant 0.000000e+00 : f32
    %100 = vector.broadcast %cst_114 : f32 to vector<128x128xf32>
    %101 = arith.maximumf %99, %100 : vector<128x128xf32>
    %102 = vector.shape_cast %101 : vector<128x128xf32> to vector<1x8x16x128xf32>
    %c0_115 = arith.constant 0 : index
    %c0_116 = arith.constant 0 : index
    %c0_117 = arith.constant 0 : index
    %c0_118 = arith.constant 0 : index
    %103 = vector.load %arg9[%c0_115, %c0_116, %c0_117, %c0_118] : memref<1x8x16x128xf32, #tpu.memory_space<vmem>>, vector<1x8x16x128xf32>
    tpu.vector_store %arg9[%c0_115, %c0_116, %c0_117, %c0_118], %102 {strides = array<i32>} : memref<1x8x16x128xf32, #tpu.memory_space<vmem>>, vector<1x8x16x128xf32>,
    return
  }
  func.func @transform_0(%arg0: i32, %arg1: i32) -> (i32, i32, i32, i32) {
    %c0_i32 = arith.constant 0 : i32
    %c0_i32_0 = arith.constant 0 : i32
    %c0_i32_1 = arith.constant 0 : i32
    %c0_i32_2 = arith.constant 0 : i32
    return %arg0, %c0_i32, %c0_i32_0, %c0_i32_1 : i32, i32, i32, i32
  }
  func.func @transform_1(%arg0: i32, %arg1: i32) -> (i32, i32) {
    %c0_i32 = arith.constant 0 : i32
    %c0_i32_0 = arith.constant 0 : i32
    %c0_i32_1 = arith.constant 0 : i32
    return %c0_i32, %c0_i32_0 : i32, i32
  }
  func.func @transform_2(%arg0: i32, %arg1: i32) -> (i32, i32) {
    %c0_i32 = arith.constant 0 : i32
    %c0_i32_0 = arith.constant 0 : i32
    %c0_i32_1 = arith.constant 0 : i32
    return %c0_i32, %c0_i32_0 : i32, i32
  }
  func.func @transform_3(%arg0: i32, %arg1: i32) -> (i32, i32) {
    %c0_i32 = arith.constant 0 : i32
    %c0_i32_0 = arith.constant 0 : i32
    %c0_i32_1 = arith.constant 0 : i32
    return %c0_i32, %c0_i32_0 : i32, i32
  }
  func.func @transform_4(%arg0: i32, %arg1: i32) -> (i32, i32) {
    %c0_i32 = arith.constant 0 : i32
    %c0_i32_0 = arith.constant 0 : i32
    %c0_i32_1 = arith.constant 0 : i32
    return %c0_i32, %c0_i32_0 : i32, i32
  }
  func.func @transform_5(%arg0: i32, %arg1: i32) -> (i32, i32) {
    %c0_i32 = arith.constant 0 : i32
    %c0_i32_0 = arith.constant 0 : i32
    %c0_i32_1 = arith.constant 0 : i32
    return %c0_i32, %c0_i32_0 : i32, i32
  }
  func.func @transform_6(%arg0: i32, %arg1: i32) -> (i32, i32) {
    %c0_i32 = arith.constant 0 : i32
    %c0_i32_0 = arith.constant 0 : i32
    %c0_i32_1 = arith.constant 0 : i32
    return %c0_i32, %c0_i32_0 : i32, i32
  }
  func.func @transform_7(%arg0: i32, %arg1: i32) -> (i32, i32, i32, i32) {
    %c0_i32 = arith.constant 0 : i32
    %c0_i32_0 = arith.constant 0 : i32
    %c0_i32_1 = arith.constant 0 : i32
    return %arg0, %arg1, %c0_i32, %c0_i32_0 : i32, i32, i32, i32
  }
}

</mosaic_0001>

<bundles_post_ra>
// kernel: tpu_custom_call.1
= control target key start
LH: loop header
LB: loop body
LE: loop exit
PB: predicated region body
PF: predicated region fallthrough
CT: control target
= control target key end

     0   :  { %s9393_s0 = inlined_call_operand.vmem [shape: bf16[2,20,18,128], index: 0, kind: input, shape index: {}]   ;;  %s9394_s1 = inlined_call_operand.vmem [shape: bf16[1152,128], index: 1, kind: input, shape index: {}]   ;;  %s9395_s2 = inlined_call_operand.hbm [shape: bf16[1152,128], index: 2, kind: input, shape index: {}]   ;;  %s9396_s3 = inlined_call_operand.vmem [shape: f32[1,128], index: 3, kind: input, shape index: {}]   ;;  %s9397_s4 = inlined_call_operand.vmem [shape: f32[1,128], index: 4, kind: input, shape index: {}]   ;;  %s9398_s5 = inlined_call_operand.vmem [shape: bf16[128,128], index: 5, kind: input, shape index: {}]   ;;  %s9399_s6 = inlined_call_operand.vmem [shape: f32[1,128], index: 6, kind: input, shape index: {}]   ;;  %s9400_s7 = inlined_call_operand.hbm [shape: f32[2,16,16,128], index: 7, kind: output, shape index: {}]  }
   0x1   :  { %9408 = sst [smem:[#allocation11_spill]] %s9395_s2 }
   0x2   :  { %12 = vsyncpa [#allocation4], 0 }
   0x3   :  { %13 = vsyncpa [#allocation5], 0 }
   0x4   :  { %15 = vsyncpa [#allocation5 + $0x1], 0  ;;  %s7713_s24 = smov 0   ;;  %s7715_s25 = smov 0  }
   0x5   :  { %s7717_s26 = smov 0   ;;  %s7719_s27 = smov 0  }
   0x6   :  { %s7721_s28 = smov 0   ;;  %s7723_s29 = smov 0  }
   0x7   :  { %s7725_s30 = smov 0   ;;  %s7727_s8 = smov 0  }
   0x8 LB: > { %s5620_s9 = sadd.s32 4294967295, %s7663_s8   ;;  %s5621_s10 = sadd.s32 4294967294, %s7663_s8   ;;  %s7663_s8 = sphi %s7727_s8, %s21_s8   ;;  %s7659_s30 = sphi %s7725_s30, %s9440_s30   ;;  %s7655_s29 = sphi %s7723_s29, %s9439_s29   ;;  %s7651_s28 = sphi %s7721_s28, %s9438_s28   ;;  %s7647_s27 = sphi %s7719_s27, %s9437_s27   ;;  %s7643_s26 = sphi %s7717_s26, %s9436_s26   ;;  %s7639_s25 = sphi %s7715_s25, %s9435_s25   ;;  %s7635_s24 = sphi %s7713_s24, %s9434_s24  }
   0x9   : > { %s30_s11 = sadd.s32 1, %s7655_s29  ;;  %s33_s12 = sadd.s32 1, %s7659_s30 }
   0xa   : > { %p31_p0 = scmp.ge.s32.totalorder %s30_s11, 2  ;;  %s194_s13 = sadd.s32 1, %s7643_s26 }
   0xb   : > { %p204_p1 = scmp.ne.s32.totalorder %s7643_s26, %s7639_s25  ;;  %p205_p2 = scmp.eq.s32.totalorder %s5620_s9, 3 }
   0xc   : > { %s9442_s11 = smov (%p31_p0, %s30_s11), 0  ;;  %s9444_s12 = smov (!%p31_p0, %s33_s12), %s7659_s30 }
   0xd   : > { %9409 = sst [smem:[#allocation9_spill]] %s9442_s11  ;;  %s190_s14 = ssub.s32 %s7655_s29, %s9442_s11 }
   0xe   : > { %p7765_p3 = por %p205_p2, %p204_p1  ;;  %p35_p4 = scmp.ge.s32.totalorder %s9444_s12, 2 }
   0xf   : > { %p210_p5 = scmp.ne.s32.totalorder %s7639_s25, %s7635_s24  ;;  %p211_p6 = scmp.eq.s32.totalorder %s5621_s10, 3 }
  0x10   : > { %s9410_s15 = scalar_select %p7765_p3, 1, 0 }
  0x11   : > { %p5622_p7 = scmp.ge.s32.totalorder %s7663_s8, 1  ;;  %s9446_s12 = smov (%p35_p4, %s9444_s12), 0 }
  0x12   : > { %9411 = sst [smem:[#allocation10_spill]] %s9446_s12  ;;  %p7774_p8 = por %p211_p6, %p210_p5 }
  0x13   : > { %p218_p9 = scmp.lt.s32.totalorder %s7663_s8, 5  ;;  %s189_s17 = ssub.s32 %s7659_s30, %s9446_s12 }
  0x14   : > { %s9412_s16 = scalar_select %p7774_p8, 1, 0 }
  0x15   : > { %s191_s18 = sor.u32 %s190_s14, %s189_s17  ;;  %p7781_p10 = pnand %p5622_p7, %p218_p9 }
  0x16   : > { %p192_p11 = scmp.eq.s32.totalorder %s191_s18, 0  ;;  %p7785_p12 = scmp.eq.s32.totalorder %s5620_s9, 0 }
  0x17   : > { %s9413_s19 = scalar_select %p7781_p10, 1, 0 }
  0x18   : > { %s9414_s20 = scalar_select %p7785_p12, 1, 0 }
  0x19   : > { %p7141_p13 = pneg %p7781_p10  ;;  %s7665_s22 = smov [#allocation3]  }
  0x1a   : > { %s7792_s21 = scalar_select %p192_p11, %s7643_s26, %s194_s13  }
  0x1b   : > { %s233_s23 = sshll.u32 %s7665_s22, 4  ;;  %p7796_p0 = pnand %p7785_p12, %p7141_p13  ;;  %s234_s23 = int_to_ptr.vmem [resolvable:$true] %s233_s23 }
  0x1c   : > { %s9416_s2 = sld [smem:[#allocation11_spill]] }
  0x1d   : > { %p7539_p2 = pneg %p7796_p0 }
  0x22   : > { %s7537_s9 = scalar_lea.hbm %s9416_s2, 9216 }
  0x23   : > { %p7538_p1 = scmp.ne.s32.totalorder %s9416_s2, %s7537_s9  ;;  %p7544_p6 = scmp.lt.u32.totalorder %s7537_s9, %s9416_s2 }
  0x25   : > { %p7540_p4 = pnand %p7539_p2, %p7538_p1 }
  0x27   : > { %p7541_p5 = pneg %p7540_p4 }
  0x29   : > { %p7546_p7 = pnand %p7544_p6, %p7541_p5 }
  0x2b   : > { %7549 = shalt.err (!%p7546_p7)
}
  0x2c   : > { %s7550_s11 = scalar_lea.vmem %s234_s23, 9216  ;;  %p7558_p8 = scmp.lt.s32.totalorder %s234_s23, %s234_s23 }
  0x2d   : > { %p7551_p9 = scmp.ne.s32.totalorder %s234_s23, %s7550_s11  ;;  %p7559_p3 = scmp.lt.s32.totalorder %s7550_s11, %s7550_s11 }
  0x2f   : > { %p7553_p11 = pnand %p7551_p9, %p7539_p2  ;;  %p7560_p12 = por %p7559_p3, %p7558_p8 }
  0x31   : > { %p7554_p13 = pneg %p7553_p11 }
  0x33   : > { %p7561_p10 = pnand %p7560_p12, %p7554_p13 }
  0x35   : > { %7564 = shalt.err (!%p7561_p10)
}
  0x36   : > { %s7666_s12 = smov 64   ;;  %s7667_s14 = smov 4  }
  0x37   : > { %7144 = dma.hbm_to_vmem [thread:$0]  (!%p7796_p0), %s9416_s2, 9216, %s234_s23, [#allocation4], %s7666_s12, %s7666_s12, %s7667_s14  }
  0x38   : > { %p9417_p1 = scmp.ne.s32.totalorder %s9413_s19, 0 }
  0x39   : > { %p9418_p4 = scmp.ne.s32.totalorder (!%p9417_p1), %s9414_s20, 0 }
  0x3a   : > { %269 = sbr.rel (%p9417_p1) target bundleno = 1006 (0x3ee), region = 48 }
  0x41   : > { %7626 = dma.done.wait (%p9418_p4), [#allocation4], 9216  }
  0x42   : > { %7628 = vsyncadd (%p9418_p4), [#allocation4], 4294958080  ;;  %s9407_s11 = sand.u32 1, %s7639_s25   ;;  %v7223_v0 = vld [vmem:[%s9394_s1 + $0x100] sm:$0xff]   ;;  %v7226_v3 = vld [vmem:[%s9394_s1 + $0x108] sm:$0xff]   ;;  %p301_p3 = scmp.lt.s32.totalorder %s7651_s28, 1 }
  0x43   : > { %s7825_s9 = sshll.u32 %s9407_s11, 7  ;;  %v7224_v1 = vld [vmem:[%s9394_s1 + $0x140] sm:$0xff]   ;;  %6116 = vmatprep.subr.bf16.mxu0 %v7223_v0  ;;  %v7227_v4 = vld [vmem:[%s9394_s1 + $0x148] sm:$0xff]   ;;  %v7229_v6 = vld [vmem:[%s9394_s1 + $0x110] sm:$0xff]   ;;  %s6094_s11 = smul.u32 96, %s7647_s27  ;;  %vm603_vm1 = vcmask 1046528  }
  0x44   : > { %v7225_v2 = vld [vmem:[%s9394_s1 + $0xc0] sm:$0xff]   ;;  %6654 = vmatprep.subr.bf16.mxu1 %v7224_v1  ;;  %v7228_v5 = vld [vmem:[%s9394_s1 + $0xc8] sm:$0xff]   ;;  %v7230_v7 = vld [vmem:[%s9394_s1 + $0x150] sm:$0xff]   ;;  %s302_s23 = scalar_select %p301_p3, %s7651_s28, 1  ;;  %vm442_vm0 = vsmask.f32 7424 }
  0x45   : > { %6117 = vmatpush3.bf16.msra.mxu0 %v7225_v2  ;;  %6655 = vmatpush3.bf16.msra.mxu1 %v7224_v1  ;;  %v7231_v8 = vld [vmem:[%s9394_s1 + $0xd0] sm:$0xff]   ;;  %v7232_v9 = vld [vmem:[%s9394_s1 + $0x118] sm:$0xff]   ;;  %v7235_v12 = vld [vmem:[%s9394_s1 + $0x120] sm:$0xff]   ;;  %vm2896_vm2 = vcmask 1043456   ;;  %vm2897_vm3 = vsmask.f32 7938 }
  0x46   : > { %6118 = vmatprep.subr.bf16.mxu0 %v7226_v3  ;;  %6656 = vmatprep.subr.bf16.mxu1 %v7227_v4  ;;  %v7233_v10 = vld [vmem:[%s9394_s1 + $0x158] sm:$0xff]   ;;  %v7236_v13 = vld [vmem:[%s9394_s1 + $0x160] sm:$0xff]   ;;  %s7134_s18 = smul.u32 240, %s302_s23  ;;  %v7238_v15 = vld [vmem:[%s9394_s1 + $0x128] sm:$0xff]   ;;  %vm2693_vm4 = vsmask.f32 256 }
  0x47   : > { %v7234_v11 = vld [vmem:[%s9394_s1 + $0xd8] sm:$0xff]   ;;  %v7237_v14 = vld [vmem:[%s9394_s1 + $0xe0] sm:$0xff]   ;;  %v7239_v16 = vld [vmem:[%s9394_s1 + $0x168] sm:$0xff]   ;;  %vm2903_vm5 = vcmask 1040384   ;;  %vm2694_vm6 = vsmask.f32 4368 }
  0x48   : > { %s305_s23 = scalar_lea.vmem %s9393_s0, %s7134_s18  ;;  %v7240_v17 = vld [vmem:[%s9394_s1 + $0xe8] sm:$0xff]   ;;  %v7241_v18 = vld [vmem:[%s9394_s1 + $0x130] sm:$0xff]   ;;  %v7244_v21 = vld [vmem:[%s9394_s1 + $0x138] sm:$0xff]   ;;  %s8794_s13 = scalar_lea.vmem [#allocation6], %s7825_s9 }
  0x49   : > { %6119 = vmatpush3.bf16.msra.mxu0 %v7228_v5  ;;  %6657 = vmatpush3.bf16.msra.mxu1 %v7227_v4  ;;  %v7242_v19 = vld [vmem:[%s9394_s1 + $0x170] sm:$0xff]   ;;  %s7893_s20 = scalar_lea.vmem %s305_s23, %s6094_s11  ;;  %v7245_v24 = vld [vmem:[%s9394_s1 + $0x178] sm:$0xff]   ;;  %v7253_v37 = vld [vmem:[%s9394_s1 + $0x40] sm:$0xff]   ;;  %p5899_p8 = scmp.ne.s32.totalorder %s7647_s27, 0 }
  0x4a   : > { %6120 = vmatprep.subr.bf16.mxu0 %v7229_v6  ;;  %6658 = vmatprep.subr.bf16.mxu1 %v7230_v7  ;;  %v7243_v20 = vld [vmem:[%s9394_s1 + $0xf0] sm:$0xff]   ;;  %v5664_v22 = vld [vmem:[%s7893_s20 + $0xc] sm:$0xf]  ;;  %v7246_v28 = vld [vmem:[%s9394_s1 + $0xf8] sm:$0xff]  }
  0x4b   : > { %v5665_v23 = vld [vmem:[%s7893_s20 + $0x10] sm:$0xf]  ;;  %v7248_v26 = vld [vmem:[%s7893_s20 + $0x14] ss:$0 sps:$4 sm:$0x11]   ;;  %v7254_v54 = vld [vmem:[%s9394_s1] sm:$0xff]  }
  0x4c   : > { %v5704_v25 = vcombine.low %v5664_v22, %v5665_v23  ;;  %v5694_v27 = vld [vmem:[%s7893_s20 + $0xc] sm:$0xe]  ;;  %v5666_v30 = vld [vmem:[%s7893_s20 + $0x18] sm:$0xf]  ;;  %v5667_v31 = vld [vmem:[%s7893_s20 + $0x1c] sm:$0xf] }
  0x4d   : > { %6121 = vmatpush3.bf16.msra.mxu0 %v7231_v8  ;;  %6659 = vmatpush3.bf16.msra.mxu1 %v7230_v7  ;;  %v5724_v29 = vcombine.low %v5694_v27, %v5665_v23  ;;  %v834_v34 = vshll.u32 %v7248_v26, 16  ;;  %v987_v35 = vrot.slane %v7248_v26, 1  ;;  %v5695_v36 = vld [vmem:[%s7893_s20 + $0x18] sm:$0xe]  ;;  %v7917_v39 = vcombine.low %v5666_v30, %v5667_v31  ;;  %v5668_v51 = vld [vmem:[%s7893_s20 + $0x24] sm:$0xf]  ;;  %vm8615_vm7 = vmand %vm2896_vm2, %vm2897_vm3 }
  0x4e   : > { %6122 = vmatprep.subr.bf16.mxu0 %v7232_v9  ;;  %6660 = vmatprep.subr.bf16.mxu1 %v7233_v10  ;;  %v827_v32 = vshrl.u32 %v5704_v25, 16  ;;  %v829_v33 = vshll.u32 %v5704_v25, 16  ;;  %v7251_v40 = vld [vmem:[%s7893_s20 + $0x20] ss:$0 sps:$4 sm:$0x11]   ;;  %v5725_v41 = vcombine.low %v5695_v36, %v5667_v31  ;;  %v7261_v61 = vld [vmem:[%s9394_s1 + $0x48] sm:$0xff]   ;;  %vm8624_vm8 = vmand %vm2903_vm5, %vm2693_vm4 }
  0x4f   : > { %v986_v38 = vrot.slane %v5724_v29, 1  ;;  %v836_v43 = vrot.slane %v834_v34, 1  ;;  %v990_v46 = vrot.slane %v7251_v40, 1  ;;  %v839_v47 = vshrl.u32 %v7917_v39, 16  ;;  %v5669_v52 = vld [vmem:[%s7893_s20 + $0x28] sm:$0xf]  ;;  %vm8632_vm9 = vmor %vm2693_vm4, %vm2694_vm6 }
  0x50   : > { %v831_v42 = vrot.slane %v829_v33, 1  ;;  %v989_v45 = vrot.slane %v5725_v41, 1  ;;  %v841_v49 = vshll.u32 %v7917_v39, 16  ;;  %v846_v50 = vshll.u32 %v7251_v40, 16  ;;  %v5696_v55 = vld [vmem:[%s7893_s20 + $0x24] sm:$0xe]  ;;  %vm8653_vm10 = vmand %vm2903_vm5, %vm2897_vm3 }
  0x51   : > { %6123 = vmatpush3.bf16.msra.mxu0 %v7234_v11  ;;  %6661 = vmatpush3.bf16.msra.mxu1 %v7233_v10  ;;  %v988_v44 = vsel %vm603_vm1, %v986_v38, %v987_v35  ;;  %v7256_v59 = vld [vmem:[%s7893_s20 + $0x2c] ss:$0 sps:$4 sm:$0x11]   ;;  %v5726_v60 = vcombine.low %v5696_v55, %v5669_v52  ;;  %v7935_v62 = vcombine.low %v5668_v51, %v5669_v52  ;;  %v5671_v63 = vld [vmem:[%s7893_s20 + $0x34] sm:$0xf]  ;;  %v7271_v31 = vld [vmem:[%s9394_s1 + $0x58] sm:$0xff]  }
  0x52   : > { %6124 = vmatprep.subr.bf16.mxu0 %v7235_v12  ;;  %6662 = vmatprep.subr.bf16.mxu1 %v7236_v13  ;;  %v832_v48 = vor.u32 %v831_v42, %v827_v32  ;;  %v991_v53 = vsel %vm603_vm1, %v989_v45, %v990_v46  ;;  %v843_v57 = vrot.slane %v841_v49, 1  ;;  %v848_v58 = vrot.slane %v846_v50, 1  ;;  %v5697_v0 = vld [vmem:[%s7893_s20 + $0x30] sm:$0xe]  ;;  %v7262_v5 = vld [vmem:[%s9394_s1 + $0x8] sm:$0xff]   ;;  %v7272_v36 = vld [vmem:[%s9394_s1 + $0x18] sm:$0xff]  }
  0x53   : > { %6670 = vmatprep.mubr.bf16.mxu1 %v988_v44  ;;  %v992_v2 = vrot.slane %v5726_v60, 1  ;;  %v993_v3 = vrot.slane %v7256_v59, 1  ;;  %v7259_v4 = vld [vmem:[%s7893_s20 + $0x38] ss:$0 sps:$4 sm:$0x11]   ;;  %v5727_v6 = vcombine.low %v5697_v0, %v5671_v63  ;;  %v851_v10 = vshrl.u32 %v7935_v62, 16 }
  0x54   : > { %v837_v56 = vsel %vm442_vm0, %v832_v48, %v836_v43  ;;  %v844_v1 = vor.u32 %v843_v57, %v839_v47  ;;  %v996_v9 = vrot.slane %v7259_v4, 1  ;;  %v853_v12 = vshll.u32 %v7935_v62, 16  ;;  %v7270_v23 = vld [vmem:[%s9394_s1 + $0x10] sm:$0xff]   ;;  %v7985_v42 = vld [vmem:[%s7893_s20 + $0x58] sm:$0xf]  ;;  %v7279_v49 = vld [vmem:[%s9394_s1 + $0x60] sm:$0xff]  }
  0x55   : > { %6125 = vmatpush3.bf16.msra.mxu0 %v7237_v14  ;;  %6663 = vmatpush3.bf16.msra.mxu1 %v7236_v13  ;;  %v994_v8 = vsel %vm603_vm1, %v992_v2, %v993_v3  ;;  %v995_v11 = vrot.slane %v5727_v6, 1  ;;  %v858_v13 = vshll.u32 %v7256_v59, 16  ;;  %v5673_v14 = vld [vmem:[%s7893_s20 + $0x40] sm:$0xf]  ;;  %v870_v41 = vshll.u32 %v7259_v4, 16  ;;  %v7282_v0 = vld [vmem:[%s9394_s1 + $0x28] sm:$0xff]  }
  0x56   : > { %6126 = vmatprep.subr.bf16.mxu0 %v7238_v15  ;;  %6664 = vmatprep.subr.bf16.mxu1 %v7239_v16  ;;  %v849_v7 = vsel %vm442_vm0, %v844_v1, %v848_v58  ;;  %v7269_v15 = vld [vmem:[%s9394_s1 + $0x50] sm:$0xff]   ;;  %v7990_v47 = vld [vmem:[%s7893_s20 + $0x5c] ss:$0 sps:$4 sm:$0x11]   ;;  %v7997_v50 = vld [vmem:[%s7893_s20 + $0x64] sm:$0xf] }
  0x57   : > { %1250 = vmatprep.mubr.bf16.mxu0 %v837_v56  ;;  %v7968_v30 = vld [vmem:[%s7893_s20 + $0x50] ss:$0 sps:$4 sm:$0x11]   ;;  %v5700_v43 = vld [vmem:[%s7893_s20 + $0x54] sm:$0xe]  ;;  %v872_v46 = vrot.slane %v870_v41, 1 }
  0x58   : > { %v1002_v35 = vrot.slane %v7968_v30, 1  ;;  %v5730_v48 = vcombine.low %v5700_v43, %v7985_v42  ;;  %v5701_v55 = vld [vmem:[%s7893_s20 + $0x60] sm:$0xe]  ;;  %v8005_v56 = vld [vmem:[%s7893_s20 + $0x68] ss:$0 sps:$4 sm:$0x11]  }
  0x59   : > { %6127 = vmatpush3.bf16.msra.mxu0 %v7240_v17  ;;  %6665 = vmatpush3.bf16.msra.mxu1 %v7239_v16  ;;  %v5670_v16 = vld [vmem:[%s7893_s20 + $0x30] sm:$0xf]  ;;  %v5698_v17 = vld [vmem:[%s7893_s20 + $0x3c] sm:$0xe]  ;;  %v5731_v57 = vcombine.low %v5701_v55, %v7997_v50  ;;  %v7280_v58 = vld [vmem:[%s9394_s1 + $0x20] sm:$0xff]  }
  0x5a   : > { %6128 = vmatprep.subr.bf16.mxu0 %v7241_v18  ;;  %6666 = vmatprep.subr.bf16.mxu1 %v7242_v19  ;;  %v997_v18 = vsel %vm603_vm1, %v995_v11, %v996_v9  ;;  %v5728_v22 = vcombine.low %v5698_v17, %v5673_v14  ;;  %v7964_v26 = vcombine.low %v5670_v16, %v5671_v63  ;;  %v7281_v63 = vld [vmem:[%s9394_s1 + $0x68] sm:$0xff]   ;;  %v7289_v9 = vld [vmem:[%s9394_s1 + $0x70] sm:$0xff]   ;;  %v5703_v16 = vld [vmem:[%s7893_s20 + $0x78] sm:$0xe] }
  0x5b   : > { %v5674_v3 = vld [vmem:[%s7893_s20 + $0x48] sm:$0xf]  ;;  %v8033_v11 = vld [vmem:[%s7893_s20 + $0x74] ss:$0 sps:$4 sm:$0x11]  }
  0x5c   : > { %v865_v40 = vshll.u32 %v7964_v26, 16  ;;  %v8076_v41 = vld [vmem:[%s7893_s20 + $0x50] ss:$0 sps:$4 sm:$0x11]  }
  0x5d   : > { %6129 = vmatpush3.bf16.msra.mxu0 %v7243_v20  ;;  %6667 = vmatpush3.bf16.msra.mxu1 %v7242_v19  ;;  %v855_v19 = vrot.slane %v853_v12, 1  ;;  %v860_v20 = vrot.slane %v858_v13, 1  ;;  %v7290_v13 = vld [vmem:[%s9394_s1 + $0x30] sm:$0xff]  }
  0x5e   : > { %6130 = vmatprep.subr.bf16.mxu0 %v7244_v21  ;;  %6668 = vmatprep.subr.bf16.mxu1 %v7245_v24  ;;  %v7955_v21 = vld [vmem:[%s7893_s20 + $0x44] ss:$0 sps:$4 sm:$0x11]   ;;  %v867_v45 = vrot.slane %v865_v40, 1 }
  0x5f   : > { %v856_v27 = vor.u32 %v855_v19, %v851_v10  ;;  %v999_v29 = vrot.slane %v7955_v21, 1  ;;  %v882_v4 = vshll.u32 %v7955_v21, 16  ;;  %v8050_v21 = vld [vmem:[%s7893_s20 + $0x80] ss:$0 sps:$4 sm:$0x11]  }
  0x61   : > { %6131 = vmatpush3.bf16.msra.mxu0 %v7246_v28  ;;  %6669 = vmatpush3.bf16.msra.mxu1 %v7245_v24  ;;  %v7961_v24 = vld [vmem:[%s7893_s20 + $0x4c] sm:$0xf]  ;;  %v998_v28 = vrot.slane %v5728_v22, 1  ;;  %v861_v33 = vsel %vm442_vm0, %v856_v27, %v860_v20  ;;  %v884_v10 = vrot.slane %v882_v4, 1  ;;  %v1011_v20 = vrot.slane %v8033_v11, 1 }
  0x62   : > { %6210 = vmatprep.subr.bf16.mxu0 %v7253_v37  ;;  %6890 = vmatprep.subr.bf16.mxu1 %v7253_v37  ;;  %v5672_v37 = vld [vmem:[%s7893_s20 + $0x3c] sm:$0xf]  ;;  %v8044_v17 = vcombine.low %v5674_v3, %v7961_v24  ;;  %v1014_v27 = vrot.slane %v8050_v21, 1 }
  0x63   : > { %v1000_v34 = vsel %vm603_vm1, %v998_v28, %v999_v29  ;;  %v7999_v51 = vcombine.low %v5672_v37, %v5673_v14  ;;  %v5678_v28 = vld [vmem:[%s7893_s20 + $0x60] sm:$0xf]  ;;  %v7292_v29 = vld [vmem:[%s9394_s1 + $0x38] sm:$0xff]   ;;  %v8072_v37 = vld [vmem:[%s7893_s20 + $0x4c] sm:$0xf] }
  0x64   : > { %1251 = vmatmul.mubr.bf16.vlgmr.msra.gmra.mrb[0].mxu0 %v5704_v25  ;;  %6671 = vmatmul.mubr.bf16.vlgmr.msra.gmra.mrb[0].mxu1 %v991_v53  ;;  %v5699_v25 = vld [vmem:[%s7893_s20 + $0x48] sm:$0xe]  ;;  %v1004_v53 = vrot.slane %v5730_v48, 1  ;;  %v8085_v48 = vcombine.low %v5678_v28, %v7997_v50  ;;  %v330_v28 = vld [vmem:[%s7893_s20 + $0x6c] sm:$0xf] }
  0x65   : > { %6211 = vmatpush3.bf16.msra.mxu0 %v7254_v54  ;;  %6898 = vmatpush3.bf16.msra.mxu1 %v7254_v54  ;;  %v5729_v32 = vcombine.low %v5699_v25, %v7961_v24  ;;  %v1005_v54 = vrot.slane %v7990_v47, 1  ;;  %v875_v1 = vshrl.u32 %v7999_v51, 16  ;;  %v877_v2 = vshll.u32 %v7999_v51, 16 }
  0x66   : > { %6212 = vmatprep.subr.bf16.mxu0 %v7261_v61  ;;  %6891 = vmatprep.subr.bf16.mxu1 %v7261_v61  ;;  %v1007_v61 = vrot.slane %v5731_v57, 1  ;;  %v911_v3 = vshrl.u32 %v8085_v48, 16  ;;  %v913_v4 = vshll.u32 %v8085_v48, 16 }
  0x67   : > { %1258 = vmatprep.mubr.bf16.mxu0 %v849_v7  ;;  %6674 = vmatprep.mubr.bf16.mxu1 %v994_v8  ;;  %v1001_v38 = vrot.slane %v5729_v32, 1  ;;  %v1006_v60 = vsel %vm603_vm1, %v1004_v53, %v1005_v54  ;;  %v879_v7 = vrot.slane %v877_v2, 1  ;;  %v5702_v8 = vld [vmem:[%s7893_s20 + $0x6c] sm:$0xe]  ;;  %v889_v32 = vshll.u32 %v8044_v17, 16 }
  0x68   : > { %v906_v54 = vshll.u32 %v7990_v47, 16  ;;  %v7296_v47 = vld [vmem:[%s9394_s1 + $0x88] sm:$0xff]  }
  0x69   : > { %6213 = vmatpush3.bf16.msra.mxu0 %v7262_v5  ;;  %6899 = vmatpush3.bf16.msra.mxu1 %v7262_v5  ;;  %v1003_v44 = vsel %vm603_vm1, %v1001_v38, %v1002_v35  ;;  %v8025_v5 = vld [vmem:[%s7893_s20 + $0x70] sm:$0xf]  ;;  %v880_v14 = vor.u32 %v879_v7, %v875_v1  ;;  %v891_v38 = vrot.slane %v889_v32, 1 }
  0x6a   : > { %6892 = vmatprep.subr.bf16.mxu1 %v7269_v15  ;;  %6214 = vmatprep.subr.bf16.mxu0 %v7269_v15  ;;  %v5732_v12 = vcombine.low %v5702_v8, %v8025_v5  ;;  %v8040_v15 = vld [vmem:[%s7893_s20 + $0x7c] sm:$0xf] }
  0x6b   : > { %v5733_v22 = vcombine.low %v5703_v16, %v8040_v15  ;;  %v885_v24 = vsel %vm442_vm0, %v880_v14, %v884_v10  ;;  %v328_v10 = vld [vmem:[%s7893_s20 + $0x60] sm:$0xf]  ;;  %v915_v16 = vrot.slane %v913_v4, 1 }
  0x6c   : > { %1259 = vmatmul.mubr.bf16.gmra.mrb[4].mxu0 %v7917_v39  ;;  %6675 = vmatmul.mubr.bf16.gmra.mrb[4].mxu1 %v997_v18  ;;  %v863_v39 = vshrl.u32 %v7964_v26, 16  ;;  %v5676_v18 = vld [vmem:[%s7893_s20 + $0x54] sm:$0xf]  ;;  %v1010_v19 = vrot.slane %v5732_v12, 1  ;;  %v8112_v12 = vld [vmem:[%s7893_s20 + $0x64] sm:$0xf] }
  0x6d   : > { %6900 = vmatpush3.bf16.msra.mxu1 %v7270_v23  ;;  %6215 = vmatpush3.bf16.msra.mxu0 %v7270_v23  ;;  %v7291_v23 = vld [vmem:[%s9394_s1 + $0x78] sm:$0xff]   ;;  %v8068_v35 = vcombine.low %v5676_v18, %v7985_v42  ;;  %v8116_v18 = vcombine.low %v328_v10, %v8112_v12  ;;  %v7312_v10 = vld [vmem:[%s7893_s20 + $0x14] ss:$0 sps:$4 sm:$0x11]  }
  0x6e   : > { %1266 = vmatprep.mubr.bf16.mxu0 %v861_v33  ;;  %6678 = vmatprep.mubr.bf16.mxu1 %v1000_v34  ;;  %v868_v52 = vor.u32 %v867_v45, %v863_v39  ;;  %v1012_v25 = vsel %vm603_vm1, %v1010_v19, %v1011_v20  ;;  %v894_v33 = vshll.u32 %v7968_v30, 16  ;;  %v324_v34 = vld [vmem:[%s7893_s20 + $0x48] sm:$0xf]  ;;  %v7295_v30 = vld [vmem:[%s9394_s1 + $0x80] sm:$0xff]   ;;  %v523_v45 = vshll.u32 %v8076_v41, 16 }
  0x6f   : > { %6893 = vmatprep.subr.bf16.mxu1 %v7271_v31  ;;  %6216 = vmatprep.subr.bf16.mxu0 %v7271_v31  ;;  %v887_v31 = vshrl.u32 %v8044_v17, 16  ;;  %v5638_v40 = vcombine.low %v324_v34, %v8072_v37  ;;  %v901_v53 = vshll.u32 %v8068_v35, 16  ;;  %v5682_v19 = vld [vmem:[%s7893_s20 + $0x78] sm:$0xf] }
  0x70   : > { %v873_v59 = vsel %vm442_vm0, %v868_v52, %v872_v46  ;;  %v896_v39 = vrot.slane %v894_v33, 1  ;;  %v326_v46 = vld [vmem:[%s7893_s20 + $0x54] sm:$0xf]  ;;  %v899_v52 = vshrl.u32 %v8068_v35, 16 }
  0x71   : > { %6901 = vmatpush3.bf16.msra.mxu1 %v7272_v36  ;;  %6217 = vmatpush3.bf16.msra.mxu0 %v7272_v36  ;;  %v892_v42 = vor.u32 %v891_v38, %v887_v31  ;;  %v516_v43 = vshrl.u32 %v5638_v40, 16  ;;  %v903_v50 = vrot.slane %v901_v53, 1  ;;  %v8133_v31 = vld [vmem:[%s7893_s20 + $0x70] sm:$0xf] }
  0x72   : > { %6894 = vmatprep.subr.bf16.mxu1 %v7279_v49  ;;  %6218 = vmatprep.subr.bf16.mxu0 %v7279_v49  ;;  %v5680_v49 = vld [vmem:[%s7893_s20 + $0x6c] sm:$0xf]  ;;  %v8136_v33 = vcombine.low %v330_v28, %v8133_v31  ;;  %v8139_v34 = vld [vmem:[%s7893_s20 + $0x74] ss:$0 sps:$4 sm:$0x11]  }
  0x73   : > { %v897_v55 = vsel %vm442_vm0, %v892_v42, %v896_v39  ;;  %v904_v1 = vor.u32 %v903_v50, %v899_v52 }
  0x74   : > { %1267 = vmatmul.mubr.bf16.gmra.mrb[8].mxu0 %v7935_v62  ;;  %6679 = vmatmul.mubr.bf16.gmra.mrb[8].mxu1 %v1003_v44  ;;  %v1008_v62 = vrot.slane %v8005_v56, 1  ;;  %v518_v44 = vshll.u32 %v5638_v40, 16 }
  0x75   : > { %1274 = vmatprep.mubr.bf16.mxu0 %v873_v59  ;;  %6682 = vmatprep.mubr.bf16.mxu1 %v1006_v60  ;;  %v908_v60 = vrot.slane %v906_v54, 1 }
  0x76   : > { %6902 = vmatpush3.bf16.msra.mxu1 %v7280_v58  ;;  %6219 = vmatpush3.bf16.msra.mxu0 %v7280_v58  ;;  %v1009_v6 = vsel %vm603_vm1, %v1007_v61, %v1008_v62  ;;  %v520_v57 = vrot.slane %v518_v44, 1  ;;  %v525_v58 = vrot.slane %v523_v45, 1  ;;  %v8097_v61 = vld [vmem:[%s7893_s20 + $0x5c] ss:$0 sps:$4 sm:$0x11]   ;;  %v554_v44 = vshll.u32 %v8136_v33, 16 }
  0x77   : > { %6895 = vmatprep.subr.bf16.mxu1 %v7281_v63  ;;  %6220 = vmatprep.subr.bf16.mxu0 %v7281_v63  ;;  %v535_v2 = vshll.u32 %v8097_v61, 16  ;;  %v552_v45 = vshrl.u32 %v8136_v33, 16 }
  0x78   : > { %v521_v62 = vor.u32 %v520_v57, %v516_v43  ;;  %v930_v43 = vshll.u32 %v8033_v11, 16  ;;  %v556_v52 = vrot.slane %v554_v44, 1  ;;  %v7303_v11 = vld [vmem:[%s9394_s1 + $0xa0] sm:$0xff]  }
  0x79   : > { %v537_v14 = vrot.slane %v535_v2, 1  ;;  %v312_v57 = vld [vmem:[%s7893_s20] sm:$0xf] }
  0x7a   : > { %6903 = vmatpush3.bf16.msra.mxu1 %v7282_v0  ;;  %6221 = vmatpush3.bf16.msra.mxu0 %v7282_v0  ;;  %v526_v7 = vsel %vm442_vm0, %v521_v62, %v525_v58  ;;  %v932_v54 = vrot.slane %v930_v43, 1  ;;  %v557_v58 = vor.u32 %v556_v52, %v552_v45  ;;  %v463_v52 = vshll.u32 %v7312_v10, 16 }
  0x7b   : > { %6896 = vmatprep.subr.bf16.mxu1 %v7289_v9  ;;  %6222 = vmatprep.subr.bf16.mxu0 %v7289_v9  ;;  %v918_v9 = vshll.u32 %v8005_v56, 16  ;;  %v8121_v56 = vld [vmem:[%s7893_s20 + $0x68] ss:$0 sps:$4 sm:$0x11]  }
  0x7c   : > { %1275 = vmatmul.mubr.bf16.gmra.mrb[12].mxu0 %v7964_v26  ;;  %6683 = vmatmul.mubr.bf16.gmra.mrb[12].mxu1 %v1009_v6  ;;  %v1013_v26 = vrot.slane %v5733_v22, 1  ;;  %v8106_v6 = vcombine.low %v5680_v49, %v8025_v5  ;;  %v540_v22 = vshrl.u32 %v8116_v18, 16  ;;  %v7320_v49 = vld [vmem:[%s9394_s1 + $0x1c0] sm:$0xff]  }
  0x7d   : > { %1282 = vmatprep.mubr.bf16.mxu0 %v885_v24  ;;  %6686 = vmatprep.mubr.bf16.mxu1 %v1012_v25  ;;  %v920_v20 = vrot.slane %v918_v9, 1  ;;  %v916_v25 = vor.u32 %v915_v16, %v911_v3  ;;  %v7310_v3 = vld [vmem:[%s7893_s20 + $0x8] ss:$0 sps:$4 sm:$0x11]   ;;  %v344_v16 = vld [vmem:[%s7893_s20 + $0x18] sm:$0xe] }
  0x7e   : > { %6904 = vmatpush3.bf16.msra.mxu1 %v7290_v13  ;;  %6223 = vmatpush3.bf16.msra.mxu0 %v7290_v13  ;;  %v1015_v36 = vsel %vm603_vm1, %v1013_v26, %v1014_v27  ;;  %v909_v13 = vsel %vm442_vm0, %v904_v1, %v908_v60  ;;  %v547_v26 = vshll.u32 %v8121_v56, 16  ;;  %v925_v27 = vshll.u32 %v8106_v6, 16 }
  0x7f   : > { %6897 = vmatprep.subr.bf16.mxu1 %v7291_v23  ;;  %6224 = vmatprep.subr.bf16.mxu0 %v7291_v23  ;;  %v542_v23 = vshll.u32 %v8116_v18, 16  ;;  %v923_v39 = vshrl.u32 %v8106_v6, 16  ;;  %v942_v60 = vshll.u32 %v8050_v21, 16  ;;  %v7307_v21 = vld [vmem:[%s9394_s1 + $0xb0] sm:$0xff]  }
  0x80   : > { %v549_v32 = vrot.slane %v547_v26, 1  ;;  %v927_v42 = vrot.slane %v925_v27, 1  ;;  %v8192_v26 = vld [vmem:[%s7893_s20 + $0x20] ss:$0 sps:$4 sm:$0x11]  }
  0x81   : > { %v944_v9 = vrot.slane %v942_v60, 1  ;;  %v314_v27 = vld [vmem:[%s7893_s20 + $0xc] sm:$0xf] }
  0x82   : > { %6905 = vmatpush3.bf16.msra.mxu1 %v7292_v29  ;;  %6225 = vmatpush3.bf16.msra.mxu0 %v7292_v29  ;;  %v544_v29 = vrot.slane %v542_v23, 1  ;;  %v928_v53 = vor.u32 %v927_v42, %v923_v39  ;;  %v451_v23 = vshll.u32 %v7310_v3, 16  ;;  %v316_v39 = vld [vmem:[%s7893_s20 + $0x18] sm:$0xf]  ;;  %v7321_v42 = vld [vmem:[%s9394_s1 + $0x200] sm:$0xff]  }
  0x83   : > { %6690 = vmatprep.subr.bf16.mxu1 %v7295_v30  ;;  %6304 = vmatprep.subr.bf16.mxu0 %v7320_v49  ;;  %v8213_v49 = vld [vmem:[%s7893_s20 + $0x2c] ss:$0 sps:$4 sm:$0x11]  }
  0x84   : > { %1283 = vmatmul.mubr.bf16.gmra.mrb[16].mxu0 %v7999_v51  ;;  %6687 = vmatmul.mubr.bf16.gmra.mrb[16].mxu1 %v1015_v36  ;;  %v8092_v51 = vld [vmem:[%s7893_s20 + $0x58] sm:$0xf]  ;;  %v8142_v36 = vcombine.low %v5682_v19, %v8040_v15  ;;  %v545_v38 = vor.u32 %v544_v29, %v540_v22  ;;  %v605_v19 = vrot.slane %v7310_v3, 1  ;;  %v453_v43 = vrot.slane %v451_v23, 1  ;;  %v347_v3 = vld [vmem:[%s7893_s20 + $0x3c] sm:$0xe] }
  0x85   : > { %v5639_v59 = vcombine.low %v326_v46, %v8092_v51  ;;  %1290 = vmatprep.mubr.bf16.mxu0 %v897_v55  ;;  %1668 = vmatprep.mubr.bf16.mxu1 %v526_v7  ;;  %v559_v46 = vshll.u32 %v8139_v34, 16  ;;  %v315_v7 = vld [vmem:[%s7893_s20 + $0x10] sm:$0xf]  ;;  %v614_v60 = vrot.slane %v8213_v49, 1 }
  0x86   : > { %v550_v15 = vsel %vm442_vm0, %v545_v38, %v549_v32  ;;  %v937_v55 = vshll.u32 %v8142_v36, 16  ;;  %v608_v32 = vrot.slane %v7312_v10, 1  ;;  %v8196_v38 = vcombine.low %v314_v27, %v315_v7 }
  0x87   : > { %v528_v63 = vshrl.u32 %v5639_v59, 16  ;;  %v530_v0 = vshll.u32 %v5639_v59, 16  ;;  %v561_v50 = vrot.slane %v559_v46, 1  ;;  %v346_v46 = vld [vmem:[%s7893_s20 + $0x30] sm:$0xe] }
  0x88   : > { %v939_v1 = vrot.slane %v937_v55, 1  ;;  %v458_v45 = vshll.u32 %v8196_v38, 16 }
  0x89   : > { %v532_v8 = vrot.slane %v530_v0, 1  ;;  %v933_v0 = vsel %vm442_vm0, %v928_v53, %v932_v54  ;;  %v562_v2 = vsel %vm442_vm0, %v557_v58, %v561_v50  ;;  %v8216_v53 = vld [vmem:[%s7893_s20 + $0x38] ss:$0 sps:$4 sm:$0x11]  }
  0x8b   : > { %v533_v5 = vor.u32 %v532_v8, %v528_v63  ;;  %v7304_v63 = vld [vmem:[%s9394_s1 + $0xa8] sm:$0xff]  }
  0x8c   : > { %1291 = vmatmul.mubr.bf16.gmra.mrb[20].mxu0 %v8044_v17  ;;  %1669 = vmatmul.mubr.bf16.vlgmr.msra.gmra.mrb[20].mxu1 %v5638_v40  ;;  %v7299_v17 = vld [vmem:[%s9394_s1 + $0x90] sm:$0xff]   ;;  %v7300_v40 = vld [vmem:[%s9394_s1 + $0x98] sm:$0xff]   ;;  %v343_v8 = vld [vmem:[%s7893_s20 + $0xc] sm:$0xe] }
  0x8d   : > { %6691 = vmatpush3.bf16.msra.mxu1 %v7295_v30  ;;  %1298 = vmatprep.mubr.bf16.mxu0 %v909_v13  ;;  %v538_v24 = vsel %vm442_vm0, %v533_v5, %v537_v14  ;;  %v921_v30 = vsel %vm442_vm0, %v916_v25, %v920_v20  ;;  %v317_v14 = vld [vmem:[%s7893_s20 + $0x1c] sm:$0xf]  ;;  %v5653_v5 = vcombine.low %v343_v8, %v315_v7  ;;  %v7333_v7 = vld [vmem:[%s9394_s1 + $0x210] sm:$0xff]  }
  0x8e   : > { %6692 = vmatprep.subr.bf16.mxu1 %v7296_v47  ;;  %1676 = vmatprep.mubr.bf16.mxu1 %v538_v24  ;;  %v7308_v20 = vld [vmem:[%s9394_s1 + $0xb8] sm:$0xff]   ;;  %v5654_v24 = vcombine.low %v344_v16, %v317_v14  ;;  %v8219_v55 = vcombine.low %v316_v39, %v317_v14  ;;  %v623_v39 = vrot.slane %v8076_v41, 1  ;;  %v7336_v41 = vld [vmem:[%s9394_s1 + $0x190] sm:$0xff]  }
  0x8f   : > { %v607_v29 = vrot.slane %v5653_v5, 1 }
  0x90   : > { %v610_v44 = vrot.slane %v5654_v24, 1 }
  0x91   : > { %6693 = vmatpush3.bf16.msra.mxu1 %v7296_v47  ;;  %v935_v47 = vshrl.u32 %v8142_v36, 16  ;;  %v609_v54 = vsel %vm603_vm1, %v607_v29, %v608_v32  ;;  %v349_v29 = vld [vmem:[%s7893_s20 + $0x54] sm:$0xe] }
  0x92   : > { %6694 = vmatprep.subr.bf16.mxu1 %v7299_v17 }
  0x94   : > { %1299 = vmatmul.mubr.bf16.gmra.mrb[24].mxu0 %v8068_v35  ;;  %1677 = vmatmul.mubr.bf16.gmra.mrb[24].mxu1 %v5639_v59  ;;  %v313_v35 = vld [vmem:[%s7893_s20 + $0x4] sm:$0xf]  ;;  %v342_v59 = vld [vmem:[%s7893_s20] sm:$0xe] }
  0x95   : > { %6695 = vmatpush3.bf16.msra.mxu1 %v7299_v17  ;;  %1306 = vmatprep.mubr.bf16.mxu0 %v921_v30  ;;  %v8166_v62 = vcombine.low %v312_v57, %v313_v35  ;;  %v5652_v4 = vcombine.low %v342_v59, %v313_v35  ;;  %v345_v30 = vld [vmem:[%s7893_s20 + $0x24] sm:$0xe]  ;;  %v456_v35 = vshrl.u32 %v8196_v38, 16  ;;  %v460_v59 = vrot.slane %v458_v45, 1 }
  0x96   : > { %6696 = vmatprep.subr.bf16.mxu1 %v7300_v40  ;;  %1684 = vmatprep.mubr.bf16.mxu1 %v550_v15  ;;  %v8207_v15 = vld [vmem:[%s7893_s20 + $0x34] sm:$0xf] }
  0x97   : > { %v446_v13 = vshll.u32 %v8166_v62, 16  ;;  %v444_v22 = vshrl.u32 %v8166_v62, 16  ;;  %v5656_v57 = vcombine.low %v346_v46, %v8207_v15  ;;  %v461_v8 = vor.u32 %v460_v59, %v456_v35 }
  0x98   : > { %v487_v46 = vshll.u32 %v8213_v49, 16  ;;  %v351_v49 = vld [vmem:[%s7893_s20 + $0x6c] sm:$0xe] }
  0x99   : > { %6697 = vmatpush3.bf16.msra.mxu1 %v7300_v40  ;;  %v448_v25 = vrot.slane %v446_v13, 1  ;;  %v319_v40 = vld [vmem:[%s7893_s20 + $0x28] sm:$0xf] }
  0x9a   : > { %6698 = vmatprep.subr.bf16.mxu1 %v7303_v11  ;;  %v348_v13 = vld [vmem:[%s7893_s20 + $0x48] sm:$0xe]  ;;  %v489_v59 = vrot.slane %v487_v46, 1  ;;  %v5817_v46 = vld [vmem:[%s7893_s20 + $0x3c] sm:$0xe] }
  0x9b   : > { %v5658_v23 = vcombine.low %v348_v13, %v8072_v37  ;;  %v7334_v37 = vld [vmem:[%s9394_s1 + $0x1d0] sm:$0xff]  }
  0x9c   : > { %1307 = vmatmul.mubr.bf16.gmra.mrb[28].mxu0 %v8085_v48  ;;  %1685 = vmatmul.mubr.bf16.gmra.mrb[28].mxu1 %v8116_v18  ;;  %v940_v48 = vor.u32 %v939_v1, %v935_v47  ;;  %v604_v18 = vrot.slane %v5652_v4, 1  ;;  %v465_v1 = vrot.slane %v463_v52, 1  ;;  %v616_v4 = vrot.slane %v5656_v57, 1  ;;  %v7340_v57 = vld [vmem:[%s9394_s1 + $0x1d8] sm:$0xff]  }
  0x9d   : > { %6699 = vmatpush3.bf16.msra.mxu1 %v7303_v11  ;;  %1314 = vmatprep.mubr.bf16.mxu0 %v933_v0  ;;  %v5655_v11 = vcombine.low %v345_v30, %v319_v40  ;;  %v318_v0 = vld [vmem:[%s7893_s20 + $0x24] sm:$0xf]  ;;  %v622_v30 = vrot.slane %v5658_v23, 1 }
  0x9e   : > { %6700 = vmatprep.subr.bf16.mxu1 %v7304_v63  ;;  %1692 = vmatprep.mubr.bf16.mxu1 %v562_v2  ;;  %v945_v17 = vsel %vm442_vm0, %v940_v48, %v944_v9  ;;  %v606_v28 = vsel %vm603_vm1, %v604_v18, %v605_v19  ;;  %v8232_v2 = vld [vmem:[%s7893_s20 + $0x40] sm:$0xf]  ;;  %v470_v9 = vshll.u32 %v8219_v55, 16  ;;  %v8245_v14 = vcombine.low %v318_v0, %v319_v40  ;;  %v7324_v18 = vld [vmem:[%s9394_s1 + $0x1c8] sm:$0xff]   ;;  %v5815_v23 = vld [vmem:[%s7893_s20 + $0x24] sm:$0xe] }
  0x9f   : > { %v613_v47 = vrot.slane %v5655_v11, 1  ;;  %v5657_v10 = vcombine.low %v347_v3, %v8232_v2  ;;  %v7322_v48 = vld [vmem:[%s9394_s1 + $0x180] sm:$0xff]   ;;  %v475_v19 = vshll.u32 %v8192_v26, 16  ;;  %v466_v5 = vsel %vm442_vm0, %v461_v8, %v465_v1  ;;  %v5814_v1 = vld [vmem:[%s7893_s20 + $0x18] sm:$0xe] }
  0xa0   : > { %v624_v11 = vsel %vm603_vm1, %v622_v30, %v623_v39  ;;  %v7345_v0 = vld [vmem:[%s9394_s1 + $0x1e0] sm:$0xff]  }
  0xa1   : > { %6701 = vmatpush3.bf16.msra.mxu1 %v7304_v63  ;;  %v7323_v63 = vld [vmem:[%s9394_s1 + $0x208] sm:$0xff]   ;;  %v615_v16 = vsel %vm603_vm1, %v613_v47, %v614_v60  ;;  %v477_v32 = vrot.slane %v475_v19, 1  ;;  %v5785_v47 = vld [vmem:[%s7893_s20 + $0x1c] sm:$0xf]  ;;  %v5784_v19 = vld [vmem:[%s7893_s20 + $0x18] sm:$0xf] }
  0xa2   : > { %6702 = vmatprep.subr.bf16.mxu1 %v7307_v21 }
  0xa4   : > { %1315 = vmatmul.mubr.bf16.gmra.mrb[32].mxu0 %v8106_v6  ;;  %1693 = vmatmul.mubr.bf16.gmra.mrb[32].mxu1 %v8136_v33  ;;  %v449_v6 = vor.u32 %v448_v25, %v444_v22  ;;  %v611_v33 = vrot.slane %v8192_v26, 1  ;;  %v472_v22 = vrot.slane %v470_v9, 1  ;;  %v619_v25 = vrot.slane %v5657_v10, 1  ;;  %v7335_v26 = vld [vmem:[%s9394_s1 + $0x218] sm:$0xff]  }
  0xa5   : > { %6703 = vmatpush3.bf16.msra.mxu1 %v7307_v21  ;;  %1322 = vmatprep.mubr.bf16.mxu0 %v945_v17  ;;  %v8236_v21 = vld [vmem:[%s7893_s20 + $0x44] ss:$0 sps:$4 sm:$0x11]   ;;  %v7329_v17 = vld [vmem:[%s9394_s1 + $0x188] sm:$0xff]  }
  0xa6   : > { %6704 = vmatprep.subr.bf16.mxu1 %v7308_v20  ;;  %6706 = vmatprep.mubr.bf16.mxu1 %v606_v28  ;;  %v454_v58 = vsel %vm442_vm0, %v449_v6, %v453_v43  ;;  %v612_v50 = vsel %vm603_vm1, %v610_v44, %v611_v33  ;;  %v620_v27 = vrot.slane %v8236_v21, 1  ;;  %v320_v28 = vld [vmem:[%s7893_s20 + $0x30] sm:$0xf]  ;;  %v5659_v43 = vcombine.low %v349_v29, %v8092_v51  ;;  %v7339_v51 = vld [vmem:[%s9394_s1 + $0x220] sm:$0xff]  }
  0xa7   : > { %v8277_v44 = vcombine.low %v320_v28, %v8207_v15  ;;  %v480_v33 = vshrl.u32 %v8245_v14, 16  ;;  %v8319_v9 = vld [vmem:[%s7893_s20 + $0x20] ss:$0 sps:$4 sm:$0x11]   ;;  %v5816_v28 = vld [vmem:[%s7893_s20 + $0x30] sm:$0xe] }
  0xa8   : > { %v621_v6 = vsel %vm603_vm1, %v619_v25, %v620_v27  ;;  %v7356_v27 = vld [vmem:[%s9394_s1 + $0x1f0] sm:$0xff]  }
  0xa9   : > { %6705 = vmatpush3.bf16.msra.mxu1 %v7308_v20  ;;  %v468_v20 = vshrl.u32 %v8219_v55, 16  ;;  %v494_v35 = vshll.u32 %v8277_v44, 16 }
  0xaa   : > { %6726 = vmatprep.subr.bf16.mxu1 %v7321_v42 }
  0xab   : > { %v473_v40 = vor.u32 %v472_v22, %v468_v20  ;;  %v496_v8 = vrot.slane %v494_v35, 1  ;;  %v5787_v22 = vld [vmem:[%s7893_s20 + $0x28] sm:$0xf]  ;;  %v8390_v35 = vld [vmem:[%s7893_s20 + $0x44] ss:$0 sps:$4 sm:$0x11]  }
  0xac   : > { %1323 = vmatmul.mubr.bf16.gmra.mrb[36].mxu0 %v8142_v36  ;;  %6707 = vmatmul.mubr.bf16.vlgmr.msra.gmra.mrb[0].mxu1 %v609_v54  ;;  %v617_v36 = vrot.slane %v8216_v53, 1  ;;  %v626_v54 = vrot.slane %v8097_v61, 1  ;;  %v7341_v61 = vld [vmem:[%s9394_s1 + $0x198] sm:$0xff]   ;;  %v5845_v29 = vcombine.low %v5815_v23, %v5787_v22 }
  0xad   : > { %1620 = vmatprep.mubr.bf16.mxu0 %v454_v58  ;;  %6710 = vmatprep.mubr.bf16.mxu1 %v612_v50  ;;  %v478_v45 = vsel %vm442_vm0, %v473_v40, %v477_v32  ;;  %v625_v58 = vrot.slane %v5659_v43, 1  ;;  %v7342_v50 = vld [vmem:[%s9394_s1 + $0x228] sm:$0xff]   ;;  %v8357_v40 = vcombine.low %v5784_v19, %v5785_v47 }
  0xae   : > { %6727 = vmatpush3.bf16.msra.mxu1 %v7321_v42  ;;  %v618_v24 = vsel %vm603_vm1, %v616_v4, %v617_v36  ;;  %v482_v42 = vshll.u32 %v8245_v14, 16  ;;  %v7346_v4 = vld [vmem:[%s9394_s1 + $0x230] sm:$0xff]   ;;  %v499_v36 = vshll.u32 %v8216_v53, 16  ;;  %v632_v53 = vrot.slane %v8139_v34, 1 }
  0xaf   : > { %6728 = vmatprep.subr.bf16.mxu1 %v7323_v63  ;;  %v627_v3 = vsel %vm603_vm1, %v625_v58, %v626_v54  ;;  %v7365_v58 = vld [vmem:[%s9394_s1 + $0x1b8] sm:$0xff]  }
  0xb0   : > { %v484_v15 = vrot.slane %v482_v42, 1  ;;  %v501_v34 = vrot.slane %v499_v36, 1 }
  0xb2   : > { %6729 = vmatpush3.bf16.msra.mxu1 %v7323_v63  ;;  %v629_v63 = vrot.slane %v8121_v56, 1  ;;  %v492_v56 = vshrl.u32 %v8277_v44, 16 }
  0xb3   : > { %6730 = vmatprep.subr.bf16.mxu1 %v7333_v7 }
  0xb4   : > { %1621 = vmatmul.mubr.bf16.vlgmr.msra.gmra.mrb[40].mxu0 %v8166_v62  ;;  %6711 = vmatmul.mubr.bf16.gmra.mrb[4].mxu1 %v615_v16  ;;  %v350_v62 = vld [vmem:[%s7893_s20 + $0x60] sm:$0xe]  ;;  %v497_v20 = vor.u32 %v496_v8, %v492_v56  ;;  %v2118_v8 = vrot.slane %v8390_v35, 1 }
  0xb5   : > { %6305 = vmatpush3.bf16.msra.mxu0 %v7322_v48  ;;  %1628 = vmatprep.mubr.bf16.mxu0 %v466_v5  ;;  %v5660_v52 = vcombine.low %v350_v62, %v8112_v12  ;;  %v322_v12 = vld [vmem:[%s7893_s20 + $0x3c] sm:$0xf]  ;;  %v5844_v48 = vcombine.low %v5814_v1, %v5785_v47  ;;  %v7357_v62 = vld [vmem:[%s9394_s1 + $0x1b0] sm:$0xff]  }
  0xb6   : > { %6306 = vmatprep.subr.bf16.mxu0 %v7324_v18  ;;  %6714 = vmatprep.mubr.bf16.mxu1 %v618_v24  ;;  %v8322_v10 = vcombine.low %v322_v12, %v8232_v2  ;;  %v7348_v2 = vld [vmem:[%s9394_s1 + $0x238] sm:$0xff]   ;;  %v7349_v18 = vld [vmem:[%s9394_s1 + $0x1e8] sm:$0xff]   ;;  %v502_v39 = vsel %vm442_vm0, %v497_v20, %v501_v34  ;;  %v5786_v12 = vld [vmem:[%s7893_s20 + $0x24] sm:$0xf] }
  0xb7   : > { %6731 = vmatpush3.bf16.msra.mxu1 %v7333_v7  ;;  %v628_v60 = vrot.slane %v5660_v52, 1  ;;  %v5661_v7 = vcombine.low %v351_v49, %v8133_v31  ;;  %v7347_v31 = vld [vmem:[%s9394_s1 + $0x1a0] sm:$0xff]   ;;  %v7350_v24 = vld [vmem:[%s9394_s1 + $0x1a8] sm:$0xff]   ;;  %v1951_v52 = vshll.u32 %v8357_v40, 16 }
  0xb8   : > { %6732 = vmatprep.subr.bf16.mxu1 %v7335_v26  ;;  %v506_v25 = vshll.u32 %v8322_v10, 16  ;;  %v504_v30 = vshrl.u32 %v8322_v10, 16  ;;  %v5818_v49 = vld [vmem:[%s7893_s20 + $0x48] sm:$0xe] }
  0xb9   : > { %6307 = vmatpush3.bf16.msra.mxu0 %v7329_v17  ;;  %v630_v16 = vsel %vm603_vm1, %v628_v60, %v629_v63  ;;  %v631_v5 = vrot.slane %v5661_v7, 1  ;;  %v2108_v17 = vrot.slane %v5844_v48, 1  ;;  %v1953_v60 = vrot.slane %v1951_v52, 1  ;;  %v8398_v1 = vld [vmem:[%s7893_s20 + $0x50] ss:$0 sps:$4 sm:$0x11]  }
  0xba   : > { %6308 = vmatprep.subr.bf16.mxu0 %v7334_v37  ;;  %v8353_v37 = vld [vmem:[%s7893_s20 + $0x2c] ss:$0 sps:$4 sm:$0x11]   ;;  %v508_v43 = vrot.slane %v506_v25, 1  ;;  %v1956_v63 = vshll.u32 %v8319_v9, 16 }
  0xbb   : > { %6733 = vmatpush3.bf16.msra.mxu1 %v7335_v26  ;;  %v8349_v26 = vld [vmem:[%s7893_s20 + $0x34] sm:$0xf]  ;;  %v633_v32 = vsel %vm603_vm1, %v631_v5, %v632_v53  ;;  %v5788_v7 = vld [vmem:[%s7893_s20 + $0x30] sm:$0xf]  ;;  %v8413_v53 = vld [vmem:[%s7893_s20 + $0x64] sm:$0xf] }
  0xbc   : > { %1629 = vmatmul.mubr.bf16.gmra.mrb[44].mxu0 %v8196_v38  ;;  %6715 = vmatmul.mubr.bf16.gmra.mrb[8].mxu1 %v621_v6  ;;  %v485_v38 = vor.u32 %v484_v15, %v480_v33  ;;  %v511_v6 = vshll.u32 %v8236_v21, 16  ;;  %v5846_v33 = vcombine.low %v5816_v28, %v8349_v26  ;;  %v2112_v15 = vrot.slane %v8353_v37, 1  ;;  %v8375_v21 = vld [vmem:[%s7893_s20 + $0x40] sm:$0xf]  ;;  %v5819_v48 = vld [vmem:[%s7893_s20 + $0x54] sm:$0xe] }
  0xbd   : > { %6309 = vmatpush3.bf16.msra.mxu0 %v7336_v41  ;;  %1636 = vmatprep.mubr.bf16.mxu0 %v478_v45  ;;  %v8366_v41 = vld [vmem:[%s7893_s20 + $0x38] ss:$0 sps:$4 sm:$0x11]   ;;  %v8422_v20 = vld [vmem:[%s7893_s20 + $0x5c] ss:$0 sps:$4 sm:$0x11]  }
  0xbe   : > { %6718 = vmatprep.mubr.bf16.mxu1 %v624_v11  ;;  %6734 = vmatprep.subr.bf16.mxu1 %v7339_v51  ;;  %v490_v13 = vsel %vm442_vm0, %v485_v38, %v489_v59  ;;  %v7364_v45 = vld [vmem:[%s9394_s1 + $0x1f8] sm:$0xff]   ;;  %v509_v11 = vor.u32 %v508_v43, %v504_v30  ;;  %v513_v54 = vrot.slane %v511_v6, 1  ;;  %v5847_v38 = vcombine.low %v5817_v46, %v8375_v21 }
  0xbf   : > { %6735 = vmatpush3.bf16.msra.mxu1 %v7339_v51  ;;  %6310 = vmatprep.subr.bf16.mxu0 %v7340_v57  ;;  %v2111_v51 = vrot.slane %v5845_v29, 1  ;;  %v2114_v57 = vrot.slane %v5846_v33, 1  ;;  %v1949_v59 = vshrl.u32 %v8357_v40, 16  ;;  %v2124_v28 = vrot.slane %v8422_v20, 1  ;;  %v8436_v29 = vld [vmem:[%s7893_s20 + $0x70] sm:$0xf] }
  0xc0   : > { %6736 = vmatprep.subr.bf16.mxu1 %v7342_v50  ;;  %v2117_v56 = vrot.slane %v5847_v38, 1  ;;  %v5822_v43 = vld [vmem:[%s7893_s20 + $0x78] sm:$0xe]  ;;  %v1980_v46 = vshll.u32 %v8366_v41, 16 }
  0xc1   : > { %6311 = vmatpush3.bf16.msra.mxu0 %v7341_v61  ;;  %v2113_v61 = vsel %vm603_vm1, %v2111_v51, %v2112_v15  ;;  %v1954_v36 = vor.u32 %v1953_v60, %v1949_v59  ;;  %v8464_v60 = vld [vmem:[%s7893_s20 + $0x88] sm:$0xf] }
  0xc2   : > { %6312 = vmatprep.subr.bf16.mxu0 %v7345_v0  ;;  %v514_v0 = vsel %vm442_vm0, %v509_v11, %v513_v54  ;;  %v2119_v19 = vsel %vm603_vm1, %v2117_v56, %v2118_v8 }
  0xc3   : > { %6737 = vmatpush3.bf16.msra.mxu1 %v7342_v50  ;;  %v8384_v50 = vld [vmem:[%s7893_s20 + $0x4c] sm:$0xf] }
  0xc4   : > { %1637 = vmatmul.mubr.bf16.gmra.mrb[48].mxu0 %v8219_v55  ;;  %6719 = vmatmul.mubr.bf16.gmra.mrb[12].mxu1 %v627_v3  ;;  %v2109_v55 = vrot.slane %v8319_v9, 1  ;;  %v5848_v3 = vcombine.low %v5818_v49, %v8384_v50  ;;  %v1958_v9 = vrot.slane %v1956_v63, 1  ;;  %v1982_v49 = vrot.slane %v1980_v46, 1  ;;  %v5823_v63 = vld [vmem:[%s7893_s20 + $0x84] sm:$0xe] }
  0xc5   : > { %1644 = vmatprep.mubr.bf16.mxu0 %v490_v13  ;;  %6722 = vmatprep.mubr.bf16.mxu1 %v630_v16  ;;  %v8407_v13 = vld [vmem:[%s7893_s20 + $0x58] sm:$0xf] }
  0xc6   : > { %6738 = vmatprep.subr.bf16.mxu1 %v7346_v4  ;;  %6313 = vmatpush3.bf16.msra.mxu0 %v7347_v31  ;;  %v2110_v42 = vsel %vm603_vm1, %v2108_v17, %v2109_v55  ;;  %v2120_v16 = vrot.slane %v5848_v3, 1  ;;  %v2121_v31 = vrot.slane %v8398_v1, 1  ;;  %v1959_v5 = vsel %vm442_vm0, %v1954_v36, %v1958_v9  ;;  %v8429_v55 = vld [vmem:[%s7893_s20 + $0x68] ss:$0 sps:$4 sm:$0x11]  }
  0xc7   : > { %6739 = vmatpush3.bf16.msra.mxu1 %v7346_v4  ;;  %6314 = vmatprep.subr.bf16.mxu0 %v7349_v18  ;;  %v8401_v4 = vcombine.low %v5786_v12, %v5787_v22  ;;  %v8417_v18 = vcombine.low %v5788_v7, %v8349_v26  ;;  %v5849_v34 = vcombine.low %v5819_v48, %v8407_v13  ;;  %v1968_v22 = vshll.u32 %v8353_v37, 16 }
  0xc8   : > { %6740 = vmatprep.subr.bf16.mxu1 %v7348_v2  ;;  %v2122_v23 = vsel %vm603_vm1, %v2120_v16, %v2121_v31  ;;  %v2127_v30 = vrot.slane %v8429_v55, 1  ;;  %v5853_v3 = vcombine.low %v5823_v63, %v8464_v60  ;;  %v1992_v9 = vshll.u32 %v8390_v35, 16  ;;  %v5794_v31 = vld [vmem:[%s7893_s20 + $0x54] sm:$0xf] }
  0xc9   : > { %v2123_v26 = vrot.slane %v5849_v34, 1  ;;  %v1970_v37 = vrot.slane %v1968_v22, 1  ;;  %v1973_v15 = vshrl.u32 %v8417_v18, 16 }
  0xca   : > { %6315 = vmatpush3.bf16.msra.mxu0 %v7350_v24  ;;  %v1961_v24 = vshrl.u32 %v8401_v4, 16 }
  0xcb   : > { %6741 = vmatpush3.bf16.msra.mxu1 %v7348_v2  ;;  %6316 = vmatprep.subr.bf16.mxu0 %v7356_v27  ;;  %v5820_v2 = vld [vmem:[%s7893_s20 + $0x60] sm:$0xe]  ;;  %v5790_v27 = vld [vmem:[%s7893_s20 + $0x3c] sm:$0xf]  ;;  %v2125_v33 = vsel %vm603_vm1, %v2123_v26, %v2124_v28 }
  0xcc   : > { %1645 = vmatmul.mubr.bf16.gmra.mrb[52].mxu0 %v8245_v14  ;;  %6723 = vmatmul.mubr.bf16.gmra.mrb[16].mxu1 %v633_v32  ;;  %v2115_v14 = vrot.slane %v8366_v41, 1  ;;  %v5850_v25 = vcombine.low %v5820_v2, %v8413_v53  ;;  %v5827_v6 = vcombine.low %v5790_v27, %v8375_v21 }
  0xcd   : > { %1652 = vmatprep.mubr.bf16.mxu0 %v502_v39  ;;  %6742 = vmatprep.mubr.bf16.mxu1 %v2110_v42  ;;  %v5821_v42 = vld [vmem:[%s7893_s20 + $0x6c] sm:$0xe] }
  0xce   : > { %6317 = vmatpush3.bf16.msra.mxu0 %v7357_v62  ;;  %v2116_v47 = vsel %vm603_vm1, %v2114_v57, %v2115_v14  ;;  %v2126_v39 = vrot.slane %v5850_v25, 1  ;;  %v1975_v62 = vshll.u32 %v8417_v18, 16  ;;  %v5851_v51 = vcombine.low %v5821_v42, %v8436_v29  ;;  %v8456_v57 = vld [vmem:[%s7893_s20 + $0x80] ss:$0 sps:$4 sm:$0x11]  }
  0xcf   : > { %6318 = vmatprep.subr.bf16.mxu0 %v7364_v45  ;;  %v8448_v45 = vld [vmem:[%s7893_s20 + $0x74] ss:$0 sps:$4 sm:$0x11]   ;;  %v5792_v14 = vld [vmem:[%s7893_s20 + $0x48] sm:$0xf]  ;;  %v1987_v12 = vshll.u32 %v5827_v6, 16 }
  0xd0   : > { %v2128_v11 = vsel %vm603_vm1, %v2126_v39, %v2127_v30  ;;  %v1977_v54 = vrot.slane %v1975_v62, 1  ;;  %v2130_v41 = vrot.slane %v8448_v45, 1  ;;  %v2133_v59 = vrot.slane %v8456_v57, 1 }
  0xd1   : > { %v1985_v7 = vshrl.u32 %v5827_v6, 16  ;;  %v1989_v36 = vrot.slane %v1987_v12, 1 }
  0xd2   : > { %6319 = vmatpush3.bf16.msra.mxu0 %v7365_v58  ;;  %v2129_v58 = vrot.slane %v5851_v51, 1 }
  0xd3   : > { %v1990_v48 = vor.u32 %v1989_v36, %v1985_v7 }
  0xd4   : > { %1653 = vmatmul.mubr.bf16.gmra.mrb[56].mxu0 %v8277_v44  ;;  %6743 = vmatmul.mubr.bf16.vlgmr.msra.gmra.mrb[0].mxu1 %v2113_v61  ;;  %v1963_v44 = vshll.u32 %v8401_v4, 16  ;;  %v1978_v61 = vor.u32 %v1977_v54, %v1973_v15  ;;  %v5802_v54 = vld [vmem:[%s7893_s20 + $0x84] sm:$0xf] }
  0xd5   : > { %1660 = vmatprep.mubr.bf16.mxu0 %v514_v0  ;;  %6746 = vmatprep.mubr.bf16.mxu1 %v2116_v47  ;;  %v2131_v0 = vsel %vm603_vm1, %v2129_v58, %v2130_v41  ;;  %v8470_v47 = vld [vmem:[%s7893_s20 + $0x8c] ss:$0 sps:$4 sm:$0x11]   ;;  %v5833_v58 = vcombine.low %v5802_v54, %v8464_v60 }
  0xd6   : > { %v1965_v17 = vrot.slane %v1963_v44, 1  ;;  %v1983_v56 = vsel %vm442_vm0, %v1978_v61, %v1982_v49  ;;  %v2136_v16 = vrot.slane %v8470_v47, 1  ;;  %v1994_v44 = vrot.slane %v1992_v9, 1 }
  0xd7   : > { %v2057_v63 = vshrl.u32 %v5833_v58, 16 }
  0xd8   : > { %v1966_v32 = vor.u32 %v1965_v17, %v1961_v24  ;;  %v1995_v34 = vsel %vm442_vm0, %v1990_v48, %v1994_v44 }
  0xda   : > { %v1971_v52 = vsel %vm442_vm0, %v1966_v32, %v1970_v37  ;;  %v2016_v37 = vshll.u32 %v8422_v20, 16 }
  0xdc   : > { %1661 = vmatmul.mubr.bf16.gmra.mrb[60].mxu0 %v8322_v10  ;;  %6747 = vmatmul.mubr.bf16.gmra.mrb[4].mxu1 %v2119_v19  ;;  %v8442_v10 = vld [vmem:[%s7893_s20 + $0x7c] sm:$0xf]  ;;  %v5829_v19 = vcombine.low %v5794_v31, %v8407_v13 }
  0xdd   : > { %2372 = vmatprep.mubr.bf16.mxu0 %v1959_v5  ;;  %6750 = vmatprep.mubr.bf16.mxu1 %v2122_v23  ;;  %v5852_v21 = vcombine.low %v5822_v43, %v8442_v10  ;;  %v5796_v23 = vld [vmem:[%s7893_s20 + $0x60] sm:$0xf]  ;;  %v2028_v43 = vshll.u32 %v8429_v55, 16 }
  0xde   : > { %v2011_v25 = vshll.u32 %v5829_v19, 16  ;;  %v5830_v27 = vcombine.low %v5796_v23, %v8413_v53  ;;  %v2009_v26 = vshrl.u32 %v5829_v19, 16 }
  0xdf   : > { %v2132_v38 = vrot.slane %v5852_v21, 1  ;;  %v2030_v20 = vrot.slane %v2028_v43, 1 }
  0xe0   : > { %v2013_v28 = vrot.slane %v2011_v25, 1  ;;  %v2023_v39 = vshll.u32 %v5830_v27, 16  ;;  %v2021_v62 = vshrl.u32 %v5830_v27, 16 }
  0xe1   : > { %v2134_v8 = vsel %vm603_vm1, %v2132_v38, %v2133_v59  ;;  %v2059_v59 = vshll.u32 %v5833_v58, 16 }
  0xe2   : > { %v2014_v32 = vor.u32 %v2013_v28, %v2009_v26  ;;  %v2025_v53 = vrot.slane %v2023_v39, 1 }
  0xe4   : > { %2373 = vmatmul.mubr.bf16.vlgmr.msra.gmra.mrb[64].mxu0 %v8357_v40  ;;  %6751 = vmatmul.mubr.bf16.gmra.mrb[8].mxu1 %v2125_v33  ;;  %v5828_v40 = vcombine.low %v5792_v14, %v8384_v50  ;;  %v2135_v50 = vrot.slane %v5853_v3, 1  ;;  %v5800_v33 = vld [vmem:[%s7893_s20 + $0x78] sm:$0xf]  ;;  %v2026_v51 = vor.u32 %v2025_v53, %v2021_v62 }
  0xe5   : > { %2380 = vmatprep.mubr.bf16.mxu0 %v1971_v52  ;;  %6754 = vmatprep.mubr.bf16.mxu1 %v2128_v11  ;;  %v5832_v15 = vcombine.low %v5800_v33, %v8442_v10  ;;  %v2052_v10 = vshll.u32 %v8456_v57, 16 }
  0xe6   : > { %v1999_v2 = vshll.u32 %v5828_v40, 16  ;;  %v2137_v5 = vsel %vm603_vm1, %v2135_v50, %v2136_v16  ;;  %v1997_v35 = vshrl.u32 %v5828_v40, 16  ;;  %v2031_v46 = vsel %vm442_vm0, %v2026_v51, %v2030_v20 }
  0xe7   : > { %v2047_v55 = vshll.u32 %v5832_v15, 16  ;;  %v2045_v49 = vshrl.u32 %v5832_v15, 16  ;;  %v2054_v38 = vrot.slane %v2052_v10, 1 }
  0xe8   : > { %v2001_v22 = vrot.slane %v1999_v2, 1 }
  0xe9   : > { %v2049_v12 = vrot.slane %v2047_v55, 1 }
  0xea   : > { %v2002_v24 = vor.u32 %v2001_v22, %v1997_v35 }
  0xeb   : > { %v2050_v61 = vor.u32 %v2049_v12, %v2045_v49 }
  0xec   : > { %2381 = vmatmul.mubr.bf16.gmra.mrb[68].mxu0 %v8401_v4  ;;  %6755 = vmatmul.mubr.bf16.gmra.mrb[12].mxu1 %v2131_v0  ;;  %v2004_v4 = vshll.u32 %v8398_v1, 16  ;;  %v5798_v1 = vld [vmem:[%s7893_s20 + $0x6c] sm:$0xf]  ;;  %v2064_v0 = vshll.u32 %v8470_v47, 16 }
  0xed   : > { %2388 = vmatprep.mubr.bf16.mxu0 %v1983_v56  ;;  %6758 = vmatprep.mubr.bf16.mxu1 %v2134_v8  ;;  %v5831_v30 = vcombine.low %v5798_v1, %v8436_v29  ;;  %v2040_v29 = vshll.u32 %v8448_v45, 16  ;;  %v2055_v45 = vsel %vm442_vm0, %v2050_v61, %v2054_v38 }
  0xee   : > { %v2006_v17 = vrot.slane %v2004_v4, 1  ;;  %v2066_v3 = vrot.slane %v2064_v0, 1 }
  0xef   : > { %v2033_v52 = vshrl.u32 %v5831_v30, 16  ;;  %v2042_v14 = vrot.slane %v2040_v29, 1 }
  0xf0   : > { %v2007_v13 = vsel %vm442_vm0, %v2002_v24, %v2006_v17 }
  0xf4   : > { %2389 = vmatmul.mubr.bf16.gmra.mrb[72].mxu0 %v8417_v18  ;;  %6759 = vmatmul.mubr.bf16.gmra.mrb[16].mxu1 %v2137_v5  ;;  %v2018_v18 = vrot.slane %v2016_v37, 1 }
  0xf5   : > { %2396 = vmatprep.mubr.bf16.mxu0 %v1995_v34 }
  0xf6   : > { %v2019_v42 = vsel %vm442_vm0, %v2014_v32, %v2018_v18 }
  0xfc   : > { %2397 = vmatmul.mubr.bf16.gmra.mrb[76].mxu0 %v5827_v6  ;;  %v2035_v6 = vshll.u32 %v5831_v30, 16 }
  0xfd   : > { %2404 = vmatprep.mubr.bf16.mxu0 %v2007_v13 }
  0xfe   : > { %v2037_v11 = vrot.slane %v2035_v6, 1 }
 0x100   : > { %v2038_v21 = vor.u32 %v2037_v11, %v2033_v52 }
 0x102   : > { %v2043_v41 = vsel %vm442_vm0, %v2038_v21, %v2042_v14 }
 0x104   : > { %2405 = vmatmul.mubr.bf16.gmra.mrb[80].mxu0 %v5828_v40  ;;  %v2061_v40 = vrot.slane %v2059_v59, 1 }
 0x105   : > { %2412 = vmatprep.mubr.bf16.mxu0 %v2019_v42 }
 0x106   : > { %v2062_v60 = vor.u32 %v2061_v40, %v2057_v63 }
 0x108   : > { %v2067_v7 = vsel %vm442_vm0, %v2062_v60, %v2066_v3 }
 0x10c   : > { %2413 = vmatmul.mubr.bf16.gmra.mrb[84].mxu0 %v5829_v19 }
 0x10d   : > { %2420 = vmatprep.mubr.bf16.mxu0 %v2031_v46 }
 0x114   : > { %2421 = vmatmul.mubr.bf16.gmra.mrb[88].mxu0 %v5830_v27 }
 0x115   : > { %2428 = vmatprep.mubr.bf16.mxu0 %v2043_v41 }
 0x11c   : > { %2429 = vmatmul.mubr.bf16.gmra.mrb[92].mxu0 %v5831_v30 }
 0x11d   : > { %2436 = vmatprep.mubr.bf16.mxu0 %v2055_v45 }
 0x124   : > { %2437 = vmatmul.mubr.bf16.gmra.mrb[96].mxu0 %v5832_v15 }
 0x125   : > { %2444 = vmatprep.mubr.bf16.mxu0 %v2067_v7 }
 0x12c   : > { %2445 = vmatmul.mubr.bf16.gmra.mrb[100].mxu0 %v5833_v58 }
 0x137   : > { %v6132_v57 = vpop.f32.mrb[0].mxu0 }
 0x138   : > { %v6133_v56 = vpop.f32.mrb[1].mxu0 }
 0x139   : > { %v8503_v8 = vadd.f32 %v6133_v56, %v6132_v57  ;;  %v6135_v36 = vpop.f32.mrb[2].mxu0 }
 0x13a   : > { %v6136_v9 = vpop.f32.mrb[3].mxu0 }
 0x13b   : > { %v8505_v50 = vadd.f32 %v6136_v9, %v6135_v36 }
 0x13f   : > { %v6138_v16 = vpop.f32.mrb[4].mxu0 }
 0x140   : > { %v6139_v31 = vpop.f32.mrb[5].mxu0 }
 0x141   : > { %v8507_v47 = vadd.f32 %v6139_v31, %v6138_v16  ;;  %v6141_v48 = vpop.f32.mrb[6].mxu0 }
 0x142   : > { %v6142_v44 = vpop.f32.mrb[7].mxu0 }
 0x143   : > { %v8509_v2 = vadd.f32 %v6142_v44, %v6141_v48 }
 0x147   : > { %v6144_v19 = vpop.f32.mrb[8].mxu0 }
 0x148   : > { %v6145_v5 = vpop.f32.mrb[9].mxu0 }
 0x149   : > { %v8511_v34 = vadd.f32 %v6145_v5, %v6144_v19  ;;  %v6147_v35 = vpop.f32.mrb[10].mxu0 }
 0x14a   : > { %v6148_v22 = vpop.f32.mrb[11].mxu0 }
 0x14b   : > { %v8513_v4 = vadd.f32 %v6148_v22, %v6147_v35 }
 0x14f   : > { %v6150_v23 = vpop.f32.mrb[12].mxu0 }
 0x150   : > { %v6151_v24 = vpop.f32.mrb[13].mxu0 }
 0x151   : > { %v8515_v17 = vadd.f32 %v6151_v24, %v6150_v23  ;;  %v6153_v25 = vpop.f32.mrb[14].mxu0 }
 0x152   : > { %v6154_v27 = vpop.f32.mrb[15].mxu0 }
 0x153   : > { %v8517_v13 = vadd.f32 %v6154_v27, %v6153_v25 }
 0x157   : > { %v6156_v26 = vpop.f32.mrb[16].mxu0 }
 0x158   : > { %v6157_v28 = vpop.f32.mrb[17].mxu0 }
 0x159   : > { %v8519_v37 = vadd.f32 %v6157_v28, %v6156_v26  ;;  %v6159_v1 = vpop.f32.mrb[18].mxu0 }
 0x15a   : > { %v6160_v32 = vpop.f32.mrb[19].mxu0 }
 0x15b   : > { %v8521_v18 = vadd.f32 %v6160_v32, %v6159_v1 }
 0x15f   : > { %v6162_v39 = vpop.f32.mrb[20].mxu0  ;;  %v6262_v30 = vpop.f32.mrb[20].mxu1 }
 0x160   : > { %v6163_v42 = vpop.f32.mrb[21].mxu0  ;;  %v6263_v62 = vpop.f32.mrb[21].mxu1 }
 0x161   : > { %v8523_v53 = vadd.f32 %v6163_v42, %v6162_v39  ;;  %v6165_v43 = vpop.f32.mrb[22].mxu0  ;;  %v6264_v33 = vadd.f32 %v6263_v62, %v6262_v30  ;;  %v6265_v51 = vpop.f32.mrb[22].mxu1 }
 0x162   : > { %v6166_v20 = vpop.f32.mrb[23].mxu0  ;;  %v6266_v6 = vpop.f32.mrb[23].mxu1 }
 0x163   : > { %v8525_v15 = vadd.f32 %v6166_v20, %v6165_v43  ;;  %v6267_v46 = vadd.f32 %v6266_v6, %v6265_v51 }
 0x167   : > { %v6168_v52 = vpop.f32.mrb[24].mxu0  ;;  %v6268_v11 = vpop.f32.mrb[24].mxu1 }
 0x168   : > { %v6169_v29 = vpop.f32.mrb[25].mxu0  ;;  %v6269_v54 = vpop.f32.mrb[25].mxu1 }
 0x169   : > { %v6170_v21 = vadd.f32 %v6169_v29, %v6168_v52  ;;  %v6171_v14 = vpop.f32.mrb[26].mxu0  ;;  %v6270_v55 = vadd.f32 %v6269_v54, %v6268_v11  ;;  %v6271_v58 = vpop.f32.mrb[26].mxu1 }
 0x16a   : > { %v6172_v41 = vpop.f32.mrb[27].mxu0  ;;  %v6272_v49 = vpop.f32.mrb[27].mxu1 }
 0x16b   : > { %v8527_v12 = vadd.f32 %v6264_v33, %v6170_v21  ;;  %v6173_v10 = vadd.f32 %v6172_v41, %v6171_v14  ;;  %v6273_v61 = vadd.f32 %v6272_v49, %v6271_v58 }
 0x16d   : > { %v8529_v38 = vadd.f32 %v6267_v46, %v6173_v10 }
 0x16f   : > { %v6174_v59 = vpop.f32.mrb[28].mxu0  ;;  %v6274_v45 = vpop.f32.mrb[28].mxu1 }
 0x170   : > { %v6175_v63 = vpop.f32.mrb[29].mxu0  ;;  %v6275_v40 = vpop.f32.mrb[29].mxu1 }
 0x171   : > { %v6176_v0 = vadd.f32 %v6175_v63, %v6174_v59  ;;  %v6177_v60 = vpop.f32.mrb[30].mxu0  ;;  %v6276_v3 = vadd.f32 %v6275_v40, %v6274_v45  ;;  %v6277_v7 = vpop.f32.mrb[30].mxu1 }
 0x172   : > { %v6178_v57 = vpop.f32.mrb[31].mxu0  ;;  %v6278_v56 = vpop.f32.mrb[31].mxu1 }
 0x173   : > { %v8531_v36 = vadd.f32 %v6270_v55, %v6176_v0  ;;  %v6179_v9 = vadd.f32 %v6178_v57, %v6177_v60  ;;  %v6279_v16 = vadd.f32 %v6278_v56, %v6277_v7 }
 0x175   : > { %v8533_v31 = vadd.f32 %v6273_v61, %v6179_v9 }
 0x177   : > { %v6180_v48 = vpop.f32.mrb[32].mxu0  ;;  %v6280_v44 = vpop.f32.mrb[32].mxu1 }
 0x178   : > { %v6181_v19 = vpop.f32.mrb[33].mxu0  ;;  %v6281_v5 = vpop.f32.mrb[33].mxu1 }
 0x179   : > { %v6182_v35 = vadd.f32 %v6181_v19, %v6180_v48  ;;  %v6183_v22 = vpop.f32.mrb[34].mxu0  ;;  %v6282_v23 = vadd.f32 %v6281_v5, %v6280_v44  ;;  %v6283_v24 = vpop.f32.mrb[34].mxu1 }
 0x17a   : > { %v6184_v25 = vpop.f32.mrb[35].mxu0  ;;  %v6284_v27 = vpop.f32.mrb[35].mxu1 }
 0x17b   : > { %v8535_v26 = vadd.f32 %v6276_v3, %v6182_v35  ;;  %v6185_v28 = vadd.f32 %v6184_v25, %v6183_v22  ;;  %v6285_v1 = vadd.f32 %v6284_v27, %v6283_v24 }
 0x17d   : > { %v8537_v32 = vadd.f32 %v6279_v16, %v6185_v28 }
 0x17f   : > { %v6186_v39 = vpop.f32.mrb[36].mxu0 }
 0x180   : > { %v6187_v30 = vpop.f32.mrb[37].mxu0 }
 0x181   : > { %v6188_v42 = vadd.f32 %v6187_v30, %v6186_v39  ;;  %v6189_v62 = vpop.f32.mrb[38].mxu0 }
 0x182   : > { %v6190_v43 = vpop.f32.mrb[39].mxu0 }
 0x183   : > { %v8539_v33 = vadd.f32 %v6282_v23, %v6188_v42  ;;  %v6191_v51 = vadd.f32 %v6190_v43, %v6189_v62 }
 0x185   : > { %v8541_v20 = vadd.f32 %v6285_v1, %v6191_v51 }
 0x187   : > { %v6226_v6 = vpop.f32.mrb[40].mxu0 }
 0x188   : > { %v6227_v46 = vpop.f32.mrb[41].mxu0 }
 0x189   : > { %v6228_v52 = vadd.f32 %v6227_v46, %v6226_v6  ;;  %v6229_v11 = vpop.f32.mrb[42].mxu0 }
 0x18a   : > { %v6230_v29 = vpop.f32.mrb[43].mxu0 }
 0x18b   : > { %v6909_v54 = vadd.f32 %v6228_v52, %v8503_v8  ;;  %v6231_v21 = vadd.f32 %v6230_v29, %v6229_v11 }
 0x18d   : > { %v6915_v14 = vadd.f32 %v6231_v21, %v8505_v50 }
 0x18f   : > { %v6232_v55 = vpop.f32.mrb[44].mxu0 }
 0x190   : > { %v6233_v58 = vpop.f32.mrb[45].mxu0 }
 0x191   : > { %v6234_v41 = vadd.f32 %v6233_v58, %v6232_v55  ;;  %v6235_v49 = vpop.f32.mrb[46].mxu0 }
 0x192   : > { %v6236_v10 = vpop.f32.mrb[47].mxu0 }
 0x193   : > { %v8546_v61 = vadd.f32 %v6234_v41, %v8507_v47  ;;  %v6237_v59 = vadd.f32 %v6236_v10, %v6235_v49 }
 0x195   : > { %v8549_v45 = vadd.f32 %v6237_v59, %v8509_v2 }
 0x197   : > { %v6238_v63 = vpop.f32.mrb[48].mxu0 }
 0x198   : > { %v6239_v40 = vpop.f32.mrb[49].mxu0 }
 0x199   : > { %v6240_v0 = vadd.f32 %v6239_v40, %v6238_v63  ;;  %v6241_v60 = vpop.f32.mrb[50].mxu0 }
 0x19a   : > { %v6242_v8 = vpop.f32.mrb[51].mxu0 }
 0x19b   : > { %v8552_v3 = vadd.f32 %v6240_v0, %v8511_v34  ;;  %v6243_v50 = vadd.f32 %v6242_v8, %v6241_v60 }
 0x19d   : > { %v8555_v7 = vadd.f32 %v6243_v50, %v8513_v4 }
 0x19f   : > { %v6244_v57 = vpop.f32.mrb[52].mxu0 }
 0x1a0   : > { %v6245_v56 = vpop.f32.mrb[53].mxu0 }
 0x1a1   : > { %v6246_v47 = vadd.f32 %v6245_v56, %v6244_v57  ;;  %v6247_v9 = vpop.f32.mrb[54].mxu0 }
 0x1a2   : > { %v6248_v16 = vpop.f32.mrb[55].mxu0 }
 0x1a3   : > { %v8558_v2 = vadd.f32 %v6246_v47, %v8515_v17  ;;  %v6249_v48 = vadd.f32 %v6248_v16, %v6247_v9 }
 0x1a5   : > { %v8561_v44 = vadd.f32 %v6249_v48, %v8517_v13 }
 0x1a7   : > { %v6250_v19 = vpop.f32.mrb[56].mxu0  ;;  %v6744_v5 = vpop.f32.mrb[0].mxu1 }
 0x1a8   : > { %v6251_v34 = vpop.f32.mrb[57].mxu0  ;;  %v2487_v35 = vpop.f32.mrb[1].mxu1 }
 0x1a9   : > { %v6252_v22 = vadd.f32 %v6251_v34, %v6250_v19  ;;  %v6253_v23 = vpop.f32.mrb[58].mxu0  ;;  %v8563_v4 = vpop.f32.mrb[2].mxu1 }
 0x1aa   : > { %v6254_v24 = vpop.f32.mrb[59].mxu0  ;;  %v2490_v25 = vpop.f32.mrb[3].mxu1 }
 0x1ab   : > { %v8566_v27 = vadd.f32 %v6252_v22, %v8519_v37  ;;  %v6255_v28 = vadd.f32 %v6254_v24, %v6253_v23 }
 0x1ad   : > { %v8569_v17 = vadd.f32 %v6255_v28, %v8521_v18 }
 0x1af   : > { %v6256_v1 = vpop.f32.mrb[60].mxu0  ;;  %v8571_v13 = vpop.f32.mrb[4].mxu1 }
 0x1b0   : > { %v6257_v39 = vpop.f32.mrb[61].mxu0  ;;  %v8573_v30 = vpop.f32.mrb[5].mxu1 }
 0x1b1   : > { %v6258_v42 = vadd.f32 %v6257_v39, %v6256_v1  ;;  %v6259_v62 = vpop.f32.mrb[62].mxu0  ;;  %v8575_v43 = vpop.f32.mrb[6].mxu1 }
 0x1b2   : > { %v6260_v51 = vpop.f32.mrb[63].mxu0  ;;  %v8577_v6 = vpop.f32.mrb[7].mxu1 }
 0x1b3   : > { %v8580_v37 = vadd.f32 %v6258_v42, %v8523_v53  ;;  %v6261_v46 = vadd.f32 %v6260_v51, %v6259_v62 }
 0x1b5   : > { %v8583_v18 = vadd.f32 %v6261_v46, %v8525_v15  ;;  %v8596_v15 = vld [vmem:[%s9396_s3] ss:$0 sm:$0xff] }
 0x1b7   : > { %v6320_v52 = vpop.f32.mrb[64].mxu0  ;;  %v8585_v11 = vpop.f32.mrb[8].mxu1 }
 0x1b8   : > { %v6321_v29 = vpop.f32.mrb[65].mxu0  ;;  %v8587_v21 = vpop.f32.mrb[9].mxu1 }
 0x1b9   : > { %v6322_v55 = vadd.f32 %v6321_v29, %v6320_v52  ;;  %v6323_v58 = vpop.f32.mrb[66].mxu0  ;;  %v8589_v41 = vpop.f32.mrb[10].mxu1 }
 0x1ba   : > { %v6324_v49 = vpop.f32.mrb[67].mxu0  ;;  %v8591_v10 = vpop.f32.mrb[11].mxu1 }
 0x1bb   : > { %v6910_v59 = vadd.f32 %v6909_v54, %v6322_v55  ;;  %v6325_v53 = vadd.f32 %v6324_v49, %v6323_v58 }
 0x1bd   : > { %v6911_v63 = vadd.f32 %v6910_v59, %v2487_v35  ;;  %v6916_v40 = vadd.f32 %v6915_v14, %v6325_v53 }
 0x1bf   : > { %v2593_v0 = vadd.f32 %v6911_v63, %v8596_v15  ;;  %v6917_v60 = vadd.f32 %v6916_v40, %v2490_v25  ;;  %v6326_v8 = vpop.f32.mrb[68].mxu0  ;;  %v8599_v50 = vpop.f32.mrb[12].mxu1 }
 0x1c0   : > { %v6327_v57 = vpop.f32.mrb[69].mxu0  ;;  %v8601_v56 = vpop.f32.mrb[13].mxu1 }
 0x1c1   : > { %v2613_v47 = vmax.f32 %v2593_v0, 0.0  ;;  %v2594_v54 = vadd.f32 %v6917_v60, %v8596_v15  ;;  %v6328_v9 = vadd.f32 %v6327_v57, %v6326_v8  ;;  %v6329_v16 = vpop.f32.mrb[70].mxu0  ;;  %v8604_v48 = vpop.f32.mrb[14].mxu1  ;;  %v2905_v8 = vld [vmem:[#allocation2 + $0x8] sm:$0x1] }
 0x1c2   : > { %v6330_v19 = vpop.f32.mrb[71].mxu0  ;;  %v8606_v34 = vpop.f32.mrb[15].mxu1 }
 0x1c3   : > { %v6095_v14 = vpack.c.bf16 %v2613_v47, %v2613_v47  ;;  %v2614_v35 = vmax.f32 %v2594_v54, 0.0  ;;  %v6907_v22 = vadd.f32 %v8546_v61, %v6328_v9  ;;  %v6331_v23 = vadd.f32 %v6330_v19, %v6329_v16 }
 0x1c5   : > { %v2697_v24 = vshrl.u32 %v6095_v14, 16  ;;  %v6096_v25 = vpack.c.bf16 %v2614_v35, %v2614_v35  ;;  %v6908_v28 = vadd.f32 %v6907_v22, %v6744_v5  ;;  %v6913_v1 = vadd.f32 %v8549_v45, %v6331_v23  ;;  %v2899_v5 = vld [vmem:[#allocation2] sm:$0xf] }
 0x1c6   : > { %v2700_v42 = vshll.u32 %v6095_v14, 16 }
 0x1c7   : > { %v2699_v39 = vrot.slane %v2697_v24, 7  ;;  %v2705_v62 = vshrl.u32 %v6096_v25, 16  ;;  %v2595_v51 = vadd.f32 %v6908_v28, %v8596_v15  ;;  %v6332_v46 = vpop.f32.mrb[72].mxu0  ;;  %v8611_v52 = vpop.f32.mrb[16].mxu1  ;;  %v6914_v29 = vadd.f32 %v6913_v1, %v8563_v4 }
 0x1c8   : > { %v6333_v55 = vpop.f32.mrb[73].mxu0  ;;  %v8620_v58 = vpop.f32.mrb[17].mxu1  ;;  %v2708_v53 = vshll.u32 %v6096_v25, 16 }
 0x1c9   : > { %v2702_v45 = vor.u32 %v2700_v42, %v2699_v39  ;;  %v2707_v59 = vrot.slane %v2705_v62, 7  ;;  %v2615_v63 = vmax.f32 %v2595_v51, 0.0  ;;  %v6335_v40 = vpop.f32.mrb[74].mxu0  ;;  %v8628_v0 = vpop.f32.mrb[18].mxu1  ;;  %v2703_v60 = vrot.slane %v2699_v39, 4 }
 0x1ca   : > { %v2596_v57 = vadd.f32 %v6914_v29, %v8596_v15  ;;  %v6334_v47 = vadd.f32 %v6333_v55, %v6332_v46  ;;  %v6336_v54 = vpop.f32.mrb[75].mxu0  ;;  %v8637_v9 = vpop.f32.mrb[19].mxu1  ;;  %v2908_v29 = vld [vmem:[#allocation2 + $0xc] sm:$0xf] }
 0x1cb   : > { %v2900_v16 = vsel %vm8615_vm7, %v2702_v45, %v2899_v5  ;;  %v2710_v19 = vor.u32 %v2708_v53, %v2707_v59  ;;  %v2712_v14 = vrot.slane %v2707_v59, 4  ;;  %v6097_v35 = vpack.c.bf16 %v2615_v63, %v2615_v63 }
 0x1cc   : > { %2901 = vst [vmem:[#allocation2] sm:$0xf] %v2900_v16  ;;  %v2616_v22 = vmax.f32 %v2596_v57, 0.0  ;;  %v6922_v23 = vadd.f32 %v8552_v3, %v6334_v47  ;;  %v6337_v24 = vadd.f32 %v6336_v54, %v6335_v40 }
 0x1cd   : > { %v2711_v25 = vsel %vm8632_vm9, %v2703_v60, %v2710_v19  ;;  %v2906_v28 = vsel %vm8624_vm8, %v2712_v14, %v2905_v8  ;;  %v2714_v1 = vshrl.u32 %v6097_v35, 16  ;;  %v2717_v46 = vshll.u32 %v6097_v35, 16  ;;  %v2912_v19 = vld [vmem:[#allocation2 + $0x14] sm:$0x1] }
 0x1ce   : > { %2902 = vst [vmem:[#allocation2 + $0x4] sm:$0xf] %v2711_v25  ;;  %2907 = vst [vmem:[#allocation2 + $0x8] sm:$0x1] %v2906_v28  ;;  %v6098_v39 = vpack.c.bf16 %v2616_v22, %v2616_v22  ;;  %v6923_v42 = vadd.f32 %v6922_v23, %v8573_v30  ;;  %v6928_v62 = vadd.f32 %v8555_v7, %v6337_v24 }
 0x1cf   : > { %v2716_v51 = vrot.slane %v2714_v1, 7  ;;  %v6338_v5 = vpop.f32.mrb[76].mxu0 }
 0x1d0   : > { %v2722_v3 = vshrl.u32 %v6098_v39, 16  ;;  %v2597_v55 = vadd.f32 %v6923_v42, %v8596_v15  ;;  %v6929_v45 = vadd.f32 %v6928_v62, %v8577_v6  ;;  %v6339_v59 = vpop.f32.mrb[77].mxu0  ;;  %v2725_v8 = vshll.u32 %v6098_v39, 16 }
 0x1d1   : > { %v2719_v53 = vor.u32 %v2717_v46, %v2716_v51  ;;  %v6340_v63 = vadd.f32 %v6339_v59, %v6338_v5  ;;  %v6341_v40 = vpop.f32.mrb[78].mxu0  ;;  %v2720_v16 = vrot.slane %v2716_v51, 4  ;;  %v2915_v59 = vld [vmem:[#allocation2 + $0x18] sm:$0xf] }
 0x1d2   : > { %v2724_v60 = vrot.slane %v2722_v3, 7  ;;  %v2617_v57 = vmax.f32 %v2597_v55, 0.0  ;;  %v2598_v30 = vadd.f32 %v6929_v45, %v8596_v15  ;;  %v6342_v47 = vpop.f32.mrb[79].mxu0 }
 0x1d3   : > { %v2971_v7 = vld [vmem:[#allocation2] sm:$0x1]  ;;  %v2909_v6 = vsel %vm8615_vm7, %v2719_v53, %v2908_v29  ;;  %v6919_v14 = vadd.f32 %v8558_v2, %v6340_v63  ;;  %v6343_v35 = vadd.f32 %v6342_v47, %v6341_v40 }
 0x1d4   : > { %v2972_v22 = vsel %vm8624_vm8, 0, %v2971_v7  ;;  %2910 = vst [vmem:[#allocation2 + $0xc] sm:$0xf] %v2909_v6  ;;  %v2727_v23 = vor.u32 %v2725_v8, %v2724_v60  ;;  %v2729_v24 = vrot.slane %v2724_v60, 4  ;;  %v6099_v25 = vpack.c.bf16 %v2617_v57, %v2617_v57 }
 0x1d5   : > { %2973 = vst [vmem:[#allocation2] sm:$0x1] %v2972_v22  ;;  %v3002_v28 = vld [vmem:[#allocation2 + $0x8] sm:$0x1]  ;;  %v2618_v1 = vmax.f32 %v2598_v30, 0.0  ;;  %v6920_v39 = vadd.f32 %v6919_v14, %v8571_v13  ;;  %v6925_v42 = vadd.f32 %v8561_v44, %v6343_v35 }
 0x1d6   : > { %v3003_v62 = vsel %vm8653_vm10, 0, %v3002_v28  ;;  %v2728_v2 = vsel %vm8632_vm9, %v2720_v16, %v2727_v23  ;;  %v2913_v51 = vsel %vm8624_vm8, %v2729_v24, %v2912_v19  ;;  %v2731_v46 = vshrl.u32 %v6099_v25, 16  ;;  %v2919_v22 = vld [vmem:[#allocation2 + $0x20] sm:$0x1] }
 0x1d7   : > { %3004 = vst [vmem:[#allocation2 + $0x8] sm:$0x1] %v3003_v62  ;;  %2911 = vst [vmem:[#allocation2 + $0x10] sm:$0xf] %v2728_v2  ;;  %v6100_v5 = vpack.c.bf16 %v2618_v1, %v2618_v1  ;;  %v2599_v29 = vadd.f32 %v6920_v39, %v8596_v15  ;;  %v6926_v13 = vadd.f32 %v6925_v42, %v8575_v43  ;;  %v6344_v3 = vpop.f32.mrb[80].mxu0  ;;  %v2734_v55 = vshll.u32 %v6099_v25, 16 }
 0x1d8   : > { %2914 = vst [vmem:[#allocation2 + $0x14] sm:$0x1] %v2913_v51  ;;  %v2733_v44 = vrot.slane %v2731_v46, 7  ;;  %v6345_v45 = vpop.f32.mrb[81].mxu0 }
 0x1d9   : > { %v2739_v53 = vshrl.u32 %v6100_v5, 16  ;;  %v2619_v63 = vmax.f32 %v2599_v29, 0.0  ;;  %v2600_v40 = vadd.f32 %v6926_v13, %v8596_v15  ;;  %v6347_v60 = vpop.f32.mrb[82].mxu0  ;;  %v2742_v57 = vshll.u32 %v6100_v5, 16 }
 0x1da   : > { %v2736_v8 = vor.u32 %v2734_v55, %v2733_v44  ;;  %v6346_v30 = vadd.f32 %v6345_v45, %v6344_v3  ;;  %v6348_v47 = vpop.f32.mrb[83].mxu0  ;;  %v2737_v24 = vrot.slane %v2733_v44, 4  ;;  %v2922_v3 = vld [vmem:[#allocation2 + $0x24] sm:$0xf] }
 0x1db   : > { %v2974_v7 = vld [vmem:[#allocation2 + $0xc] sm:$0x1]  ;;  %v2741_v16 = vrot.slane %v2739_v53, 7  ;;  %v6101_v6 = vpack.c.bf16 %v2619_v63, %v2619_v63  ;;  %v2620_v19 = vmax.f32 %v2600_v40, 0.0  ;;  %v6349_v14 = vadd.f32 %v6348_v47, %v6347_v60 }
 0x1dc   : > { %v2975_v43 = vsel %vm8624_vm8, 0, %v2974_v7  ;;  %v2916_v35 = vsel %vm8615_vm7, %v2736_v8, %v2915_v59  ;;  %v6934_v23 = vadd.f32 %v8566_v27, %v6346_v30  ;;  %v2926_v7 = vld [vmem:[#allocation2 + $0x2c] sm:$0x1] }
 0x1dd   : > { %2976 = vst [vmem:[#allocation2 + $0xc] sm:$0x1] %v2975_v43  ;;  %2917 = vst [vmem:[#allocation2 + $0x18] sm:$0xf] %v2916_v35  ;;  %v2744_v25 = vor.u32 %v2742_v57, %v2741_v16  ;;  %v2746_v28 = vrot.slane %v2741_v16, 4  ;;  %v2748_v1 = vshrl.u32 %v6101_v6, 16  ;;  %v6102_v62 = vpack.c.bf16 %v2620_v19, %v2620_v19 }
 0x1de   : > { %v2751_v42 = vshll.u32 %v6101_v6, 16  ;;  %v6935_v2 = vadd.f32 %v6934_v23, %v8587_v21  ;;  %v6940_v51 = vadd.f32 %v8569_v17, %v6349_v14 }
 0x1df   : > { %v3005_v39 = vld [vmem:[#allocation2 + $0x14] sm:$0x1]  ;;  %v2745_v5 = vsel %vm8632_vm9, %v2737_v24, %v2744_v25  ;;  %v2920_v27 = vsel %vm8624_vm8, %v2746_v28, %v2919_v22  ;;  %v2750_v29 = vrot.slane %v2748_v1, 7  ;;  %v6350_v13 = vpop.f32.mrb[84].mxu0  ;;  %v2756_v44 = vshrl.u32 %v6102_v62, 16 }
 0x1e0   : > { %v3006_v46 = vsel %vm8653_vm10, 0, %v3005_v39  ;;  %2918 = vst [vmem:[#allocation2 + $0x1c] sm:$0xf] %v2745_v5  ;;  %2921 = vst [vmem:[#allocation2 + $0x20] sm:$0x1] %v2920_v27  ;;  %v2601_v21 = vadd.f32 %v6935_v2, %v8596_v15  ;;  %v6941_v17 = vadd.f32 %v6940_v51, %v8591_v10  ;;  %v6351_v55 = vpop.f32.mrb[85].mxu0 }
 0x1e1   : > { %3007 = vst [vmem:[#allocation2 + $0x14] sm:$0x1] %v3006_v46  ;;  %v2753_v45 = vor.u32 %v2751_v42, %v2750_v29  ;;  %v6352_v59 = vadd.f32 %v6351_v55, %v6350_v13  ;;  %v6353_v53 = vpop.f32.mrb[86].mxu0  ;;  %v2758_v63 = vrot.slane %v2756_v44, 7  ;;  %v2759_v40 = vshll.u32 %v6102_v62, 16 }
 0x1e2   : > { %v2621_v60 = vmax.f32 %v2601_v21, 0.0  ;;  %v2602_v8 = vadd.f32 %v6941_v17, %v8596_v15  ;;  %v6354_v57 = vpop.f32.mrb[87].mxu0  ;;  %v2754_v30 = vrot.slane %v2750_v29, 4  ;;  %v2929_v5 = vld [vmem:[#allocation2 + $0x30] sm:$0xf] }
 0x1e3   : > { %v2923_v47 = vsel %vm8615_vm7, %v2753_v45, %v2922_v3  ;;  %v6931_v16 = vadd.f32 %v8580_v37, %v6352_v59  ;;  %v6355_v6 = vadd.f32 %v6354_v57, %v6353_v53  ;;  %v2761_v10 = vor.u32 %v2759_v40, %v2758_v63 }
 0x1e4   : > { %v2977_v19 = vld [vmem:[#allocation2 + $0x18] sm:$0x1]  ;;  %2924 = vst [vmem:[#allocation2 + $0x24] sm:$0xf] %v2923_v47  ;;  %v2763_v14 = vrot.slane %v2758_v63, 4  ;;  %v6103_v43 = vpack.c.bf16 %v2621_v60, %v2621_v60  ;;  %v2622_v35 = vmax.f32 %v2602_v8, 0.0 }
 0x1e5   : > { %v2978_v22 = vsel %vm8624_vm8, 0, %v2977_v19  ;;  %v6932_v23 = vadd.f32 %v6931_v16, %v8585_v11  ;;  %v6937_v24 = vadd.f32 %v8583_v18, %v6355_v6  ;;  %v2762_v25 = vsel %vm8632_vm9, %v2754_v30, %v2761_v10  ;;  %v2933_v8 = vld [vmem:[#allocation2 + $0x38] sm:$0x1] }
 0x1e6   : > { %2979 = vst [vmem:[#allocation2 + $0x18] sm:$0x1] %v2978_v22  ;;  %v2927_v37 = vsel %vm8624_vm8, %v2763_v14, %v2926_v7  ;;  %v2765_v28 = vshrl.u32 %v6103_v43, 16  ;;  %2925 = vst [vmem:[#allocation2 + $0x28] sm:$0xf] %v2762_v25  ;;  %v6104_v39 = vpack.c.bf16 %v2622_v35, %v2622_v35  ;;  %v2768_v51 = vshll.u32 %v6103_v43, 16 }
 0x1e7   : > { %v3008_v1 = vld [vmem:[#allocation2 + $0x20] sm:$0x1]  ;;  %2928 = vst [vmem:[#allocation2 + $0x2c] sm:$0x1] %v2927_v37  ;;  %v2603_v42 = vadd.f32 %v6932_v23, %v8596_v15  ;;  %v6938_v62 = vadd.f32 %v6937_v24, %v8589_v41  ;;  %v6356_v2 = vpop.f32.mrb[88].mxu0 }
 0x1e8   : > { %v3009_v18 = vsel %vm8653_vm10, 0, %v3008_v1  ;;  %v2767_v11 = vrot.slane %v2765_v28, 7  ;;  %v6357_v46 = vpop.f32.mrb[89].mxu0  ;;  %v2773_v27 = vshrl.u32 %v6104_v39, 16  ;;  %v2776_v21 = vshll.u32 %v6104_v39, 16 }
 0x1e9   : > { %3010 = vst [vmem:[#allocation2 + $0x20] sm:$0x1] %v3009_v18  ;;  %v2623_v29 = vmax.f32 %v2603_v42, 0.0  ;;  %v2604_v13 = vadd.f32 %v6938_v62, %v8596_v15  ;;  %v6359_v3 = vpop.f32.mrb[90].mxu0  ;;  %v6358_v17 = vadd.f32 %v6357_v46, %v6356_v2  ;;  %v2936_v25 = vld [vmem:[#allocation2 + $0x3c] sm:$0xf] }
 0x1ea   : > { %v2770_v44 = vor.u32 %v2768_v51, %v2767_v11  ;;  %v6360_v55 = vpop.f32.mrb[91].mxu0  ;;  %v2775_v41 = vrot.slane %v2773_v27, 7  ;;  %v2771_v30 = vrot.slane %v2767_v11, 4  ;;  %v2940_v27 = vld [vmem:[#allocation2 + $0x44] sm:$0x1] }
 0x1eb   : > { %v2980_v45 = vld [vmem:[#allocation2 + $0x24] sm:$0x1]  ;;  %v6105_v59 = vpack.c.bf16 %v2623_v29, %v2623_v29  ;;  %v2624_v53 = vmax.f32 %v2604_v13, 0.0  ;;  %v6361_v63 = vadd.f32 %v6360_v55, %v6359_v3  ;;  %v6946_v57 = vadd.f32 %v8527_v12, %v6358_v17 }
 0x1ec   : > { %v2981_v40 = vsel %vm8624_vm8, 0, %v2980_v45  ;;  %v2930_v60 = vsel %vm8615_vm7, %v2770_v44, %v2929_v5  ;;  %v2778_v47 = vor.u32 %v2776_v21, %v2775_v41  ;;  %v2780_v7 = vrot.slane %v2775_v41, 4 }
 0x1ed   : > { %2982 = vst [vmem:[#allocation2 + $0x24] sm:$0x1] %v2981_v40  ;;  %2931 = vst [vmem:[#allocation2 + $0x30] sm:$0xf] %v2930_v60  ;;  %v2782_v16 = vshrl.u32 %v6105_v59, 16  ;;  %v2785_v19 = vshll.u32 %v6105_v59, 16  ;;  %v6106_v10 = vpack.c.bf16 %v2624_v53, %v2624_v53  ;;  %v6947_v14 = vadd.f32 %v6946_v57, %v8601_v56 }
 0x1ee   : > { %v3011_v6 = vld [vmem:[#allocation2 + $0x2c] sm:$0x1]  ;;  %v6952_v43 = vadd.f32 %v8529_v38, %v6361_v63  ;;  %v2779_v22 = vsel %vm8632_vm9, %v2771_v30, %v2778_v47  ;;  %v2934_v12 = vsel %vm8624_vm8, %v2780_v7, %v2933_v8  ;;  %v2943_v7 = vld [vmem:[#allocation2 + $0x48] sm:$0xf] }
 0x1ef   : > { %v3012_v35 = vsel %vm8653_vm10, 0, %v3011_v6  ;;  %v2784_v23 = vrot.slane %v2782_v16, 7  ;;  %v6362_v24 = vpop.f32.mrb[92].mxu0  ;;  %2932 = vst [vmem:[#allocation2 + $0x34] sm:$0xf] %v2779_v22  ;;  %v2790_v37 = vshrl.u32 %v6106_v10, 16  ;;  %v2605_v56 = vadd.f32 %v6947_v14, %v8596_v15 }
 0x1f0   : > { %3013 = vst [vmem:[#allocation2 + $0x2c] sm:$0x1] %v3012_v35  ;;  %2935 = vst [vmem:[#allocation2 + $0x38] sm:$0x1] %v2934_v12  ;;  %v6953_v38 = vadd.f32 %v6952_v43, %v8606_v34  ;;  %v6363_v28 = vpop.f32.mrb[93].mxu0  ;;  %v2793_v2 = vshll.u32 %v6106_v10, 16 }
 0x1f1   : > { %v2787_v1 = vor.u32 %v2785_v19, %v2784_v23  ;;  %v6364_v39 = vadd.f32 %v6363_v28, %v6362_v24  ;;  %v6365_v42 = vpop.f32.mrb[94].mxu0  ;;  %v2792_v62 = vrot.slane %v2790_v37, 7  ;;  %v2625_v18 = vmax.f32 %v2605_v56, 0.0 }
 0x1f2   : > { %v2606_v11 = vadd.f32 %v6953_v38, %v8596_v15  ;;  %v6366_v51 = vpop.f32.mrb[95].mxu0  ;;  %v2788_v46 = vrot.slane %v2784_v23, 4  ;;  %v2947_v38 = vld [vmem:[#allocation2 + $0x50] sm:$0x1] }
 0x1f3   : > { %v2937_v5 = vsel %vm8615_vm7, %v2787_v1, %v2936_v25  ;;  %v6943_v29 = vadd.f32 %v8531_v36, %v6364_v39  ;;  %v6367_v13 = vadd.f32 %v6366_v51, %v6365_v42  ;;  %v2795_v34 = vor.u32 %v2793_v2, %v2792_v62 }
 0x1f4   : > { %v2983_v3 = vld [vmem:[#allocation2 + $0x30] sm:$0x1]  ;;  %2938 = vst [vmem:[#allocation2 + $0x3c] sm:$0xf] %v2937_v5  ;;  %v2797_v44 = vrot.slane %v2792_v62, 4  ;;  %v6107_v21 = vpack.c.bf16 %v2625_v18, %v2625_v18  ;;  %v2626_v17 = vmax.f32 %v2606_v11, 0.0 }
 0x1f5   : > { %v2984_v55 = vsel %vm8624_vm8, 0, %v2983_v3  ;;  %v6944_v45 = vadd.f32 %v6943_v29, %v8599_v50  ;;  %v6949_v41 = vadd.f32 %v8533_v31, %v6367_v13  ;;  %v2796_v59 = vsel %vm8632_vm9, %v2788_v46, %v2795_v34  ;;  %v2950_v3 = vld [vmem:[#allocation2 + $0x54] sm:$0xf] }
 0x1f6   : > { %2985 = vst [vmem:[#allocation2 + $0x30] sm:$0x1] %v2984_v55  ;;  %v2941_v36 = vsel %vm8624_vm8, %v2797_v44, %v2940_v27  ;;  %v2799_v53 = vshrl.u32 %v6107_v21, 16  ;;  %2939 = vst [vmem:[#allocation2 + $0x40] sm:$0xf] %v2796_v59  ;;  %v6108_v40 = vpack.c.bf16 %v2626_v17, %v2626_v17  ;;  %v2802_v30 = vshll.u32 %v6107_v21, 16 }
 0x1f7   : > { %v3014_v63 = vld [vmem:[#allocation2 + $0x38] sm:$0x1]  ;;  %2942 = vst [vmem:[#allocation2 + $0x44] sm:$0x1] %v2941_v36  ;;  %v2607_v60 = vadd.f32 %v6944_v45, %v8596_v15  ;;  %v6950_v8 = vadd.f32 %v6949_v41, %v8604_v48  ;;  %v6368_v57 = vpop.f32.mrb[96].mxu0 }
 0x1f8   : > { %v3015_v31 = vsel %vm8653_vm10, 0, %v3014_v63  ;;  %v2801_v50 = vrot.slane %v2799_v53, 7  ;;  %v6369_v47 = vpop.f32.mrb[97].mxu0  ;;  %v2807_v16 = vshrl.u32 %v6108_v40, 16  ;;  %v2810_v43 = vshll.u32 %v6108_v40, 16 }
 0x1f9   : > { %3016 = vst [vmem:[#allocation2 + $0x38] sm:$0x1] %v3015_v31  ;;  %v2627_v6 = vmax.f32 %v2607_v60, 0.0  ;;  %v2608_v19 = vadd.f32 %v6950_v8, %v8596_v15  ;;  %v6371_v10 = vpop.f32.mrb[98].mxu0  ;;  %v6370_v35 = vadd.f32 %v6369_v47, %v6368_v57  ;;  %v2954_v60 = vld [vmem:[#allocation2 + $0x5c] sm:$0x1] }
 0x1fa   : > { %v2804_v14 = vor.u32 %v2802_v30, %v2801_v50  ;;  %v6372_v22 = vpop.f32.mrb[99].mxu0  ;;  %v2809_v48 = vrot.slane %v2807_v16, 7  ;;  %v2805_v1 = vrot.slane %v2801_v50, 4 }
 0x1fb   : > { %v2986_v12 = vld [vmem:[#allocation2 + $0x3c] sm:$0x1]  ;;  %v6109_v23 = vpack.c.bf16 %v2627_v6, %v2627_v6  ;;  %v2628_v24 = vmax.f32 %v2608_v19, 0.0  ;;  %v6373_v25 = vadd.f32 %v6372_v22, %v6371_v10  ;;  %v6958_v28 = vadd.f32 %v8535_v26, %v6370_v35 }
 0x1fc   : > { %v2987_v37 = vsel %vm8624_vm8, 0, %v2986_v12  ;;  %v2944_v56 = vsel %vm8615_vm7, %v2804_v14, %v2943_v7  ;;  %v2812_v39 = vor.u32 %v2810_v43, %v2809_v48  ;;  %v2814_v42 = vrot.slane %v2809_v48, 4  ;;  %v2957_v48 = vld [vmem:[#allocation2 + $0x60] sm:$0xf] }
 0x1fd   : > { %2988 = vst [vmem:[#allocation2 + $0x3c] sm:$0x1] %v2987_v37  ;;  %2945 = vst [vmem:[#allocation2 + $0x48] sm:$0xf] %v2944_v56  ;;  %v2816_v62 = vshrl.u32 %v6109_v23, 16  ;;  %v2819_v18 = vshll.u32 %v6109_v23, 16  ;;  %v6110_v11 = vpack.c.bf16 %v2628_v24, %v2628_v24  ;;  %v6959_v51 = vadd.f32 %v6958_v28, %v8620_v58 }
 0x1fe   : > { %v3017_v2 = vld [vmem:[#allocation2 + $0x44] sm:$0x1]  ;;  %v6964_v46 = vadd.f32 %v8537_v32, %v6373_v25  ;;  %v2813_v27 = vsel %vm8632_vm9, %v2805_v1, %v2812_v39  ;;  %v2948_v26 = vsel %vm8624_vm8, %v2814_v42, %v2947_v38 }
 0x1ff   : > { %v3018_v5 = vsel %vm8653_vm10, 0, %v3017_v2  ;;  %v2818_v29 = vrot.slane %v2816_v62, 7  ;;  %v6374_v13 = vpop.f32.mrb[100].mxu0  ;;  %2946 = vst [vmem:[#allocation2 + $0x4c] sm:$0xf] %v2813_v27  ;;  %v2824_v34 = vshrl.u32 %v6110_v11, 16  ;;  %v2609_v58 = vadd.f32 %v6959_v51, %v8596_v15 }
 0x200   : > { %3019 = vst [vmem:[#allocation2 + $0x44] sm:$0x1] %v3018_v5  ;;  %2949 = vst [vmem:[#allocation2 + $0x50] sm:$0x1] %v2948_v26  ;;  %v6965_v32 = vadd.f32 %v6964_v46, %v8637_v9  ;;  %v6375_v44 = vpop.f32.mrb[101].mxu0  ;;  %v2827_v41 = vshll.u32 %v6110_v11, 16 }
 0x201   : > { %v2821_v21 = vor.u32 %v2819_v18, %v2818_v29  ;;  %v6376_v17 = vadd.f32 %v6375_v44, %v6374_v13  ;;  %v6377_v55 = vpop.f32.mrb[102].mxu0  ;;  %v2826_v45 = vrot.slane %v2824_v34, 7  ;;  %v2629_v59 = vmax.f32 %v2609_v58, 0.0  ;;  %v2961_v62 = vld [vmem:[#allocation2 + $0x68] sm:$0x1] }
 0x202   : > { %v2610_v36 = vadd.f32 %v6965_v32, %v8596_v15  ;;  %v6378_v53 = vpop.f32.mrb[103].mxu0  ;;  %v2822_v63 = vrot.slane %v2818_v29, 4 }
 0x203   : > { %v2951_v40 = vsel %vm8615_vm7, %v2821_v21, %v2950_v3  ;;  %v6955_v8 = vadd.f32 %v8539_v33, %v6376_v17  ;;  %v6379_v57 = vadd.f32 %v6378_v53, %v6377_v55  ;;  %v2829_v9 = vor.u32 %v2827_v41, %v2826_v45  ;;  %v2964_v3 = vld [vmem:[#allocation2 + $0x6c] sm:$0xf]  ;;  %v2968_v17 = vld [vmem:[#allocation2 + $0x74] sm:$0x1] }
 0x204   : > { %v2989_v31 = vld [vmem:[#allocation2 + $0x48] sm:$0x1]  ;;  %2952 = vst [vmem:[#allocation2 + $0x54] sm:$0xf] %v2951_v40  ;;  %v2831_v50 = vrot.slane %v2826_v45, 4  ;;  %v6111_v30 = vpack.c.bf16 %v2629_v59, %v2629_v59  ;;  %v2630_v47 = vmax.f32 %v2610_v36, 0.0 }
 0x205   : > { %v2990_v7 = vsel %vm8624_vm8, 0, %v2989_v31  ;;  %v6956_v16 = vadd.f32 %v6955_v8, %v8611_v52  ;;  %v6961_v6 = vadd.f32 %v8541_v20, %v6379_v57  ;;  %v2830_v19 = vsel %vm8632_vm9, %v2822_v63, %v2829_v9 }
 0x206   : > { %2991 = vst [vmem:[#allocation2 + $0x48] sm:$0x1] %v2990_v7  ;;  %v2955_v33 = vsel %vm8624_vm8, %v2831_v50, %v2954_v60  ;;  %v2833_v10 = vshrl.u32 %v6111_v30, 16  ;;  %2953 = vst [vmem:[#allocation2 + $0x58] sm:$0xf] %v2830_v19  ;;  %v6112_v43 = vpack.c.bf16 %v2630_v47, %v2630_v47  ;;  %v2836_v12 = vshll.u32 %v6111_v30, 16 }
 0x207   : > { %v3020_v14 = vld [vmem:[#allocation2 + $0x50] sm:$0x1]  ;;  %2956 = vst [vmem:[#allocation2 + $0x5c] sm:$0x1] %v2955_v33  ;;  %v2611_v35 = vadd.f32 %v6956_v16, %v8596_v15  ;;  %v6962_v22 = vadd.f32 %v6961_v6, %v8628_v0  ;;  %v7668_v31 = vmov (!%p5899_p8), 0  }
 0x208   : > { %v3021_v52 = vsel %vm8653_vm10, 0, %v3020_v14  ;;  %v2835_v20 = vrot.slane %v2833_v10, 7  ;;  %v2841_v23 = vshrl.u32 %v6112_v43, 16  ;;  %v2844_v28 = vshll.u32 %v6112_v43, 16  ;;  %3036 = vst [vmem:[#allocation2] sm:$0xf] (!%p5899_p8), %v7668_v31 }
 0x209   : > { %3022 = vst [vmem:[#allocation2 + $0x50] sm:$0x1] %v3021_v52  ;;  %v2631_v24 = vmax.f32 %v2611_v35, 0.0  ;;  %v2612_v25 = vadd.f32 %v6962_v22, %v8596_v15  ;;  %3037 = vst [vmem:[#allocation2 + $0x4] sm:$0xf] (!%p5899_p8), %v7668_v31 }
 0x20a   : > { %v2838_v37 = vor.u32 %v2836_v12, %v2835_v20  ;;  %v2843_v38 = vrot.slane %v2841_v23, 7  ;;  %v2839_v2 = vrot.slane %v2835_v20, 4  ;;  %3038 = vst [vmem:[#allocation2 + $0x8] sm:$0x1] (!%p5899_p8), %v7668_v31 }
 0x20b   : > { %v2992_v56 = vld [vmem:[#allocation2 + $0x54] sm:$0x1]  ;;  %v6113_v1 = vpack.c.bf16 %v2631_v24, %v2631_v24  ;;  %v2632_v39 = vmax.f32 %v2612_v25, 0.0 }
 0x20c   : > { %v2993_v0 = vsel %vm8624_vm8, 0, %v2992_v56  ;;  %v2958_v42 = vsel %vm8615_vm7, %v2838_v37, %v2957_v48  ;;  %v2846_v18 = vor.u32 %v2844_v28, %v2843_v38  ;;  %v2848_v11 = vrot.slane %v2843_v38, 4 }
 0x20d   : > { %2994 = vst [vmem:[#allocation2 + $0x54] sm:$0x1] %v2993_v0  ;;  %2959 = vst [vmem:[#allocation2 + $0x60] sm:$0xf] %v2958_v42  ;;  %v2850_v51 = vshrl.u32 %v6113_v1, 16  ;;  %v2853_v46 = vshll.u32 %v6113_v1, 16  ;;  %v6114_v5 = vpack.c.bf16 %v2632_v39, %v2632_v39 }
 0x20e   : > { %v3023_v15 = vld [vmem:[#allocation2 + $0x5c] sm:$0x1]  ;;  %v2847_v26 = vsel %vm8632_vm9, %v2839_v2, %v2846_v18  ;;  %v2962_v29 = vsel %vm8624_vm8, %v2848_v11, %v2961_v62 }
 0x20f   : > { %v3024_v27 = vsel %vm8653_vm10, 0, %v3023_v15  ;;  %v2852_v13 = vrot.slane %v2850_v51, 7  ;;  %2960 = vst [vmem:[#allocation2 + $0x64] sm:$0xf] %v2847_v26  ;;  %2963 = vst [vmem:[#allocation2 + $0x68] sm:$0x1] %v2962_v29 }
 0x210   : > { %3025 = vst [vmem:[#allocation2 + $0x5c] sm:$0x1] %v3024_v27  ;;  %v2858_v34 = vshrl.u32 %v6114_v5, 16  ;;  %v2861_v44 = vshll.u32 %v6114_v5, 16 }
 0x211   : > { %v2855_v58 = vor.u32 %v2853_v46, %v2852_v13  ;;  %v2856_v45 = vrot.slane %v2852_v13, 4 }
 0x212   : > { %v2860_v32 = vrot.slane %v2858_v34, 7 }
 0x213   : > { %v2965_v21 = vsel %vm8615_vm7, %v2855_v58, %v2964_v3 }
 0x214   : > { %v2995_v55 = vld [vmem:[#allocation2 + $0x60] sm:$0x1]  ;;  %2966 = vst [vmem:[#allocation2 + $0x6c] sm:$0xf] %v2965_v21  ;;  %v2863_v41 = vor.u32 %v2861_v44, %v2860_v32  ;;  %v2865_v59 = vrot.slane %v2860_v32, 4 }
 0x215   : > { %v2996_v36 = vsel %vm8624_vm8, 0, %v2995_v55 }
 0x216   : > { %2997 = vst [vmem:[#allocation2 + $0x60] sm:$0x1] %v2996_v36  ;;  %v2864_v53 = vsel %vm8632_vm9, %v2856_v45, %v2863_v41  ;;  %v2969_v63 = vsel %vm8624_vm8, %v2865_v59, %v2968_v17  ;;  %v3026_v40 = vld [vmem:[#allocation2 + $0x68] sm:$0x1] }
 0x217   : > { %2967 = vst [vmem:[#allocation2 + $0x70] sm:$0xf] %v2864_v53  ;;  %2970 = vst [vmem:[#allocation2 + $0x74] sm:$0x1] %v2969_v63  ;;  %v3027_v61 = vsel %vm8653_vm10, 0, %v3026_v40 }
 0x218   : > { %3028 = vst [vmem:[#allocation2 + $0x68] sm:$0x1] %v3027_v61 }
 0x21a   : > { %3035 = sbr.rel (%p5899_p8) target bundleno = 545 (0x221), region = 56 }
 0x21b   : > { %v2998_v60 = vld [vmem:[#allocation2 + $0x6c] sm:$0x1] }
 0x21c   : > { %v2999_v8 = vsel %vm8624_vm8, 0, %v2998_v60 }
 0x21d   : > { %3000 = vst [vmem:[#allocation2 + $0x6c] sm:$0x1] %v2999_v8 }
 0x21e   : > { %v3029_v57 = vld [vmem:[#allocation2 + $0x74] sm:$0x1] }
 0x21f   : > { %v3030_v4 = vsel %vm8653_vm10, 0, %v3029_v57 }
 0x220   : > { %3031 = vst [vmem:[#allocation2 + $0x74] sm:$0x1] %v3030_v4 }
 0x221 PF: > { %p5900_p10 = scmp.ne.s32.totalorder %s7647_s27, 1 }
 0x222   : > { %v7669_v49 = vmov (!%p5900_p10), 0  }
 0x223   : > { %3042 = sbr.rel (%p5900_p10) target bundleno = 554 (0x22a), region = 60  ;;  %3044 = vst [vmem:[#allocation2 + $0x6c] sm:$0xf] (!%p5900_p10), %v7669_v49  ;;  %3045 = vst [vmem:[#allocation2 + $0x70] sm:$0xf] (!%p5900_p10), %v7669_v49 }
 0x224   : > { %3046 = vst [vmem:[#allocation2 + $0x74] sm:$0x1] (!%p5900_p10), %v7669_v49 }
 0x22a PF: > { %v7385_v54 = vld [vmem:[#allocation3 + $0x100] sm:$0xff]   ;;  %v7388_v30 = vld [vmem:[#allocation3 + $0x108] sm:$0xff]   ;;  %v7391_v16 = vld [vmem:[#allocation3 + $0x110] sm:$0xff]   ;;  %vm5062_vm11 = vsmask.f32 3328  ;;  %s6115_s11 = sshll.u32 %s7647_s27, 4 }
 0x22b   : > { %v7386_v9 = vld [vmem:[#allocation3 + $0x140] sm:$0xff]   ;;  %6398 = vmatprep.subr.bf16.mxu0 %v7385_v54  ;;  %v7389_v47 = vld [vmem:[#allocation3 + $0x148] sm:$0xff]   ;;  %v7392_v6 = vld [vmem:[#allocation3 + $0x150] sm:$0xff]   ;;  %vm5063_vm12 = vsmask.f32 7440  ;;  %s6090_s23 = sshll.u32 %s7651_s28, 5 }
 0x22c   : > { %v7387_v50 = vld [vmem:[#allocation3 + $0xc0] sm:$0xff]   ;;  %6762 = vmatprep.subr.bf16.mxu1 %v7386_v9  ;;  %v7390_v7 = vld [vmem:[#allocation3 + $0xc8] sm:$0xff]   ;;  %v7393_v19 = vld [vmem:[#allocation3 + $0xd0] sm:$0xff]   ;;  %s5519_s10 = sadd.s32 %s6115_s11, %s6090_s23  ;;  %s5522_s28 = sshll.u32 %s8794_s13, 4  ;;  %s9334_s28 = int_to_ptr.vmem [resolvable:$true] %s5522_s28 }
 0x22d   : > { %6399 = vmatpush3.bf16.msra.mxu0 %v7387_v50  ;;  %6763 = vmatpush3.bf16.msra.mxu1 %v7386_v9  ;;  %v7394_v33 = vld [vmem:[#allocation3 + $0x118] sm:$0xff]   ;;  %v7397_v43 = vld [vmem:[#allocation3 + $0x120] sm:$0xff]   ;;  %v7400_v52 = vld [vmem:[#allocation3 + $0x128] sm:$0xff]   ;;  %s6091_s27 = sshll.u32 %s5519_s10, 7  ;;  %s9429_s12 = sand.u32 1, %s7639_s25  }
 0x22e   : > { %6400 = vmatprep.subr.bf16.mxu0 %v7388_v30  ;;  %6764 = vmatprep.subr.bf16.mxu1 %v7389_v47  ;;  %v7395_v10 = vld [vmem:[#allocation3 + $0x158] sm:$0xff]   ;;  %v7398_v35 = vld [vmem:[#allocation3 + $0x160] sm:$0xff]   ;;  %v7401_v20 = vld [vmem:[#allocation3 + $0x168] sm:$0xff]   ;;  %s9332_s22 = scalar_lea.hbm %s9400_s7, %s6091_s27  ;;  %s9341_s14 = scalar_lea.sflag [#allocation5], %s9429_s12 }
 0x22f   : > { %v7396_v14 = vld [vmem:[#allocation3 + $0xd8] sm:$0xff]   ;;  %v7399_v22 = vld [vmem:[#allocation3 + $0xe0] sm:$0xff]   ;;  %v7402_v12 = vld [vmem:[#allocation3 + $0xe8] sm:$0xff]   ;;  %p9430_p0 = scmp.ne.s32.totalorder %s9410_s15, 0  ;;  %s7670_s18 = smov [#allocation6]  }
 0x230   : > { %v7403_v48 = vld [vmem:[#allocation3 + $0x130] sm:$0xff]   ;;  %v7406_v25 = vld [vmem:[#allocation3 + $0x138] sm:$0xff]   ;;  %v3362_v62 = vld [vmem:[#allocation2 + $0x18] sm:$0xf]  ;;  %s7569_s2 = sshll.u32 %s7670_s18, 4  ;;  %s7570_s2 = int_to_ptr.vmem [resolvable:$false] %s7569_s2 }
 0x231   : > { %6401 = vmatpush3.bf16.msra.mxu0 %v7390_v7  ;;  %6765 = vmatpush3.bf16.msra.mxu1 %v7389_v47  ;;  %v7404_v23 = vld [vmem:[#allocation3 + $0x170] sm:$0xff]   ;;  %v3361_v56 = vld [vmem:[#allocation2 + $0x10] sm:$0xf]  ;;  %v7410_v1 = vld [vmem:[#allocation2 + $0x14] ss:$0 sps:$4 sm:$0x11]   ;;  %p7572_p6 = scmp.lt.s32.totalorder %s9334_s28, %s7570_s2 }
 0x232   : > { %6402 = vmatprep.subr.bf16.mxu0 %v7391_v16  ;;  %6766 = vmatprep.subr.bf16.mxu1 %v7392_v6  ;;  %v7405_v24 = vld [vmem:[#allocation3 + $0xf0] sm:$0xff]   ;;  %v7407_v38 = vld [vmem:[#allocation3 + $0x178] sm:$0xff]   ;;  %v3363_v2 = vld [vmem:[#allocation2 + $0x1c] sm:$0xf]  ;;  %v3472_v51 = vshll.u32 %v7410_v1, 16  ;;  %v3593_v15 = vrot.slane %v7410_v1, 1 }
 0x233   : > { %v3360_v37 = vld [vmem:[#allocation2 + $0xc] sm:$0xf]  ;;  %v7408_v0 = vld [vmem:[#allocation3 + $0xf8] sm:$0xff]   ;;  %v3385_v46 = vld [vmem:[#allocation2 + $0x18] sm:$0xe]  ;;  %v8798_v26 = vcombine.low %v3362_v62, %v3363_v2  ;;  %s7571_s17 = scalar_lea.vmem %s7570_s2, 4096 }
 0x234   : > { %v5925_v28 = vcombine.low %v3360_v37, %v3361_v56  ;;  %v3384_v39 = vld [vmem:[#allocation2 + $0xc] sm:$0xe]  ;;  %v7415_v5 = vld [vmem:[#allocation3 + $0x80] sm:$0xff]   ;;  %v7413_v29 = vld [vmem:[#allocation2 + $0x20] ss:$0 sps:$4 sm:$0x11]   ;;  %v5942_v13 = vcombine.low %v3385_v46, %v3363_v2 }
 0x235   : > { %6403 = vmatpush3.bf16.msra.mxu0 %v7393_v19  ;;  %6767 = vmatpush3.bf16.msra.mxu1 %v7392_v6  ;;  %v5941_v42 = vcombine.low %v3384_v39, %v3361_v56  ;;  %v3474_v34 = vrot.slane %v3472_v51, 1  ;;  %v3596_v44 = vrot.slane %v7413_v29, 1  ;;  %v3477_v21 = vshrl.u32 %v8798_v26, 16  ;;  %v3364_v41 = vld [vmem:[#allocation2 + $0x24] sm:$0xf]  ;;  %v7431_v51 = vld [vmem:[#allocation3 + $0xa0] sm:$0xff]   ;;  %vm9110_vm13 = vmor %vm5062_vm11, %vm5063_vm12 }
 0x236   : > { %6404 = vmatprep.subr.bf16.mxu0 %v7394_v33  ;;  %6768 = vmatprep.subr.bf16.mxu1 %v7395_v10  ;;  %v3465_v18 = vshrl.u32 %v5925_v28, 16  ;;  %v3467_v11 = vshll.u32 %v5925_v28, 16  ;;  %v3595_v32 = vrot.slane %v5942_v13, 1  ;;  %v3479_v55 = vshll.u32 %v8798_v26, 16  ;;  %v3365_v59 = vld [vmem:[#allocation2 + $0x28] sm:$0xf] }
 0x237   : > { %v3592_v27 = vrot.slane %v5941_v42, 1  ;;  %v3484_v45 = vshll.u32 %v7413_v29, 16  ;;  %v3386_v53 = vld [vmem:[#allocation2 + $0x24] sm:$0xe]  ;;  %v8805_v4 = vcombine.low %v3364_v41, %v3365_v59  ;;  %v3367_v31 = vld [vmem:[#allocation2 + $0x34] sm:$0xf] }
 0x238   : > { %v3469_v3 = vrot.slane %v3467_v11, 1  ;;  %v3597_v36 = vsel %vm603_vm1, %v3595_v32, %v3596_v44  ;;  %v7416_v40 = vld [vmem:[#allocation3 + $0x88] sm:$0xff]   ;;  %v3481_v61 = vrot.slane %v3479_v55, 1  ;;  %v7418_v8 = vld [vmem:[#allocation2 + $0x2c] ss:$0 sps:$4 sm:$0x11]   ;;  %v5943_v57 = vcombine.low %v3386_v53, %v3365_v59 }
 0x239   : > { %6405 = vmatpush3.bf16.msra.mxu0 %v7396_v14  ;;  %6769 = vmatpush3.bf16.msra.mxu1 %v7395_v10  ;;  %v3594_v58 = vsel %vm603_vm1, %v3592_v27, %v3593_v15  ;;  %v3486_v60 = vrot.slane %v3484_v45, 1  ;;  %v3387_v49 = vld [vmem:[#allocation2 + $0x30] sm:$0xe]  ;;  %v3599_v50 = vrot.slane %v7418_v8, 1  ;;  %v7423_v33 = vld [vmem:[#allocation3 + $0x90] sm:$0xff]   ;;  %v3489_v14 = vshrl.u32 %v8805_v4, 16 }
 0x23a   : > { %6406 = vmatprep.subr.bf16.mxu0 %v7397_v43  ;;  %6770 = vmatprep.subr.bf16.mxu1 %v7398_v35  ;;  %v3470_v17 = vor.u32 %v3469_v3, %v3465_v18  ;;  %v3482_v54 = vor.u32 %v3481_v61, %v3477_v21  ;;  %v3598_v9 = vrot.slane %v5943_v57, 1  ;;  %v7421_v30 = vld [vmem:[#allocation2 + $0x38] ss:$0 sps:$4 sm:$0x11]   ;;  %v5944_v47 = vcombine.low %v3387_v49, %v3367_v31  ;;  %v3366_v6 = vld [vmem:[#allocation2 + $0x30] sm:$0xf] }
 0x23b   : > { %6778 = vmatprep.mubr.bf16.mxu1 %v3594_v58  ;;  %v3602_v19 = vrot.slane %v7421_v30, 1  ;;  %v3491_v43 = vshll.u32 %v8805_v4, 16  ;;  %v8814_v37 = vcombine.low %v3366_v6, %v3367_v31  ;;  %v8816_v56 = vld [vmem:[#allocation2 + $0x4c] sm:$0xf]  ;;  %v3368_v2 = vld [vmem:[#allocation2 + $0x3c] sm:$0xf] }
 0x23c   : > { %v3475_v63 = vsel %vm442_vm0, %v3470_v17, %v3474_v34  ;;  %v3487_v7 = vsel %vm442_vm0, %v3482_v54, %v3486_v60  ;;  %v3600_v16 = vsel %vm603_vm1, %v3598_v9, %v3599_v50  ;;  %v3601_v10 = vrot.slane %v5944_v47, 1  ;;  %v3390_v29 = vld [vmem:[#allocation2 + $0x54] sm:$0xe]  ;;  %v8830_v34 = vld [vmem:[#allocation2 + $0x5c] ss:$0 sps:$4 sm:$0x11]  }
 0x23d   : > { %6407 = vmatpush3.bf16.msra.mxu0 %v7399_v22  ;;  %6771 = vmatpush3.bf16.msra.mxu1 %v7398_v35  ;;  %v3496_v35 = vshll.u32 %v7418_v8, 16  ;;  %v3369_v22 = vld [vmem:[#allocation2 + $0x40] sm:$0xf]  ;;  %v3501_v46 = vshrl.u32 %v8814_v37, 16  ;;  %v3508_v27 = vshll.u32 %v7421_v30, 16  ;;  %v7444_v32 = vld [vmem:[#allocation3 + $0x40] sm:$0xff]  }
 0x23e   : > { %6408 = vmatprep.subr.bf16.mxu0 %v7400_v52  ;;  %6772 = vmatprep.subr.bf16.mxu1 %v7401_v20  ;;  %v3388_v52 = vld [vmem:[#allocation2 + $0x3c] sm:$0xe]  ;;  %v8833_v44 = vcombine.low %v3368_v2, %v3369_v22  ;;  %v8836_v17 = vld [vmem:[#allocation2 + $0x64] sm:$0xf]  ;;  %v3391_v55 = vld [vmem:[#allocation2 + $0x60] sm:$0xe] }
 0x23f   : > { %3848 = vmatprep.mubr.bf16.mxu0 %v3475_v63  ;;  %v3510_v3 = vrot.slane %v3508_v27, 1  ;;  %v7432_v45 = vld [vmem:[#allocation3 + $0xa8] sm:$0xff]   ;;  %v8839_v53 = vld [vmem:[#allocation2 + $0x68] ss:$0 sps:$4 sm:$0x11]   ;;  %v5948_v63 = vcombine.low %v3391_v55, %v8836_v17 }
 0x240   : > { %v3614_v60 = vrot.slane %v8839_v53, 1  ;;  %v7439_v8 = vld [vmem:[#allocation3 + $0xb0] sm:$0xff]   ;;  %v3513_v57 = vshrl.u32 %v8833_v44, 16  ;;  %v3515_v49 = vshll.u32 %v8833_v44, 16  ;;  %v8849_v9 = vld [vmem:[#allocation2 + $0x4] sm:$0xf] }
 0x241   : > { %6409 = vmatpush3.bf16.msra.mxu0 %v7402_v12  ;;  %6773 = vmatpush3.bf16.msra.mxu1 %v7401_v20  ;;  %v3603_v20 = vsel %vm603_vm1, %v3601_v10, %v3602_v19  ;;  %v7424_v12 = vld [vmem:[#allocation3 + $0x98] sm:$0xff]   ;;  %v3613_v31 = vrot.slane %v5948_v63, 1  ;;  %v3370_v50 = vld [vmem:[#allocation2 + $0x48] sm:$0xf]  ;;  %v3071_v30 = vld [vmem:[#allocation2] sm:$0xe] }
 0x242   : > { %6410 = vmatprep.subr.bf16.mxu0 %v7403_v48  ;;  %6774 = vmatprep.subr.bf16.mxu1 %v7404_v23  ;;  %v3493_v48 = vrot.slane %v3491_v43, 1  ;;  %v3517_v47 = vrot.slane %v3515_v49, 1  ;;  %v5917_v6 = vcombine.low %v3071_v30, %v8849_v9  ;;  %v7440_v19 = vld [vmem:[#allocation3 + $0xb8] sm:$0xff]   ;;  %v8874_v27 = vld [vmem:[#allocation2 + $0x20] ss:$0 sps:$4 sm:$0x11]  }
 0x243   : > { %v3615_v10 = vsel %vm603_vm1, %v3613_v31, %v3614_v60  ;;  %v7463_v60 = vld [vmem:[#allocation3 + $0x190] sm:$0xff]   ;;  %v7465_v49 = vld [vmem:[#allocation3 + $0x1d8] sm:$0xff]  }
 0x244   : > { %v3279_v43 = vrot.slane %v5917_v6, 1  ;;  %v7467_v30 = vld [vmem:[#allocation3 + $0x198] sm:$0xff]  }
 0x245   : > { %6411 = vmatpush3.bf16.msra.mxu0 %v7405_v24  ;;  %6775 = vmatpush3.bf16.msra.mxu1 %v7404_v23  ;;  %v3498_v23 = vrot.slane %v3496_v35, 1  ;;  %v8812_v24 = vld [vmem:[#allocation2 + $0x44] ss:$0 sps:$4 sm:$0x11]  }
 0x246   : > { %6412 = vmatprep.subr.bf16.mxu0 %v7406_v25  ;;  %6776 = vmatprep.subr.bf16.mxu1 %v7407_v38  ;;  %v5945_v25 = vcombine.low %v3388_v52, %v3369_v22  ;;  %v3605_v39 = vrot.slane %v8812_v24, 1  ;;  %v3520_v54 = vshll.u32 %v8812_v24, 16  ;;  %v3072_v22 = vld [vmem:[#allocation2 + $0xc] sm:$0xe] }
 0x247   : > { %v8858_v52 = vld [vmem:[#allocation2 + $0x14] ss:$0 sps:$4 sm:$0x11]  }
 0x248   : > { %v3604_v1 = vrot.slane %v5945_v25, 1 }
 0x249   : > { %6413 = vmatpush3.bf16.msra.mxu0 %v7408_v0  ;;  %6777 = vmatpush3.bf16.msra.mxu1 %v7407_v38  ;;  %v3389_v38 = vld [vmem:[#allocation2 + $0x48] sm:$0xe]  ;;  %v8819_v0 = vld [vmem:[#allocation2 + $0x50] ss:$0 sps:$4 sm:$0x11]  }
 0x24a   : > { %6794 = vmatprep.subr.bf16.mxu1 %v7415_v5  ;;  %v5946_v42 = vcombine.low %v3389_v38, %v8816_v56  ;;  %v3606_v18 = vsel %vm603_vm1, %v3604_v1, %v3605_v39  ;;  %v3608_v11 = vrot.slane %v8819_v0, 1  ;;  %6478 = vmatprep.subr.bf16.mxu0 %v7444_v32  ;;  %v3283_v38 = vrot.slane %v8858_v52, 1 }
 0x24b   : > { %v3532_v2 = vshll.u32 %v8819_v0, 16  ;;  %v8877_v0 = vld [vmem:[#allocation2 + $0x28] sm:$0xf]  ;;  %v3286_v32 = vrot.slane %v8874_v27, 1 }
 0x24c   : > { %3849 = vmatmul.mubr.bf16.vlgmr.msra.gmra.mrb[104].mxu0 %v5925_v28  ;;  %6779 = vmatmul.mubr.bf16.vlgmr.msra.gmra.mrb[36].mxu1 %v3597_v36  ;;  %v3494_v28 = vor.u32 %v3493_v48, %v3489_v14  ;;  %v3607_v15 = vrot.slane %v5946_v42, 1  ;;  %v3611_v36 = vrot.slane %v8830_v34, 1  ;;  %v3518_v14 = vor.u32 %v3517_v47, %v3513_v57  ;;  %v7449_v42 = vld [vmem:[#allocation3 + $0x180] sm:$0xff]   ;;  %v7464_v57 = vld [vmem:[#allocation3 + $0x58] sm:$0xff]  }
 0x24d   : > { %6795 = vmatpush3.bf16.msra.mxu1 %v7415_v5  ;;  %3856 = vmatprep.mubr.bf16.mxu0 %v3487_v7  ;;  %v3503_v5 = vshll.u32 %v8814_v37, 16  ;;  %v3522_v7 = vrot.slane %v3520_v54, 1  ;;  %v8862_v48 = vcombine.low %v3370_v50, %v8816_v56  ;;  %v7452_v56 = vld [vmem:[#allocation3 + $0x8] sm:$0xff]  }
 0x24e   : > { %6796 = vmatprep.subr.bf16.mxu1 %v7416_v40  ;;  %6782 = vmatprep.mubr.bf16.mxu1 %v3600_v16  ;;  %v3499_v62 = vsel %vm442_vm0, %v3494_v28, %v3498_v23  ;;  %v3609_v21 = vsel %vm603_vm1, %v3607_v15, %v3608_v11  ;;  %v8851_v16 = vld [vmem:[#allocation2 + $0x8] ss:$0 sps:$4 sm:$0x11]   ;;  %v7447_v28 = vld [vmem:[#allocation3 + $0x1c0] sm:$0xff]   ;;  %v3374_v50 = vld [vmem:[#allocation2 + $0x60] sm:$0xf] }
 0x24f   : > { %v3505_v13 = vrot.slane %v3503_v5, 1  ;;  %v3280_v35 = vrot.slane %v8851_v16, 1  ;;  %v3523_v23 = vsel %vm442_vm0, %v3518_v14, %v3522_v7  ;;  %v3525_v1 = vshrl.u32 %v8862_v48, 16  ;;  %v3073_v15 = vld [vmem:[#allocation2 + $0x18] sm:$0xe] }
 0x250   : > { %v3527_v39 = vshll.u32 %v8862_v48, 16  ;;  %v3534_v5 = vrot.slane %v3532_v2, 1  ;;  %v8891_v7 = vld [vmem:[#allocation2 + $0x34] sm:$0xf]  ;;  %v7478_v2 = vld [vmem:[#allocation3 + $0x68] sm:$0xff]  }
 0x251   : > { %6797 = vmatpush3.bf16.msra.mxu1 %v7416_v40  ;;  %v3506_v41 = vor.u32 %v3505_v13, %v3501_v46  ;;  %v3281_v24 = vsel %vm603_vm1, %v3279_v43, %v3280_v35  ;;  %v7457_v46 = vld [vmem:[#allocation3 + $0x50] sm:$0xff]   ;;  %v7453_v13 = vld [vmem:[#allocation3 + $0x188] sm:$0xff]   ;;  %v8893_v43 = vld [vmem:[#allocation2 + $0x38] ss:$0 sps:$4 sm:$0x11]  }
 0x252   : > { %6798 = vmatprep.subr.bf16.mxu1 %v7423_v33 }
 0x253   : > { %v3511_v40 = vsel %vm442_vm0, %v3506_v41, %v3510_v3 }
 0x254   : > { %3857 = vmatmul.mubr.bf16.gmra.mrb[108].mxu0 %v8798_v26  ;;  %6783 = vmatmul.mubr.bf16.gmra.mrb[40].mxu1 %v3603_v20  ;;  %v8828_v26 = vld [vmem:[#allocation2 + $0x58] sm:$0xf] }
 0x255   : > { %6799 = vmatpush3.bf16.msra.mxu1 %v7423_v33  ;;  %3864 = vmatprep.mubr.bf16.mxu0 %v3499_v62  ;;  %v5947_v58 = vcombine.low %v3390_v29, %v8828_v26  ;;  %v8854_v33 = vld [vmem:[#allocation2 + $0x10] sm:$0xf]  ;;  %v7451_v62 = vld [vmem:[#allocation3 + $0x1c8] sm:$0xff]  }
 0x256   : > { %6800 = vmatprep.subr.bf16.mxu1 %v7424_v12  ;;  %6786 = vmatprep.mubr.bf16.mxu1 %v3606_v18  ;;  %v5918_v20 = vcombine.low %v3072_v22, %v8854_v33  ;;  %v3372_v18 = vld [vmem:[#allocation2 + $0x54] sm:$0xf]  ;;  %v8896_v22 = vld [vmem:[#allocation2 + $0x40] sm:$0xf] }
 0x257   : > { %v3610_v59 = vrot.slane %v5947_v58, 1 }
 0x258   : > { %v3282_v25 = vrot.slane %v5918_v20, 1 }
 0x259   : > { %6801 = vmatpush3.bf16.msra.mxu1 %v7424_v12  ;;  %v3612_v61 = vsel %vm603_vm1, %v3610_v59, %v3611_v36  ;;  %v7450_v12 = vld [vmem:[#allocation3 + $0x48] sm:$0xff]   ;;  %v7461_v59 = vld [vmem:[#allocation3 + $0x1d0] sm:$0xff]   ;;  %v5931_v36 = vcombine.low %v3372_v18, %v8828_v26  ;;  %v7466_v26 = vld [vmem:[#allocation3 + $0x18] sm:$0xff]  }
 0x25a   : > { %6802 = vmatprep.subr.bf16.mxu1 %v7431_v51  ;;  %v3284_v11 = vsel %vm603_vm1, %v3282_v25, %v3283_v38  ;;  %v8901_v25 = vld [vmem:[#allocation2 + $0x44] ss:$0 sps:$4 sm:$0x11]  }
 0x25b   : > { %v3537_v31 = vshrl.u32 %v5931_v36, 16  ;;  %v3539_v54 = vshll.u32 %v5931_v36, 16 }
 0x25c   : > { %3865 = vmatmul.mubr.bf16.gmra.mrb[112].mxu0 %v8805_v4  ;;  %6787 = vmatmul.mubr.bf16.gmra.mrb[44].mxu1 %v3609_v21  ;;  %v7448_v4 = vld [vmem:[#allocation3] sm:$0xff]   ;;  %v3074_v21 = vld [vmem:[#allocation2 + $0x24] sm:$0xe] }
 0x25d   : > { %6803 = vmatpush3.bf16.msra.mxu1 %v7431_v51  ;;  %3872 = vmatprep.mubr.bf16.mxu0 %v3511_v40  ;;  %v3529_v51 = vrot.slane %v3527_v39, 1  ;;  %v5920_v41 = vcombine.low %v3074_v21, %v8877_v0  ;;  %v3541_v47 = vrot.slane %v3539_v54, 1  ;;  %v3295_v39 = vrot.slane %v8901_v25, 1  ;;  %v8910_v21 = vld [vmem:[#allocation2 + $0x50] ss:$0 sps:$4 sm:$0x11]  }
 0x25e   : > { %6804 = vmatprep.subr.bf16.mxu1 %v7432_v45  ;;  %6790 = vmatprep.mubr.bf16.mxu1 %v3612_v61  ;;  %v7462_v61 = vld [vmem:[#allocation3 + $0x10] sm:$0xff]  }
 0x25f   : > { %6479 = vmatpush3.bf16.msra.mxu0 %v7448_v4  ;;  %v3530_v3 = vor.u32 %v3529_v51, %v3525_v1  ;;  %v3544_v4 = vshll.u32 %v8830_v34, 16  ;;  %v3542_v14 = vor.u32 %v3541_v47, %v3537_v31  ;;  %v7475_v34 = vld [vmem:[#allocation3 + $0x1e0] sm:$0xff]   ;;  %v3556_v51 = vshll.u32 %v8839_v53, 16  ;;  %v7490_v31 = vld [vmem:[#allocation3 + $0x30] sm:$0xff]   ;;  %v7492_v47 = vld [vmem:[#allocation3 + $0x78] sm:$0xff]  }
 0x260   : > { %6480 = vmatprep.subr.bf16.mxu0 %v7450_v12 }
 0x261   : > { %6805 = vmatpush3.bf16.msra.mxu1 %v7432_v45  ;;  %v3535_v55 = vsel %vm442_vm0, %v3530_v3, %v3534_v5  ;;  %v8882_v45 = vld [vmem:[#allocation2 + $0x2c] ss:$0 sps:$4 sm:$0x11]   ;;  %v3546_v6 = vrot.slane %v3544_v4, 1  ;;  %v3047_v5 = vld [vmem:[#allocation2] sm:$0xf] }
 0x262   : > { %6806 = vmatprep.subr.bf16.mxu1 %v7439_v8  ;;  %v3289_v40 = vrot.slane %v8882_v45, 1  ;;  %v8908_v3 = vld [vmem:[#allocation2 + $0x4c] sm:$0xf] }
 0x263   : > { %6481 = vmatpush3.bf16.msra.mxu0 %v7452_v56  ;;  %v3547_v20 = vsel %vm442_vm0, %v3542_v14, %v3546_v6  ;;  %v3159_v6 = vshll.u32 %v8851_v16, 16  ;;  %v7494_v14 = vld [vmem:[#allocation3 + $0x38] sm:$0xff]   ;;  %v8929_v16 = vld [vmem:[#allocation2 + $0x20] ss:$0 sps:$4 sm:$0x11]  }
 0x264   : > { %3873 = vmatmul.mubr.bf16.gmra.mrb[116].mxu0 %v8814_v37  ;;  %6791 = vmatmul.mubr.bf16.gmra.mrb[48].mxu1 %v3615_v10  ;;  %v8871_v37 = vld [vmem:[#allocation2 + $0x1c] sm:$0xf] }
 0x265   : > { %6807 = vmatpush3.bf16.msra.mxu1 %v7439_v8  ;;  %3880 = vmatprep.mubr.bf16.mxu0 %v3523_v23  ;;  %v5919_v29 = vcombine.low %v3073_v15, %v8871_v37  ;;  %v7471_v10 = vld [vmem:[#allocation3 + $0x60] sm:$0xff]   ;;  %v7480_v15 = vld [vmem:[#allocation3 + $0x28] sm:$0xff]  }
 0x266   : > { %6808 = vmatprep.subr.bf16.mxu1 %v7440_v19  ;;  %6810 = vmatprep.mubr.bf16.mxu1 %v3281_v24  ;;  %v3076_v23 = vld [vmem:[#allocation2 + $0x3c] sm:$0xe]  ;;  %v5932_v24 = vcombine.low %v3374_v50, %v8836_v17  ;;  %v3051_v50 = vld [vmem:[#allocation2 + $0x18] sm:$0xf] }
 0x267   : > { %6482 = vmatprep.subr.bf16.mxu0 %v7457_v46  ;;  %v3285_v58 = vrot.slane %v5919_v29, 1  ;;  %v5922_v38 = vcombine.low %v3076_v23, %v8896_v22  ;;  %v7481_v29 = vld [vmem:[#allocation3 + $0x1a8] sm:$0xff]   ;;  %v3171_v23 = vshll.u32 %v8858_v52, 16  ;;  %v4461_v52 = vshll.u32 %v8929_v16, 16 }
 0x268   : > { %6483 = vmatpush3.bf16.msra.mxu0 %v7462_v61  ;;  %v3551_v18 = vshll.u32 %v5932_v24, 16  ;;  %v8918_v61 = vld [vmem:[#allocation2 + $0x5c] ss:$0 sps:$4 sm:$0x11]  }
 0x269   : > { %6809 = vmatpush3.bf16.msra.mxu1 %v7440_v19  ;;  %v3287_v63 = vsel %vm603_vm1, %v3285_v58, %v3286_v32  ;;  %6484 = vmatprep.subr.bf16.mxu0 %v7464_v57  ;;  %v3075_v19 = vld [vmem:[#allocation2 + $0x30] sm:$0xe]  ;;  %v3294_v56 = vrot.slane %v5922_v38, 1  ;;  %v3077_v32 = vld [vmem:[#allocation2 + $0x48] sm:$0xe] }
 0x26a   : > { %6558 = vmatprep.subr.bf16.mxu1 %v7447_v28  ;;  %v5921_v35 = vcombine.low %v3075_v19, %v8891_v7  ;;  %v7476_v28 = vld [vmem:[#allocation3 + $0x20] sm:$0xff]   ;;  %v3553_v46 = vrot.slane %v3551_v18, 1  ;;  %v7493_v19 = vld [vmem:[#allocation3 + $0x1f8] sm:$0xff]   ;;  %v4351_v18 = vld [vmem:[#allocation2 + $0x24] sm:$0xf] }
 0x26b   : > { %v3296_v17 = vsel %vm603_vm1, %v3294_v56, %v3295_v39  ;;  %v3055_v56 = vld [vmem:[#allocation2 + $0x30] sm:$0xf] }
 0x26c   : > { %3881 = vmatmul.mubr.bf16.gmra.mrb[120].mxu0 %v8833_v44  ;;  %6811 = vmatmul.mubr.bf16.vlgmr.msra.gmra.mrb[36].mxu1 %v3284_v11  ;;  %v3288_v44 = vrot.slane %v5920_v41, 1  ;;  %v3291_v12 = vrot.slane %v5921_v35, 1  ;;  %v7479_v11 = vld [vmem:[#allocation3 + $0x1e8] sm:$0xff]   ;;  %v7485_v41 = vld [vmem:[#allocation3 + $0x70] sm:$0xff]   ;;  %v3161_v35 = vrot.slane %v3159_v6, 1 }
 0x26d   : > { %6559 = vmatpush3.bf16.msra.mxu1 %v7449_v42  ;;  %3888 = vmatprep.mubr.bf16.mxu0 %v3535_v55  ;;  %v7477_v42 = vld [vmem:[#allocation3 + $0x1a0] sm:$0xff]   ;;  %v5923_v55 = vcombine.low %v3077_v32, %v8908_v3  ;;  %v8946_v32 = vld [vmem:[#allocation2 + $0x2c] ss:$0 sps:$4 sm:$0x11]  }
 0x26e   : > { %6560 = vmatprep.subr.bf16.mxu1 %v7451_v62  ;;  %6814 = vmatprep.mubr.bf16.mxu1 %v3287_v63  ;;  %v3290_v8 = vsel %vm603_vm1, %v3288_v44, %v3289_v40  ;;  %v3549_v62 = vshrl.u32 %v5932_v24, 16  ;;  %v3298_v44 = vrot.slane %v8910_v21, 1  ;;  %v3078_v40 = vld [vmem:[#allocation2 + $0x54] sm:$0xe] }
 0x26f   : > { %6485 = vmatpush3.bf16.msra.mxu0 %v7466_v26  ;;  %v3297_v63 = vrot.slane %v5923_v55, 1  ;;  %v7491_v26 = vld [vmem:[#allocation3 + $0x1b0] sm:$0xff]   ;;  %v8950_v55 = vcombine.low %v3055_v56, %v8891_v7 }
 0x270   : > { %6486 = vmatprep.subr.bf16.mxu0 %v7471_v10  ;;  %v3554_v58 = vor.u32 %v3553_v46, %v3549_v62  ;;  %v4463_v46 = vrot.slane %v4461_v52, 1 }
 0x271   : > { %6561 = vmatpush3.bf16.msra.mxu1 %v7453_v13  ;;  %v3558_v13 = vrot.slane %v3556_v51, 1  ;;  %v3299_v57 = vsel %vm603_vm1, %v3297_v63, %v3298_v44  ;;  %v8937_v51 = vld [vmem:[#allocation2 + $0x28] sm:$0xf]  ;;  %v3183_v63 = vshll.u32 %v8874_v27, 16  ;;  %v4353_v44 = vld [vmem:[#allocation2 + $0x30] sm:$0xf] }
 0x272   : > { %6562 = vmatprep.subr.bf16.mxu1 %v7461_v59  ;;  %v8914_v59 = vld [vmem:[#allocation2 + $0x58] sm:$0xf] }
 0x273   : > { %6487 = vmatpush3.bf16.msra.mxu0 %v7476_v28  ;;  %v3559_v53 = vsel %vm442_vm0, %v3554_v58, %v3558_v13  ;;  %v7498_v28 = vld [vmem:[#allocation3 + $0x200] sm:$0xff]   ;;  %v8944_v58 = vcombine.low %v4351_v18, %v8937_v51  ;;  %v3185_v7 = vrot.slane %v3183_v63, 1  ;;  %v3200_v63 = vshrl.u32 %v8950_v55, 16 }
 0x274   : > { %3889 = vmatmul.mubr.bf16.gmra.mrb[124].mxu0 %v8862_v48  ;;  %6815 = vmatmul.mubr.bf16.gmra.mrb[40].mxu1 %v3290_v8  ;;  %v3292_v48 = vrot.slane %v8893_v43, 1  ;;  %v7489_v8 = vld [vmem:[#allocation3 + $0x1f0] sm:$0xff]  }
 0x275   : > { %6563 = vmatpush3.bf16.msra.mxu1 %v7463_v60  ;;  %3896 = vmatprep.mubr.bf16.mxu0 %v3547_v20  ;;  %v5924_v60 = vcombine.low %v3078_v40, %v8914_v59  ;;  %v8953_v40 = vld [vmem:[#allocation2 + $0x34] sm:$0xf] }
 0x276   : > { %6564 = vmatprep.subr.bf16.mxu1 %v7465_v49  ;;  %v3293_v1 = vsel %vm603_vm1, %v3291_v12, %v3292_v48  ;;  %6488 = vmatprep.subr.bf16.mxu0 %v7478_v2  ;;  %v4349_v12 = vld [vmem:[#allocation2 + $0x18] sm:$0xf]  ;;  %v8925_v48 = vld [vmem:[#allocation2 + $0x1c] sm:$0xf] }
 0x277   : > { %6818 = vmatprep.mubr.bf16.mxu1 %v3293_v1  ;;  %6489 = vmatpush3.bf16.msra.mxu0 %v7480_v15  ;;  %v3300_v54 = vrot.slane %v5924_v60, 1  ;;  %v5997_v38 = vcombine.low %v4349_v12, %v8925_v48  ;;  %v8932_v1 = vcombine.low %v3051_v50, %v8871_v37  ;;  %v4468_v60 = vshll.u32 %v8944_v58, 16  ;;  %v8972_v12 = vld [vmem:[#allocation2 + $0x40] sm:$0xf] }
 0x278   : > { %6490 = vmatprep.subr.bf16.mxu0 %v7485_v41 }
 0x279   : > { %6565 = vmatpush3.bf16.msra.mxu1 %v7467_v30  ;;  %v4454_v62 = vshrl.u32 %v5997_v38, 16  ;;  %v3176_v37 = vshrl.u32 %v8932_v1, 16  ;;  %v4470_v27 = vrot.slane %v4468_v60, 1  ;;  %v8997_v60 = vld [vmem:[#allocation2 + $0x50] ss:$0 sps:$4 sm:$0x11]  }
 0x27a   : > { %6566 = vmatprep.subr.bf16.mxu1 %v7475_v34  ;;  %v7495_v34 = vld [vmem:[#allocation3 + $0x1b8] sm:$0xff]  }
 0x27b   : > { %6491 = vmatpush3.bf16.msra.mxu0 %v7490_v31 }
 0x27c   : > { %3897 = vmatmul.mubr.bf16.gmra.mrb[128].mxu0 %v5931_v36  ;;  %6819 = vmatmul.mubr.bf16.gmra.mrb[44].mxu1 %v3296_v17  ;;  %v5901_v36 = vcombine.low %v3047_v5, %v8849_v9  ;;  %v3301_v9 = vrot.slane %v8918_v61, 1  ;;  %v4456_v17 = vshll.u32 %v5997_v38, 16 }
 0x27d   : > { %6567 = vmatpush3.bf16.msra.mxu1 %v7477_v42  ;;  %3904 = vmatprep.mubr.bf16.mxu0 %v3559_v53  ;;  %v3049_v42 = vld [vmem:[#allocation2 + $0xc] sm:$0xf] }
 0x27e   : > { %6568 = vmatprep.subr.bf16.mxu1 %v7479_v11  ;;  %v3152_v49 = vshrl.u32 %v5901_v36, 16  ;;  %6822 = vmatprep.mubr.bf16.mxu1 %v3299_v57  ;;  %v3154_v4 = vshll.u32 %v5901_v36, 16  ;;  %v3302_v30 = vsel %vm603_vm1, %v3300_v54, %v3301_v9  ;;  %v5902_v2 = vcombine.low %v3049_v42, %v8854_v33  ;;  %v8962_v9 = vld [vmem:[#allocation2 + $0x38] ss:$0 sps:$4 sm:$0x11]  }
 0x27f   : > { %6492 = vmatprep.subr.bf16.mxu0 %v7492_v47  ;;  %v3173_v11 = vrot.slane %v3171_v23, 1  ;;  %v4458_v15 = vrot.slane %v4456_v17, 1  ;;  %v3178_v33 = vshll.u32 %v8932_v1, 16  ;;  %v8960_v54 = vcombine.low %v4353_v44, %v8953_v40 }
 0x280   : > { %v3156_v10 = vrot.slane %v3154_v4, 1  ;;  %6493 = vmatpush3.bf16.msra.mxu0 %v7494_v14  ;;  %v3164_v5 = vshrl.u32 %v5902_v2, 16 }
 0x281   : > { %6569 = vmatpush3.bf16.msra.mxu1 %v7481_v29  ;;  %v3166_v29 = vshll.u32 %v5902_v2, 16  ;;  %v4459_v41 = vor.u32 %v4458_v15, %v4454_v62  ;;  %v3180_v57 = vrot.slane %v3178_v33, 1  ;;  %v4478_v47 = vshrl.u32 %v8960_v54, 16  ;;  %v3057_v62 = vld [vmem:[#allocation2 + $0x3c] sm:$0xf]  ;;  %v7508_v33 = vld [vmem:[#allocation3 + $0x218] sm:$0xff]  }
 0x282   : > { %6570 = vmatprep.subr.bf16.mxu1 %v7489_v8  ;;  %v3157_v20 = vor.u32 %v3156_v10, %v3152_v49  ;;  %v4473_v8 = vshll.u32 %v8946_v32, 16  ;;  %v4480_v6 = vshll.u32 %v8960_v54, 16  ;;  %v4355_v10 = vld [vmem:[#allocation2 + $0x3c] sm:$0xf]  ;;  %v8983_v15 = vld [vmem:[#allocation2 + $0x4c] sm:$0xf] }
 0x283   : > { %v3168_v53 = vrot.slane %v3166_v29, 1  ;;  %v4464_v31 = vsel %vm442_vm0, %v4459_v41, %v4463_v46  ;;  %v3181_v4 = vor.u32 %v3180_v57, %v3176_v37  ;;  %v8975_v56 = vcombine.low %v4355_v10, %v8972_v12 }
 0x284   : > { %3905 = vmatmul.mubr.bf16.gmra.mrb[132].mxu0 %v5932_v24  ;;  %6823 = vmatmul.mubr.bf16.gmra.mrb[48].mxu1 %v3302_v30  ;;  %v3053_v24 = vld [vmem:[#allocation2 + $0x24] sm:$0xf]  ;;  %v3162_v39 = vsel %vm442_vm0, %v3157_v20, %v3161_v35  ;;  %v3195_v20 = vshll.u32 %v8882_v45, 16  ;;  %v4482_v23 = vrot.slane %v4480_v6, 1  ;;  %v3202_v37 = vshll.u32 %v8950_v55, 16 }
 0x285   : > { %6571 = vmatpush3.bf16.msra.mxu1 %v7491_v26  ;;  %4186 = vmatprep.mubr.bf16.mxu0 %v3162_v39  ;;  %v8941_v13 = vcombine.low %v3053_v24, %v8877_v0  ;;  %v4466_v0 = vshrl.u32 %v8944_v58, 16  ;;  %v3169_v49 = vor.u32 %v3168_v53, %v3164_v5  ;;  %v4475_v26 = vrot.slane %v4473_v8, 1  ;;  %v8977_v39 = vld [vmem:[#allocation2 + $0x44] ss:$0 sps:$4 sm:$0x11]   ;;  %v7511_v8 = vld [vmem:[#allocation3 + $0x220] sm:$0xff]  }
 0x286   : > { %6572 = vmatprep.subr.bf16.mxu1 %v7493_v19  ;;  %4837 = vmatprep.mubr.bf16.mxu1 %v4464_v31  ;;  %v4485_v19 = vshll.u32 %v8962_v9, 16  ;;  %v3186_v35 = vsel %vm442_vm0, %v3181_v4, %v3185_v7  ;;  %v4483_v17 = vor.u32 %v4482_v23, %v4478_v47  ;;  %v3197_v45 = vrot.slane %v3195_v20, 1  ;;  %v3059_v7 = vld [vmem:[#allocation2 + $0x48] sm:$0xf] }
 0x287   : > { %v3188_v50 = vshrl.u32 %v8941_v13, 16  ;;  %v3174_v30 = vsel %vm442_vm0, %v3169_v49, %v3173_v11  ;;  %v4471_v14 = vor.u32 %v4470_v27, %v4466_v0  ;;  %v4492_v52 = vshll.u32 %v8975_v56, 16  ;;  %v9001_v49 = vld [vmem:[#allocation2 + $0x58] sm:$0xf] }
 0x288   : > { %v4487_v24 = vrot.slane %v4485_v19, 1  ;;  %v4490_v11 = vshrl.u32 %v8975_v56, 16  ;;  %v4497_v29 = vshll.u32 %v8977_v39, 16  ;;  %v8991_v53 = vcombine.low %v3057_v62, %v8896_v22  ;;  %v9017_v20 = vld [vmem:[#allocation2 + $0x5c] ss:$0 sps:$4 sm:$0x11]  }
 0x289   : > { %6573 = vmatpush3.bf16.msra.mxu1 %v7495_v34  ;;  %v3190_v34 = vshll.u32 %v8941_v13, 16  ;;  %v4494_v5 = vrot.slane %v4492_v52, 1  ;;  %v3204_v44 = vrot.slane %v3202_v37, 1  ;;  %v3207_v0 = vshll.u32 %v8893_v43, 16  ;;  %v7520_v52 = vld [vmem:[#allocation3 + $0x238] sm:$0xff]  }
 0x28a   : > { %6826 = vmatprep.subr.bf16.mxu1 %v7498_v28  ;;  %v4488_v46 = vsel %vm442_vm0, %v4483_v17, %v4487_v24  ;;  %v4499_v31 = vrot.slane %v4497_v29, 1  ;;  %v3214_v43 = vshll.u32 %v8991_v53, 16  ;;  %v4509_v47 = vshll.u32 %v8997_v60, 16 }
 0x28b   : > { %v3192_v42 = vrot.slane %v3190_v34, 1  ;;  %v4495_v57 = vor.u32 %v4494_v5, %v4490_v11  ;;  %v3205_v27 = vor.u32 %v3204_v44, %v3200_v63  ;;  %v9011_v19 = vcombine.low %v3059_v7, %v8908_v3  ;;  %v9036_v63 = vld [vmem:[%s9398_s5] sm:$0xff]   ;;  %v9039_v44 = vld [vmem:[#allocation2 + $0x68] ss:$0 sps:$4 sm:$0x11]  }
 0x28c   : > { %4187 = vmatmul.mubr.bf16.vlgmr.msra.gmra.mrb[136].mxu0 %v5901_v36  ;;  %v7502_v36 = vld [vmem:[#allocation3 + $0x208] sm:$0xff]   ;;  %4838 = vmatmul.mubr.bf16.vlgmr.msra.gmra.mrb[52].mxu1 %v5997_v38  ;;  %v7505_v38 = vld [vmem:[#allocation3 + $0x210] sm:$0xff]   ;;  %v3219_v34 = vshll.u32 %v8901_v25, 16  ;;  %v4511_v24 = vrot.slane %v4509_v47, 1 }
 0x28d   : > { %6827 = vmatpush3.bf16.msra.mxu1 %v7498_v28  ;;  %4194 = vmatprep.mubr.bf16.mxu0 %v3174_v30  ;;  %v4476_v28 = vsel %vm442_vm0, %v4471_v14, %v4475_v26  ;;  %v3193_v18 = vor.u32 %v3192_v42, %v3188_v50  ;;  %v3209_v26 = vrot.slane %v3207_v0, 1  ;;  %v7514_v50 = vld [vmem:[#allocation3 + $0x228] sm:$0xff]   ;;  %v3212_v14 = vshrl.u32 %v8991_v53, 16  ;;  %v3061_v42 = vld [vmem:[#allocation2 + $0x54] sm:$0xf] }
 0x28e   : > { %6828 = vmatprep.subr.bf16.mxu1 %v7502_v36  ;;  %4845 = vmatprep.mubr.bf16.mxu1 %v4476_v28  ;;  %v9021_v28 = vld [vmem:[#allocation2 + $0x64] sm:$0xf]  ;;  %v3221_v17 = vrot.slane %v3219_v34, 1  ;;  %v3226_v25 = vshll.u32 %v9011_v19, 16  ;;  %v5908_v37 = vcombine.low %v3061_v42, %v8914_v59  ;;  %v3224_v5 = vshrl.u32 %v9011_v19, 16 }
 0x28f   : > { %v3210_v10 = vsel %vm442_vm0, %v3205_v27, %v3209_v26  ;;  %v4363_v0 = vld [vmem:[#allocation2 + $0x6c] sm:$0xf]  ;;  %v4533_v27 = vshll.u32 %v9039_v44, 16  ;;  %v9051_v47 = vld [vmem:[#allocation2 + $0x74] ss:$0 sps:$4 sm:$0x11]  }
 0x290   : > { %v3228_v29 = vrot.slane %v3226_v25, 1  ;;  %v4375_v25 = vld [vmem:[#allocation2 + $0x30] sm:$0xe] }
 0x291   : > { %6829 = vmatpush3.bf16.msra.mxu1 %v7502_v36  ;;  %v3198_v36 = vsel %vm442_vm0, %v3193_v18, %v3197_v45  ;;  %v4521_v45 = vshll.u32 %v9017_v20, 16 }
 0x292   : > { %6830 = vmatprep.subr.bf16.mxu1 %v7505_v38 }
 0x294   : > { %4195 = vmatmul.mubr.bf16.gmra.mrb[140].mxu0 %v5902_v2  ;;  %v4357_v2 = vld [vmem:[#allocation2 + $0x48] sm:$0xf]  ;;  %4846 = vmatmul.mubr.bf16.gmra.mrb[56].mxu1 %v8944_v58  ;;  %v4359_v58 = vld [vmem:[#allocation2 + $0x54] sm:$0xf] }
 0x295   : > { %4202 = vmatprep.mubr.bf16.mxu0 %v3186_v35  ;;  %v8988_v41 = vcombine.low %v4357_v2, %v8983_v15  ;;  %4853 = vmatprep.mubr.bf16.mxu1 %v4488_v46  ;;  %v9008_v6 = vcombine.low %v4359_v58, %v9001_v49  ;;  %v3216_v35 = vrot.slane %v3214_v43, 1  ;;  %v3236_v43 = vshrl.u32 %v5908_v37, 16 }
 0x296   : > { %6831 = vmatpush3.bf16.msra.mxu1 %v7505_v38  ;;  %v7517_v38 = vld [vmem:[#allocation3 + $0x230] sm:$0xff]  }
 0x297   : > { %6832 = vmatprep.subr.bf16.mxu1 %v7508_v33  ;;  %v4504_v22 = vshll.u32 %v8988_v41, 16  ;;  %v4502_v4 = vshrl.u32 %v8988_v41, 16  ;;  %v4516_v3 = vshll.u32 %v9008_v6, 16  ;;  %v3217_v62 = vor.u32 %v3216_v35, %v3212_v14 }
 0x298   : > { %v4514_v2 = vshrl.u32 %v9008_v6, 16 }
 0x299   : > { %v4506_v30 = vrot.slane %v4504_v22, 1  ;;  %v4518_v18 = vrot.slane %v4516_v3, 1  ;;  %v3222_v46 = vsel %vm442_vm0, %v3217_v62, %v3221_v17  ;;  %v4374_v17 = vld [vmem:[#allocation2 + $0x24] sm:$0xe] }
 0x29a   : > { %6833 = vmatpush3.bf16.msra.mxu1 %v7508_v33  ;;  %v3231_v33 = vshll.u32 %v8910_v21, 16  ;;  %v3229_v21 = vor.u32 %v3228_v29, %v3224_v5 }
 0x29b   : > { %6834 = vmatprep.subr.bf16.mxu1 %v7511_v8  ;;  %v4507_v23 = vor.u32 %v4506_v30, %v4502_v4  ;;  %v4519_v59 = vor.u32 %v4518_v18, %v4514_v2  ;;  %v4535_v30 = vrot.slane %v4533_v27, 1  ;;  %v4376_v2 = vld [vmem:[#allocation2 + $0x3c] sm:$0xe] }
 0x29c   : > { %4203 = vmatmul.mubr.bf16.gmra.mrb[144].mxu0 %v8932_v1  ;;  %v4500_v1 = vsel %vm442_vm0, %v4495_v57, %v4499_v31  ;;  %4854 = vmatmul.mubr.bf16.gmra.mrb[60].mxu1 %v8960_v54  ;;  %v4361_v54 = vld [vmem:[#allocation2 + $0x60] sm:$0xf]  ;;  %v3233_v57 = vrot.slane %v3231_v33, 1  ;;  %v3238_v31 = vshll.u32 %v5908_v37, 16 }
 0x29d   : > { %4210 = vmatprep.mubr.bf16.mxu0 %v3198_v36  ;;  %4861 = vmatprep.mubr.bf16.mxu1 %v4500_v1  ;;  %v6003_v11 = vcombine.low %v4361_v54, %v9021_v28  ;;  %v4523_v36 = vrot.slane %v4521_v45, 1 }
 0x29e   : > { %6835 = vmatpush3.bf16.msra.mxu1 %v7511_v8  ;;  %v9041_v8 = vld [vmem:[#allocation2 + $0x70] sm:$0xf]  ;;  %v3234_v26 = vsel %vm442_vm0, %v3229_v21, %v3233_v57  ;;  %v3240_v4 = vrot.slane %v3238_v31, 1  ;;  %v6050_v21 = vld [vmem:[%s7893_s20 + $0x28] sm:$0xf]  ;;  %v4591_v57 = vrot.slane %v8977_v39, 1 }
 0x29f   : > { %6836 = vmatprep.subr.bf16.mxu1 %v7514_v50  ;;  %v4526_v22 = vshrl.u32 %v6003_v11, 16  ;;  %v4524_v58 = vsel %vm442_vm0, %v4519_v59, %v4523_v36  ;;  %v4378_v59 = vld [vmem:[#allocation2 + $0x54] sm:$0xe]  ;;  %v4594_v31 = vrot.slane %v8997_v60, 1  ;;  %v5099_v39 = vshll.u32 %v6050_v21, 16 }
 0x2a0   : > { %v3241_v14 = vor.u32 %v3240_v4, %v3236_v43  ;;  %v5103_v60 = vshrl.u32 %v6050_v21, 16  ;;  %v7532_v21 = vld [vmem:[%s9398_s5 + $0x28] sm:$0xff]  }
 0x2a2   : > { %6837 = vmatpush3.bf16.msra.mxu1 %v7514_v50  ;;  %v3243_v50 = vshll.u32 %v8918_v61, 16 }
 0x2a3   : > { %6838 = vmatprep.subr.bf16.mxu1 %v7517_v38 }
 0x2a4   : > { %4211 = vmatmul.mubr.bf16.gmra.mrb[148].mxu0 %v8941_v13  ;;  %v4512_v13 = vsel %vm442_vm0, %v4507_v23, %v4511_v24  ;;  %4862 = vmatmul.mubr.bf16.gmra.mrb[64].mxu1 %v8975_v56  ;;  %v4528_v56 = vshll.u32 %v6003_v11, 16  ;;  %v3245_v35 = vrot.slane %v3243_v50, 1  ;;  %v4545_v24 = vshll.u32 %v9051_v47, 16 }
 0x2a5   : > { %4218 = vmatprep.mubr.bf16.mxu0 %v3210_v10  ;;  %4869 = vmatprep.mubr.bf16.mxu1 %v4512_v13 }
 0x2a6   : > { %6839 = vmatpush3.bf16.msra.mxu1 %v7517_v38  ;;  %v4530_v7 = vrot.slane %v4528_v56, 1  ;;  %v3246_v61 = vsel %vm442_vm0, %v3241_v14, %v3245_v35  ;;  %v4547_v3 = vrot.slane %v4545_v24, 1  ;;  %v4373_v38 = vld [vmem:[#allocation2 + $0x18] sm:$0xe] }
 0x2a7   : > { %6840 = vmatprep.subr.bf16.mxu1 %v7520_v52  ;;  %v6013_v42 = vcombine.low %v4373_v38, %v8925_v48  ;;  %v4585_v48 = vrot.slane %v8946_v32, 1  ;;  %v7524_v32 = vld [vmem:[%s9398_s5 + $0x8] sm:$0xff]   ;;  %v7528_v35 = vld [vmem:[%s9398_s5 + $0x18] sm:$0xff]  }
 0x2a8   : > { %v4531_v1 = vor.u32 %v4530_v7, %v4526_v22 }
 0x2a9   : > { %v4581_v62 = vrot.slane %v6013_v42, 1 }
 0x2aa   : > { %6841 = vmatpush3.bf16.msra.mxu1 %v7520_v52  ;;  %v4536_v34 = vsel %vm442_vm0, %v4531_v1, %v4535_v30  ;;  %v6015_v52 = vcombine.low %v4375_v25, %v8953_v40  ;;  %v4597_v1 = vrot.slane %v9017_v20, 1  ;;  %v4380_v30 = vld [vmem:[#allocation2 + $0x6c] sm:$0xe] }
 0x2ab   : > { %6858 = vmatprep.subr.bf16.mxu1 %v9036_v63  ;;  %v6020_v38 = vcombine.low %v4380_v30, %v9041_v8 }
 0x2ac   : > { %4219 = vmatmul.mubr.bf16.gmra.mrb[152].mxu0 %v8950_v55  ;;  %v6004_v55 = vcombine.low %v4363_v0, %v9041_v8  ;;  %4870 = vmatmul.mubr.bf16.gmra.mrb[68].mxu1 %v8988_v41  ;;  %v4587_v18 = vrot.slane %v6015_v52, 1  ;;  %v6049_v0 = vld [vmem:[%s7893_s20 + $0x24] sm:$0xf] }
 0x2ad   : > { %4226 = vmatprep.mubr.bf16.mxu0 %v3222_v46  ;;  %4877 = vmatprep.mubr.bf16.mxu1 %v4524_v58  ;;  %v6016_v46 = vcombine.low %v4376_v2, %v8972_v12  ;;  %v6018_v58 = vcombine.low %v4378_v59, %v9001_v49  ;;  %v5093_v43 = vshll.u32 %v6049_v0, 16  ;;  %v4600_v49 = vrot.slane %v9039_v44, 1  ;;  %v7531_v8 = vld [vmem:[%s9398_s5 + $0x20] sm:$0xff]   ;;  %v6055_v2 = vld [vmem:[%s7893_s20 + $0x3c] sm:$0xf] }
 0x2ae   : > { %v4540_v10 = vshll.u32 %v6004_v55, 16  ;;  %v4538_v41 = vshrl.u32 %v6004_v55, 16  ;;  %v5105_v44 = vrot.slane %v5103_v60, 4 }
 0x2af   : > { %v4590_v12 = vrot.slane %v6016_v46, 1  ;;  %v5095_v24 = vrot.slane %v5093_v43, 5 }
 0x2b0   : > { %v4542_v23 = vrot.slane %v4540_v10, 1  ;;  %v6048_v10 = vld [vmem:[%s7893_s20 + $0x20] sm:$0x1] }
 0x2b1   : > { %v4592_v14 = vsel %vm603_vm1, %v4590_v12, %v4591_v57  ;;  %v5085_v42 = vshll.u32 %v6048_v10, 16 }
 0x2b3   : > { %v5087_v46 = vrot.slane %v5085_v42, 5 }
 0x2b4   : > { %4227 = vmatmul.mubr.bf16.gmra.mrb[156].mxu0 %v8991_v53  ;;  %4878 = vmatmul.mubr.bf16.gmra.mrb[72].mxu1 %v9008_v6  ;;  %v4543_v53 = vor.u32 %v4542_v23, %v4538_v41  ;;  %v4582_v6 = vrot.slane %v8929_v16, 1  ;;  %v4588_v16 = vrot.slane %v8962_v9, 1  ;;  %v6052_v23 = vld [vmem:[%s7893_s20 + $0x30] sm:$0xf] }
 0x2b5   : > { %4234 = vmatprep.mubr.bf16.mxu0 %v3234_v26  ;;  %4885 = vmatprep.mubr.bf16.mxu1 %v4536_v34  ;;  %v5090_v26 = vshrl.u32 %v6049_v0, 16  ;;  %v4596_v34 = vrot.slane %v6018_v58, 1  ;;  %v6059_v0 = vld [vmem:[%s7893_s20 + $0x4c] sm:$0xf] }
 0x2b6   : > { %v4548_v54 = vsel %vm442_vm0, %v4543_v53, %v4547_v3  ;;  %v4583_v45 = vsel %vm603_vm1, %v4581_v62, %v4582_v6  ;;  %v4589_v36 = vsel %vm603_vm1, %v4587_v18, %v4588_v16  ;;  %v6053_v53 = vld [vmem:[%s7893_s20 + $0x34] sm:$0xf]  ;;  %v6051_v62 = vld [vmem:[%s7893_s20 + $0x2c] sm:$0x1]  ;;  %v5114_v6 = vshrl.u32 %v6052_v23, 16 }
 0x2b7   : > { %v5092_v20 = vrot.slane %v5090_v26, 4  ;;  %v5123_v25 = vshll.u32 %v6053_v53, 16  ;;  %v4602_v18 = vrot.slane %v6020_v38, 1  ;;  %v4603_v16 = vrot.slane %v9051_v47, 1 }
 0x2b8   : > { %v5171_v43 = vshll.u32 %v6059_v0, 16 }
 0x2b9   : > { %v5096_v52 = vor.u32 %v5095_v24, %v5092_v20  ;;  %v9119_v47 = vrot.slane %v5123_v25, 5 }
 0x2bb   : > { %v5097_v57 = vrot.slane %v5096_v52, 4  ;;  %v6064_v52 = vld [vmem:[%s7893_s20 + $0x60] sm:$0xf] }
 0x2bc   : > { %4235 = vmatmul.mubr.bf16.gmra.mrb[160].mxu0 %v9011_v19  ;;  %4886 = vmatmul.mubr.bf16.gmra.mrb[76].mxu1 %v6003_v11  ;;  %v6014_v19 = vcombine.low %v4374_v17, %v8937_v51  ;;  %v4377_v11 = vld [vmem:[#allocation2 + $0x48] sm:$0xe]  ;;  %v6047_v51 = vld [vmem:[%s7893_s20 + $0x1c] sm:$0xf]  ;;  %v5117_v17 = vshll.u32 %v6052_v23, 16 }
 0x2bd   : > { %4242 = vmatprep.mubr.bf16.mxu0 %v3246_v61  ;;  %4893 = vmatprep.mubr.bf16.mxu1 %v4548_v54  ;;  %v6017_v40 = vcombine.low %v4377_v11, %v8983_v15  ;;  %v5075_v56 = vshll.u32 %v6047_v51, 16  ;;  %v5079_v9 = vshrl.u32 %v6047_v51, 16  ;;  %v4379_v15 = vld [vmem:[#allocation2 + $0x60] sm:$0xe]  ;;  %v9096_v61 = vrot.slane %v5099_v39, 5 }
 0x2be   : > { %v4584_v13 = vrot.slane %v6014_v19, 1  ;;  %v6019_v4 = vcombine.low %v4379_v15, %v9021_v28  ;;  %v5127_v19 = vshrl.u32 %v6053_v53, 16  ;;  %v6054_v51 = vld [vmem:[%s7893_s20 + $0x38] sm:$0x1]  ;;  %v5175_v39 = vshrl.u32 %v6059_v0, 16 }
 0x2bf   : > { %v4593_v22 = vrot.slane %v6017_v40, 1  ;;  %v5081_v50 = vrot.slane %v5079_v9, 4  ;;  %v5141_v9 = vshll.u32 %v6055_v2, 16  ;;  %v5133_v26 = vshll.u32 %v6054_v51, 16 }
 0x2c0   : > { %v4586_v5 = vsel %vm603_vm1, %v4584_v13, %v4585_v48  ;;  %v4599_v3 = vrot.slane %v6019_v4, 1  ;;  %v5106_v13 = vor.u32 %v5105_v44, %v9096_v61  ;;  %v5109_v48 = vshll.u32 %v6051_v62, 16  ;;  %v6062_v62 = vld [vmem:[%s7893_s20 + $0x58] sm:$0xf] }
 0x2c1   : > { %v4595_v28 = vsel %vm603_vm1, %v4593_v22, %v4594_v31  ;;  %v5129_v59 = vrot.slane %v5127_v19, 4  ;;  %v5102_v30 = vsel %vm9110_vm13, %v5097_v57, %v9096_v61  ;;  %v5135_v24 = vrot.slane %v5133_v26, 5 }
 0x2c2   : > { %v4601_v40 = vsel %vm603_vm1, %v4599_v3, %v4600_v49  ;;  %v5107_v31 = vrot.slane %v5106_v13, 4  ;;  %v5111_v15 = vrot.slane %v5109_v48, 5  ;;  %v7535_v49 = vld [vmem:[%s9398_s5 + $0x30] sm:$0xff]   ;;  %v9144_v44 = vrot.slane %v5171_v43, 5  ;;  %v6065_v13 = vld [vmem:[%s7893_s20 + $0x64] sm:$0xf] }
 0x2c3   : > { %v5130_v4 = vor.u32 %v5129_v59, %v9119_v47  ;;  %v5177_v53 = vrot.slane %v5175_v39, 4  ;;  %v6061_v3 = vld [vmem:[%s7893_s20 + $0x54] sm:$0xf] }
 0x2c4   : > { %4243 = vmatmul.mubr.bf16.gmra.mrb[164].mxu0 %v5908_v37  ;;  %4894 = vmatmul.mubr.bf16.gmra.mrb[80].mxu1 %v6004_v55  ;;  %v6046_v37 = vld [vmem:[%s7893_s20 + $0x18] sm:$0xf]  ;;  %v7527_v55 = vld [vmem:[%s9398_s5 + $0x10] sm:$0xff]   ;;  %v5112_v10 = vsel %vm9110_vm13, %v5107_v31, %v5111_v15  ;;  %v6063_v31 = vld [vmem:[%s7893_s20 + $0x5c] sm:$0x1] }
 0x2c5   : > { %6842 = vmatprep.mubr.bf16.mxu1 %v4583_v45  ;;  %v5066_v29 = vshrl.u32 %v6046_v37, 16  ;;  %v5069_v33 = vshll.u32 %v6046_v37, 16  ;;  %v5131_v38 = vrot.slane %v5130_v4, 4  ;;  %v5178_v48 = vor.u32 %v5177_v53, %v9144_v44  ;;  %v6067_v15 = vld [vmem:[%s7893_s20 + $0x6c] sm:$0xf] }
 0x2c7   : > { %v5068_v7 = vrot.slane %v5066_v29, 4  ;;  %v5071_v27 = vrot.slane %v5069_v33, 5  ;;  %v5116_v29 = vrot.slane %v5114_v6, 4  ;;  %v5119_v33 = vrot.slane %v5117_v17, 5  ;;  %v7536_v6 = vld [vmem:[%s9398_s5 + $0x38] sm:$0xff]  }
 0x2c8   : > { %v6072_v17 = vcombine.low %v5102_v30, %v5112_v10  ;;  %v5179_v0 = vrot.slane %v5178_v48, 4  ;;  %v5237_v30 = vshll.u32 %v6067_v15, 16 }
 0x2c9   : > { %v5072_v41 = vor.u32 %v5071_v27, %v5068_v7  ;;  %v5120_v60 = vor.u32 %v5119_v33, %v5116_v29  ;;  %v5213_v29 = vshll.u32 %v6064_v52, 16  ;;  %v5219_v33 = vshll.u32 %v6065_v13, 16 }
 0x2cb   : > { %v5073_v45 = vrot.slane %v5072_v41, 4  ;;  %v5121_v61 = vrot.slane %v5120_v60, 4  ;;  %v6066_v60 = vld [vmem:[%s7893_s20 + $0x68] sm:$0x1] }
 0x2cc   : > { %6843 = vmatmul.mubr.bf16.vlgmr.msra.gmra.mrb[36].mxu1 %v4586_v5  ;;  %v4598_v5 = vsel %vm603_vm1, %v4596_v34, %v4597_v1  ;;  %v4604_v1 = vsel %vm603_vm1, %v4602_v18, %v4603_v16  ;;  %v6060_v34 = vld [vmem:[%s7893_s20 + $0x50] sm:$0x1]  ;;  %v5195_v18 = vshll.u32 %v6062_v62, 16  ;;  %v5199_v16 = vshrl.u32 %v6062_v62, 16 }
 0x2cd   : > { %6859 = vmatpush3.bf16.msra.mxu1 %v9036_v63  ;;  %6846 = vmatprep.mubr.bf16.mxu1 %v4589_v36  ;;  %v9085_v63 = vrot.slane %v5075_v56, 5  ;;  %v6058_v36 = vld [vmem:[%s7893_s20 + $0x48] sm:$0xf]  ;;  %v5138_v56 = vshrl.u32 %v6055_v2, 16  ;;  %v5189_v2 = vshll.u32 %v6061_v3, 16 }
 0x2ce   : > { %6860 = vmatprep.subr.bf16.mxu1 %v7524_v32  ;;  %v5162_v7 = vshrl.u32 %v6058_v36, 16  ;;  %v5165_v27 = vshll.u32 %v6058_v36, 16 }
 0x2cf   : > { %v5082_v54 = vor.u32 %v5081_v50, %v9085_v63  ;;  %v5078_v12 = vsel %vm9110_vm13, %v5073_v45, %v9085_v63  ;;  %v5140_v63 = vrot.slane %v5138_v56, 4  ;;  %v5143_v50 = vrot.slane %v5141_v9, 5 }
 0x2d0   : > { %v5164_v41 = vrot.slane %v5162_v7, 4  ;;  %v5167_v23 = vrot.slane %v5165_v27, 5  ;;  %v5186_v45 = vshrl.u32 %v6061_v3, 16  ;;  %v5221_v7 = vrot.slane %v5219_v33, 5 }
 0x2d1   : > { %6861 = vmatpush3.bf16.msra.mxu1 %v7524_v32  ;;  %v5083_v37 = vrot.slane %v5082_v54, 4  ;;  %v6056_v32 = vld [vmem:[%s7893_s20 + $0x40] sm:$0xf]  ;;  %v5144_v54 = vor.u32 %v5143_v50, %v5140_v63  ;;  %v5239_v3 = vrot.slane %v5237_v30, 5 }
 0x2d2   : > { %6862 = vmatprep.subr.bf16.mxu1 %v7527_v55  ;;  %v5147_v22 = vshll.u32 %v6056_v32, 16  ;;  %v5151_v58 = vshrl.u32 %v6056_v32, 16  ;;  %v5168_v19 = vor.u32 %v5167_v23, %v5164_v41  ;;  %v5223_v32 = vshrl.u32 %v6065_v13, 16 }
 0x2d3   : > { %v5145_v51 = vrot.slane %v5144_v54, 4  ;;  %v5188_v9 = vrot.slane %v5186_v45, 4 }
 0x2d4   : > { %6847 = vmatmul.mubr.bf16.gmra.mrb[40].mxu1 %v4592_v14  ;;  %v6057_v14 = vld [vmem:[%s7893_s20 + $0x44] sm:$0x1]  ;;  %v5169_v59 = vrot.slane %v5168_v19, 4  ;;  %v5225_v27 = vrot.slane %v5223_v32, 4 }
 0x2d5   : > { %6863 = vmatpush3.bf16.msra.mxu1 %v7527_v55  ;;  %6850 = vmatprep.mubr.bf16.mxu1 %v4595_v28  ;;  %v5088_v55 = vsel %vm9110_vm13, %v5083_v37, %v5087_v46  ;;  %v5153_v28 = vrot.slane %v5151_v58, 4  ;;  %v5157_v42 = vshll.u32 %v6057_v14, 16  ;;  %v5126_v37 = vsel %vm9110_vm13, %v5121_v61, %v9119_v47 }
 0x2d6   : > { %6864 = vmatprep.subr.bf16.mxu1 %v7528_v35  ;;  %v6071_v20 = vcombine.low %v5078_v12, %v5088_v55  ;;  %v5136_v46 = vsel %vm9110_vm13, %v5131_v38, %v5135_v24  ;;  %v5191_v47 = vrot.slane %v5189_v2, 5  ;;  %v5201_v12 = vrot.slane %v5199_v16, 4  ;;  %v6068_v55 = vld [vmem:[%s7893_s20 + $0x70] sm:$0xf] }
 0x2d7   : > { %v6073_v57 = vcombine.low %v5126_v37, %v5136_v46  ;;  %v5215_v58 = vrot.slane %v5213_v29, 5  ;;  %v5174_v39 = vsel %vm9110_vm13, %v5169_v59, %v9144_v44  ;;  %v5243_v10 = vshll.u32 %v6068_v55, 16 }
 0x2d8   : > { %v5192_v63 = vor.u32 %v5191_v47, %v5188_v9  ;;  %v5247_v14 = vshrl.u32 %v6068_v55, 16 }
 0x2d9   : > { %6865 = vmatpush3.bf16.msra.mxu1 %v7528_v35  ;;  %v9141_v35 = vrot.slane %v5147_v22, 5  ;;  %v5245_v61 = vrot.slane %v5243_v10, 5 }
 0x2da   : > { %6866 = vmatprep.subr.bf16.mxu1 %v7531_v8  ;;  %v5249_v38 = vrot.slane %v5247_v14, 4 }
 0x2db   : > { %v5154_v25 = vor.u32 %v5153_v28, %v9141_v35  ;;  %v5150_v26 = vsel %vm9110_vm13, %v5145_v51, %v9141_v35  ;;  %v5226_v28 = vor.u32 %v5225_v27, %v5221_v7 }
 0x2dc   : > { %6851 = vmatmul.mubr.bf16.gmra.mrb[44].mxu1 %v4598_v5  ;;  %v5159_v5 = vrot.slane %v5157_v42, 5 }
 0x2dd   : > { %6867 = vmatpush3.bf16.msra.mxu1 %v7531_v8  ;;  %6854 = vmatprep.mubr.bf16.mxu1 %v4601_v40  ;;  %v5181_v8 = vshll.u32 %v6060_v34, 16  ;;  %v5210_v40 = vshrl.u32 %v6064_v52, 16  ;;  %v5155_v36 = vrot.slane %v5154_v25, 4  ;;  %v5229_v34 = vshll.u32 %v6066_v60, 16 }
 0x2de   : > { %6868 = vmatprep.subr.bf16.mxu1 %v7532_v21  ;;  %v5227_v42 = vrot.slane %v5226_v28, 4 }
 0x2df   : > { %v5183_v56 = vrot.slane %v5181_v8, 5  ;;  %v5212_v22 = vrot.slane %v5210_v40, 4  ;;  %v5160_v43 = vsel %vm9110_vm13, %v5155_v36, %v5159_v5  ;;  %v5231_v62 = vrot.slane %v5229_v34, 5 }
 0x2e0   : > { %v6074_v41 = vcombine.low %v5150_v26, %v5160_v43  ;;  %v5250_v8 = vor.u32 %v5249_v38, %v5245_v61 }
 0x2e1   : > { %6869 = vmatpush3.bf16.msra.mxu1 %v7532_v21  ;;  %v5197_v21 = vrot.slane %v5195_v18, 5  ;;  %v5184_v4 = vsel %vm9110_vm13, %v5179_v0, %v5183_v56  ;;  %v5216_v35 = vor.u32 %v5215_v58, %v5212_v22  ;;  %v5232_v13 = vsel %vm9110_vm13, %v5227_v42, %v5231_v62 }
 0x2e2   : > { %6870 = vmatprep.subr.bf16.mxu1 %v7535_v49  ;;  %v6075_v23 = vcombine.low %v5174_v39, %v5184_v4  ;;  %v5251_v16 = vrot.slane %v5250_v8, 4 }
 0x2e3   : > { %v5202_v50 = vor.u32 %v5201_v12, %v5197_v21  ;;  %v5217_v54 = vrot.slane %v5216_v35, 4 }
 0x2e4   : > { %6855 = vmatmul.mubr.bf16.gmra.mrb[48].mxu1 %v4604_v1  ;;  %v5205_v1 = vshll.u32 %v6063_v31, 16 }
 0x2e5   : > { %6871 = vmatpush3.bf16.msra.mxu1 %v7535_v49  ;;  %6874 = vmatprep.mubr.bf16.mxu1 %v6071_v20  ;;  %v5234_v49 = vshrl.u32 %v6067_v15, 16  ;;  %v5193_v20 = vrot.slane %v5192_v63, 4  ;;  %v5203_v24 = vrot.slane %v5202_v50, 4  ;;  %v5222_v52 = vsel %vm9110_vm13, %v5217_v54, %v5221_v7 }
 0x2e6   : > { %6872 = vmatprep.subr.bf16.mxu1 %v7536_v6  ;;  %v5207_v44 = vrot.slane %v5205_v1, 5  ;;  %v6077_v2 = vcombine.low %v5222_v52, %v5232_v13 }
 0x2e7   : > { %v5236_v53 = vrot.slane %v5234_v49, 4 }
 0x2e8   : > { %v5208_v25 = vsel %vm9110_vm13, %v5203_v24, %v5207_v44 }
 0x2e9   : > { %6873 = vmatpush3.bf16.msra.mxu1 %v7536_v6  ;;  %v6069_v6 = vld [vmem:[%s7893_s20 + $0x74] sm:$0x1]  ;;  %v5240_v19 = vor.u32 %v5239_v3, %v5236_v53  ;;  %s7565_s20 = scalar_lea.vmem %s9334_s28, 2048 }
 0x2ea   : > { %v5253_v45 = vshll.u32 %v6069_v6, 16  ;;  %p7566_p12 = scmp.ne.s32.totalorder %s9334_s28, %s7565_s20  ;;  %p7573_p7 = scmp.lt.s32.totalorder %s7571_s17, %s7565_s20 }
 0x2eb   : > { %v5241_v18 = vrot.slane %v5240_v19, 4 }
 0x2ec   : > { %6875 = vmatmul.mubr.bf16.vlgmr.msra.gmra.mrb[36].mxu1 %v6072_v17  ;;  %v5198_v17 = vsel %vm9110_vm13, %v5193_v20, %v5197_v21  ;;  %v5255_v37 = vrot.slane %v5253_v45, 5  ;;  %p7567_p2 = pnand %p7566_p12, %p9430_p0  ;;  %p7574_p9 = por %p7573_p7, %p7572_p6 }
 0x2ed   : > { %6878 = vmatprep.mubr.bf16.mxu1 %v6073_v57  ;;  %v6076_v48 = vcombine.low %v5198_v17, %v5208_v25  ;;  %v5246_v46 = vsel %vm9110_vm13, %v5241_v18, %v5245_v61 }
 0x2ee   : > { %v5256_v51 = vsel %vm9110_vm13, %v5251_v16, %v5255_v37  ;;  %p7568_p5 = pneg %p7567_p2 }
 0x2ef   : > { %v6078_v5 = vcombine.low %v5246_v46, %v5256_v51 }
 0x2f0   : > { %p7575_p11 = pnand %p7574_p9, %p7568_p5 }
 0x2f4   : > { %6879 = vmatmul.mubr.bf16.gmra.mrb[40].mxu1 %v6074_v41 }
 0x2f5   : > { %6882 = vmatprep.mubr.bf16.mxu1 %v6075_v23 }
 0x2fc   : > { %6883 = vmatmul.mubr.bf16.gmra.mrb[44].mxu1 %v6076_v48 }
 0x2fd   : > { %6886 = vmatprep.mubr.bf16.mxu1 %v6077_v2 }
 0x304   : > { %6887 = vmatmul.mubr.bf16.gmra.mrb[48].mxu1 %v6078_v5 }
 0x31f   : > { %v6414_v40 = vpop.f32.mrb[104].mxu0 }
 0x320   : > { %v6415_v29 = vpop.f32.mrb[105].mxu0 }
 0x321   : > { %v6416_v33 = vadd.f32 %v6415_v29, %v6414_v40  ;;  %v6417_v32 = vpop.f32.mrb[106].mxu0 }
 0x322   : > { %v6418_v36 = vpop.f32.mrb[107].mxu0 }
 0x323   : > { %v6419_v59 = vadd.f32 %v6418_v36, %v6417_v32 }
 0x327   : > { %v6420_v56 = vpop.f32.mrb[108].mxu0 }
 0x328   : > { %v6421_v9 = vpop.f32.mrb[109].mxu0 }
 0x329   : > { %v6422_v0 = vadd.f32 %v6421_v9, %v6420_v56  ;;  %v6423_v47 = vpop.f32.mrb[110].mxu0 }
 0x32a   : > { %v6424_v21 = vpop.f32.mrb[111].mxu0 }
 0x32b   : > { %v6425_v12 = vadd.f32 %v6424_v21, %v6423_v47 }
 0x32f   : > { %v6426_v57 = vpop.f32.mrb[112].mxu0 }
 0x330   : > { %v6427_v31 = vpop.f32.mrb[113].mxu0 }
 0x331   : > { %v9187_v15 = vadd.f32 %v6427_v31, %v6426_v57  ;;  %v6429_v11 = vpop.f32.mrb[114].mxu0 }
 0x332   : > { %v6430_v22 = vpop.f32.mrb[115].mxu0 }
 0x333   : > { %v9189_v58 = vadd.f32 %v6430_v22, %v6429_v11 }
 0x337   : > { %v6432_v7 = vpop.f32.mrb[116].mxu0 }
 0x338   : > { %v6433_v27 = vpop.f32.mrb[117].mxu0 }
 0x339   : > { %v9191_v55 = vadd.f32 %v6433_v27, %v6432_v7  ;;  %v6435_v26 = vpop.f32.mrb[118].mxu0 }
 0x33a   : > { %v6436_v43 = vpop.f32.mrb[119].mxu0 }
 0x33b   : > { %v9193_v39 = vadd.f32 %v6436_v43, %v6435_v26 }
 0x33f   : > { %v6438_v60 = vpop.f32.mrb[120].mxu0 }
 0x340   : > { %v6439_v4 = vpop.f32.mrb[121].mxu0 }
 0x341   : > { %v9195_v63 = vadd.f32 %v6439_v4, %v6438_v60  ;;  %v6441_v50 = vpop.f32.mrb[122].mxu0 }
 0x342   : > { %v6442_v1 = vpop.f32.mrb[123].mxu0 }
 0x343   : > { %v9197_v49 = vadd.f32 %v6442_v1, %v6441_v50 }
 0x347   : > { %v6444_v30 = vpop.f32.mrb[124].mxu0 }
 0x348   : > { %v6445_v10 = vpop.f32.mrb[125].mxu0 }
 0x349   : > { %v9199_v14 = vadd.f32 %v6445_v10, %v6444_v30  ;;  %v6447_v35 = vpop.f32.mrb[126].mxu0 }
 0x34a   : > { %v6448_v28 = vpop.f32.mrb[127].mxu0 }
 0x34b   : > { %v9201_v34 = vadd.f32 %v6448_v28, %v6447_v35 }
 0x34f   : > { %v6450_v41 = vpop.f32.mrb[128].mxu0 }
 0x350   : > { %v6451_v23 = vpop.f32.mrb[129].mxu0 }
 0x351   : > { %v9203_v20 = vadd.f32 %v6451_v23, %v6450_v41  ;;  %v6453_v24 = vpop.f32.mrb[130].mxu0 }
 0x352   : > { %v6454_v44 = vpop.f32.mrb[131].mxu0 }
 0x353   : > { %v9205_v53 = vadd.f32 %v6454_v44, %v6453_v24 }
 0x357   : > { %v6456_v3 = vpop.f32.mrb[132].mxu0 }
 0x358   : > { %v6457_v61 = vpop.f32.mrb[133].mxu0 }
 0x359   : > { %v9207_v38 = vadd.f32 %v6457_v61, %v6456_v3  ;;  %v6459_v54 = vpop.f32.mrb[134].mxu0 }
 0x35a   : > { %v6460_v42 = vpop.f32.mrb[135].mxu0 }
 0x35b   : > { %v9209_v62 = vadd.f32 %v6460_v42, %v6459_v54 }
 0x35f   : > { %v6494_v6 = vpop.f32.mrb[136].mxu0  ;;  %v6574_v48 = vpop.f32.mrb[52].mxu1 }
 0x360   : > { %v6495_v17 = vpop.f32.mrb[137].mxu0  ;;  %v6575_v2 = vpop.f32.mrb[53].mxu1 }
 0x361   : > { %v6496_v25 = vadd.f32 %v6495_v17, %v6494_v6  ;;  %v6497_v19 = vpop.f32.mrb[138].mxu0  ;;  %v6576_v18 = vadd.f32 %v6575_v2, %v6574_v48  ;;  %v6577_v16 = vpop.f32.mrb[54].mxu1 }
 0x362   : > { %v6498_v8 = vpop.f32.mrb[139].mxu0  ;;  %v6578_v46 = vpop.f32.mrb[55].mxu1 }
 0x363   : > { %v6971_v45 = vadd.f32 %v6496_v25, %v6416_v33  ;;  %v6499_v52 = vadd.f32 %v6498_v8, %v6497_v19  ;;  %v6579_v40 = vadd.f32 %v6578_v46, %v6577_v16 }
 0x365   : > { %v6981_v13 = vadd.f32 %v6499_v52, %v6419_v59  ;;  %v9211_v5 = vadd.f32 %v6971_v45, %v6576_v18 }
 0x367   : > { %v6500_v37 = vpop.f32.mrb[140].mxu0  ;;  %v9213_v56 = vadd.f32 %v6981_v13, %v6579_v40  ;;  %v6580_v33 = vpop.f32.mrb[56].mxu1 }
 0x368   : > { %v6501_v51 = vpop.f32.mrb[141].mxu0  ;;  %v6581_v59 = vpop.f32.mrb[57].mxu1 }
 0x369   : > { %v6502_v29 = vadd.f32 %v6501_v51, %v6500_v37  ;;  %v6503_v32 = vpop.f32.mrb[142].mxu0  ;;  %v6582_v57 = vadd.f32 %v6581_v59, %v6580_v33  ;;  %v6583_v31 = vpop.f32.mrb[58].mxu1 }
 0x36a   : > { %v6504_v36 = vpop.f32.mrb[143].mxu0  ;;  %v6584_v22 = vpop.f32.mrb[59].mxu1 }
 0x36b   : > { %v6966_v9 = vadd.f32 %v6502_v29, %v6422_v0  ;;  %v6505_v47 = vadd.f32 %v6504_v36, %v6503_v32  ;;  %v6585_v26 = vadd.f32 %v6584_v22, %v6583_v31 }
 0x36d   : > { %v6976_v21 = vadd.f32 %v6505_v47, %v6425_v12  ;;  %v9215_v27 = vadd.f32 %v6966_v9, %v6582_v57 }
 0x36f   : > { %v6506_v11 = vpop.f32.mrb[144].mxu0  ;;  %v9217_v50 = vadd.f32 %v6976_v21, %v6585_v26  ;;  %v6586_v30 = vpop.f32.mrb[60].mxu1 }
 0x370   : > { %v6507_v7 = vpop.f32.mrb[145].mxu0  ;;  %v6587_v10 = vpop.f32.mrb[61].mxu1 }
 0x371   : > { %v6508_v43 = vadd.f32 %v6507_v7, %v6506_v11  ;;  %v6509_v60 = vpop.f32.mrb[146].mxu0  ;;  %v6588_v35 = vadd.f32 %v6587_v10, %v6586_v30  ;;  %v6589_v28 = vpop.f32.mrb[62].mxu1 }
 0x372   : > { %v6510_v4 = vpop.f32.mrb[147].mxu0  ;;  %v6590_v23 = vpop.f32.mrb[63].mxu1 }
 0x373   : > { %v6991_v1 = vadd.f32 %v6508_v43, %v9187_v15  ;;  %v6511_v0 = vadd.f32 %v6510_v4, %v6509_v60  ;;  %v6591_v3 = vadd.f32 %v6590_v23, %v6589_v28 }
 0x375   : > { %v7001_v12 = vadd.f32 %v6511_v0, %v9189_v58  ;;  %v9221_v44 = vadd.f32 %v6991_v1, %v6588_v35 }
 0x377   : > { %v6512_v41 = vpop.f32.mrb[148].mxu0  ;;  %v9223_v6 = vadd.f32 %v7001_v12, %v6591_v3  ;;  %v6592_v25 = vpop.f32.mrb[64].mxu1 }
 0x378   : > { %v6513_v24 = vpop.f32.mrb[149].mxu0  ;;  %v6593_v19 = vpop.f32.mrb[65].mxu1 }
 0x379   : > { %v6514_v61 = vadd.f32 %v6513_v24, %v6512_v41  ;;  %v6515_v54 = vpop.f32.mrb[150].mxu0  ;;  %v6594_v8 = vadd.f32 %v6593_v19, %v6592_v25  ;;  %v6595_v45 = vpop.f32.mrb[66].mxu1 }
 0x37a   : > { %v6516_v42 = vpop.f32.mrb[151].mxu0  ;;  %v6596_v13 = vpop.f32.mrb[67].mxu1 }
 0x37b   : > { %v6986_v15 = vadd.f32 %v6514_v61, %v9191_v55  ;;  %v6517_v17 = vadd.f32 %v6516_v42, %v6515_v54  ;;  %v6597_v18 = vadd.f32 %v6596_v13, %v6595_v45 }
 0x37d   : > { %v6996_v58 = vadd.f32 %v6517_v17, %v9193_v39  ;;  %v9227_v2 = vadd.f32 %v6986_v15, %v6594_v8 }
 0x37f   : > { %v6518_v52 = vpop.f32.mrb[152].mxu0  ;;  %v9229_v51 = vadd.f32 %v6996_v58, %v6597_v18  ;;  %v6598_v29 = vpop.f32.mrb[68].mxu1 }
 0x380   : > { %v6519_v48 = vpop.f32.mrb[153].mxu0  ;;  %v6599_v32 = vpop.f32.mrb[69].mxu1 }
 0x381   : > { %v6520_v16 = vadd.f32 %v6519_v48, %v6518_v52  ;;  %v6521_v37 = vpop.f32.mrb[154].mxu0  ;;  %v6600_v36 = vadd.f32 %v6599_v32, %v6598_v29  ;;  %v6601_v9 = vpop.f32.mrb[70].mxu1 }
 0x382   : > { %v6522_v46 = vpop.f32.mrb[155].mxu0  ;;  %v6602_v33 = vpop.f32.mrb[71].mxu1 }
 0x383   : > { %v7011_v55 = vadd.f32 %v6520_v16, %v9195_v63  ;;  %v6523_v40 = vadd.f32 %v6522_v46, %v6521_v37  ;;  %v6603_v57 = vadd.f32 %v6602_v33, %v6601_v9  ;;  %v9267_v9 = vld [vmem:[%s9399_s6] ss:$0 sm:$0xff] }
 0x385   : > { %v7021_v39 = vadd.f32 %v6523_v40, %v9197_v49  ;;  %v9233_v59 = vadd.f32 %v7011_v55, %v6600_v36  ;;  %v9258_v36 = vld [vmem:[%s9397_s4] ss:$0 sm:$0xff] }
 0x387   : > { %v6524_v47 = vpop.f32.mrb[156].mxu0  ;;  %v9235_v7 = vadd.f32 %v7021_v39, %v6603_v57  ;;  %v6604_v43 = vpop.f32.mrb[72].mxu1 }
 0x388   : > { %v6525_v21 = vpop.f32.mrb[157].mxu0  ;;  %v6605_v60 = vpop.f32.mrb[73].mxu1 }
 0x389   : > { %v6526_v31 = vadd.f32 %v6525_v21, %v6524_v47  ;;  %v6527_v11 = vpop.f32.mrb[158].mxu0  ;;  %v6606_v4 = vadd.f32 %v6605_v60, %v6604_v43  ;;  %v6607_v1 = vpop.f32.mrb[74].mxu1  ;;  %v6968_v47 = vadd.f32 %v9215_v27, %v9258_v36  ;;  %v6973_v21 = vadd.f32 %v9211_v5, %v9258_v36 }
 0x38a   : > { %v6528_v22 = vpop.f32.mrb[159].mxu0  ;;  %v6608_v30 = vpop.f32.mrb[75].mxu1  ;;  %v6988_v43 = vadd.f32 %v9227_v2, %v9258_v36  ;;  %v6993_v60 = vadd.f32 %v9221_v44, %v9258_v36 }
 0x38b   : > { %v7006_v63 = vadd.f32 %v6526_v31, %v9199_v14  ;;  %v6529_v26 = vadd.f32 %v6528_v22, %v6527_v11  ;;  %v6609_v35 = vadd.f32 %v6608_v30, %v6607_v1 }
 0x38c   : > { %v6989_v2 = vadd.f32 %v6988_v43, %v9267_v9  ;;  %v6994_v44 = vadd.f32 %v6993_v60, %v9267_v9 }
 0x38d   : > { %v7016_v49 = vadd.f32 %v6529_v26, %v9201_v34  ;;  %v9239_v10 = vadd.f32 %v7006_v63, %v6606_v4 }
 0x38f   : > { %v6530_v0 = vpop.f32.mrb[160].mxu0  ;;  %v9241_v24 = vadd.f32 %v7016_v49, %v6609_v35  ;;  %v6610_v61 = vpop.f32.mrb[76].mxu1  ;;  %v7003_v35 = vadd.f32 %v9223_v6, %v9258_v36 }
 0x390   : > { %v6531_v12 = vpop.f32.mrb[161].mxu0  ;;  %v6611_v54 = vpop.f32.mrb[77].mxu1 }
 0x391   : > { %v6532_v28 = vadd.f32 %v6531_v12, %v6530_v0  ;;  %v6533_v41 = vpop.f32.mrb[162].mxu0  ;;  %v6612_v42 = vadd.f32 %v6611_v54, %v6610_v61  ;;  %v6613_v15 = vpop.f32.mrb[78].mxu1  ;;  %v6998_v0 = vadd.f32 %v9229_v51, %v9258_v36  ;;  %v7004_v6 = vadd.f32 %v7003_v35, %v9267_v9 }
 0x392   : > { %v6534_v23 = vpop.f32.mrb[163].mxu0  ;;  %v6614_v25 = vpop.f32.mrb[79].mxu1 }
 0x393   : > { %v7031_v14 = vadd.f32 %v6532_v28, %v9203_v20  ;;  %v6535_v3 = vadd.f32 %v6534_v23, %v6533_v41  ;;  %v6615_v8 = vadd.f32 %v6614_v25, %v6613_v15  ;;  %v6999_v51 = vadd.f32 %v6998_v0, %v9267_v9 }
 0x394   : > { %v7013_v25 = vadd.f32 %v9233_v59, %v9258_v36 }
 0x395   : > { %v7041_v34 = vadd.f32 %v6535_v3, %v9205_v53  ;;  %v9245_v19 = vadd.f32 %v7031_v14, %v6612_v42  ;;  %v7008_v42 = vadd.f32 %v9239_v10, %v9258_v36 }
 0x397   : > { %v6536_v17 = vpop.f32.mrb[164].mxu0  ;;  %v9247_v48 = vadd.f32 %v7041_v34, %v6615_v8  ;;  %v6616_v16 = vpop.f32.mrb[80].mxu1  ;;  %v7018_v8 = vadd.f32 %v9241_v24, %v9258_v36 }
 0x398   : > { %v6537_v58 = vpop.f32.mrb[165].mxu0  ;;  %v6617_v37 = vpop.f32.mrb[81].mxu1 }
 0x399   : > { %v6538_v45 = vadd.f32 %v6537_v58, %v6536_v17  ;;  %v6539_v52 = vpop.f32.mrb[166].mxu0  ;;  %v6618_v46 = vadd.f32 %v6617_v37, %v6616_v16  ;;  %v6619_v55 = vpop.f32.mrb[82].mxu1  ;;  %v7019_v16 = vadd.f32 %v7018_v8, %v9267_v9 }
 0x39a   : > { %v6540_v13 = vpop.f32.mrb[167].mxu0  ;;  %v6620_v40 = vpop.f32.mrb[83].mxu1 }
 0x39b   : > { %v7026_v20 = vadd.f32 %v6538_v45, %v9207_v38  ;;  %v6541_v18 = vadd.f32 %v6540_v13, %v6539_v52  ;;  %v6621_v39 = vadd.f32 %v6620_v40, %v6619_v55  ;;  %v6978_v38 = vadd.f32 %v9217_v50, %v9258_v36 }
 0x39c   : > { %v7023_v52 = vadd.f32 %v9235_v7, %v9258_v36  ;;  %v7009_v13 = vadd.f32 %v7008_v42, %v9267_v9 }
 0x39d   : > { %v7036_v53 = vadd.f32 %v6541_v18, %v9209_v62  ;;  %v9251_v29 = vadd.f32 %v7026_v20, %v6618_v46  ;;  %v6983_v62 = vadd.f32 %v9213_v56, %v9258_v36  ;;  %v6979_v11 = vadd.f32 %v6978_v38, %v9267_v9 }
 0x39e   : > { %v7014_v20 = vadd.f32 %v7013_v25, %v9267_v9  ;;  %v7024_v37 = vadd.f32 %v7023_v52, %v9267_v9 }
 0x39f   : > { %v9253_v32 = vadd.f32 %v7036_v53, %v6621_v39  ;;  %v6984_v56 = vadd.f32 %v6983_v62, %v9267_v9  ;;  %v7028_v40 = vadd.f32 %v9251_v29, %v9258_v36  ;;  %v7033_v62 = vadd.f32 %v9245_v19, %v9258_v36 }
 0x3a1   : > { %v7029_v29 = vadd.f32 %v7028_v40, %v9267_v9 }
 0x3bf   : > { %v6876_v33 = vpop.f32.mrb[36].mxu1 }
 0x3c0   : > { %v6969_v57 = vadd.f32 %v6968_v47, %v6876_v33  ;;  %v5394_v31 = vpop.f32.mrb[37].mxu1  ;;  %v7038_v33 = vadd.f32 %v9253_v32, %v9258_v36 }
 0x3c1   : > { %v6974_v50 = vadd.f32 %v6973_v21, %v5394_v31  ;;  %v6877_v22 = vpop.f32.mrb[38].mxu1  ;;  %v7034_v31 = vadd.f32 %v7033_v62, %v9267_v9 }
 0x3c2   : > { %v6970_v63 = vadd.f32 %v6969_v57, %v9267_v9  ;;  %v6980_v26 = vadd.f32 %v6979_v11, %v6877_v22  ;;  %v5397_v27 = vpop.f32.mrb[39].mxu1  ;;  %v7043_v57 = vadd.f32 %v9247_v48, %v9258_v36  ;;  %v7039_v32 = vadd.f32 %v7038_v33, %v9267_v9 }
 0x3c3   : > { %v6975_v5 = vadd.f32 %v6974_v50, %v9267_v9  ;;  %v6985_v49 = vadd.f32 %v6984_v56, %v5397_v27 }
 0x3c4   : > { %v5475_v4 = vmax.f32 %v6970_v63, 0.0  ;;  %v5476_v1 = vmax.f32 %v6980_v26, 0.0  ;;  %v7044_v48 = vadd.f32 %v7043_v57, %v9267_v9 }
 0x3c5   : > { %v5473_v30 = vmax.f32 %v6975_v5, 0.0  ;;  %v5474_v12 = vmax.f32 %v6985_v49, 0.0 }
 0x3c6   : > { %5491 = vst [vmem:[%s8794_s13 + $0x10] sm:$0xff] %v5475_v4  ;;  %5492 = vst [vmem:[%s8794_s13 + $0x18] sm:$0xff] %v5476_v1 }
 0x3c7   : > { %5489 = vst [vmem:[%s8794_s13] sm:$0xff] %v5473_v30  ;;  %5490 = vst [vmem:[%s8794_s13 + $0x8] sm:$0xff] %v5474_v12  ;;  %v6880_v28 = vpop.f32.mrb[40].mxu1 }
 0x3c8   : > { %v6990_v41 = vadd.f32 %v6989_v2, %v6880_v28  ;;  %v5410_v23 = vpop.f32.mrb[41].mxu1 }
 0x3c9   : > { %v6995_v14 = vadd.f32 %v6994_v44, %v5410_v23  ;;  %v6881_v3 = vpop.f32.mrb[42].mxu1 }
 0x3ca   : > { %v5479_v61 = vmax.f32 %v6990_v41, 0.0  ;;  %v7000_v34 = vadd.f32 %v6999_v51, %v6881_v3  ;;  %v5413_v54 = vpop.f32.mrb[43].mxu1 }
 0x3cb   : > { %v5477_v15 = vmax.f32 %v6995_v14, 0.0  ;;  %v7005_v17 = vadd.f32 %v7004_v6, %v5413_v54 }
 0x3cc   : > { %5495 = vst [vmem:[%s8794_s13 + $0x30] sm:$0xff] %v5479_v61  ;;  %v5480_v58 = vmax.f32 %v7000_v34, 0.0 }
 0x3cd   : > { %5493 = vst [vmem:[%s8794_s13 + $0x20] sm:$0xff] %v5477_v15  ;;  %v5478_v45 = vmax.f32 %v7005_v17, 0.0 }
 0x3ce   : > { %5496 = vst [vmem:[%s8794_s13 + $0x38] sm:$0xff] %v5480_v58 }
 0x3cf   : > { %5494 = vst [vmem:[%s8794_s13 + $0x28] sm:$0xff] %v5478_v45  ;;  %v6884_v10 = vpop.f32.mrb[44].mxu1 }
 0x3d0   : > { %v7010_v59 = vadd.f32 %v7009_v13, %v6884_v10  ;;  %v5426_v18 = vpop.f32.mrb[45].mxu1 }
 0x3d1   : > { %v7015_v24 = vadd.f32 %v7014_v20, %v5426_v18  ;;  %v6885_v53 = vpop.f32.mrb[46].mxu1 }
 0x3d2   : > { %v5483_v7 = vmax.f32 %v7010_v59, 0.0  ;;  %v7020_v46 = vadd.f32 %v7019_v16, %v6885_v53  ;;  %v5429_v55 = vpop.f32.mrb[47].mxu1 }
 0x3d3   : > { %v5481_v39 = vmax.f32 %v7015_v24, 0.0  ;;  %v7025_v38 = vadd.f32 %v7024_v37, %v5429_v55 }
 0x3d4   : > { %5499 = vst [vmem:[%s8794_s13 + $0x50] sm:$0xff] %v5483_v7  ;;  %v5484_v47 = vmax.f32 %v7020_v46, 0.0 }
 0x3d5   : > { %5497 = vst [vmem:[%s8794_s13 + $0x40] sm:$0xff] %v5481_v39  ;;  %v5482_v21 = vmax.f32 %v7025_v38, 0.0 }
 0x3d6   : > { %5500 = vst [vmem:[%s8794_s13 + $0x58] sm:$0xff] %v5484_v47 }
 0x3d7   : > { %5498 = vst [vmem:[%s8794_s13 + $0x48] sm:$0xff] %v5482_v21  ;;  %v6888_v19 = vpop.f32.mrb[48].mxu1 }
 0x3d8   : > { %v7030_v11 = vadd.f32 %v7029_v29, %v6888_v19  ;;  %v5442_v50 = vpop.f32.mrb[49].mxu1 }
 0x3d9   : > { %v7035_v22 = vadd.f32 %v7034_v31, %v5442_v50  ;;  %v6889_v56 = vpop.f32.mrb[50].mxu1 }
 0x3da   : > { %v5487_v36 = vmax.f32 %v7030_v11, 0.0  ;;  %v7040_v63 = vadd.f32 %v7039_v32, %v6889_v56  ;;  %v5445_v26 = vpop.f32.mrb[51].mxu1 }
 0x3db   : > { %v5485_v27 = vmax.f32 %v7035_v22, 0.0  ;;  %v7045_v43 = vadd.f32 %v7044_v48, %v5445_v26 }
 0x3dc   : > { %5503 = vst [vmem:[%s8794_s13 + $0x70] sm:$0xff] %v5487_v36  ;;  %v5488_v5 = vmax.f32 %v7040_v63, 0.0 }
 0x3dd   : > { %5501 = vst [vmem:[%s8794_s13 + $0x60] sm:$0xff] %v5485_v27  ;;  %v5486_v9 = vmax.f32 %v7045_v43, 0.0 }
 0x3de   : > { %5504 = vst [vmem:[%s8794_s13 + $0x78] sm:$0xff] %v5488_v5 }
 0x3df   : > { %5502 = vst [vmem:[%s8794_s13 + $0x68] sm:$0xff] %v5486_v9 }
 0x3e0   : > { %7578 = shalt.err (!%p7575_p11)
}
 0x3e1   : > { %s7579_s13 = scalar_lea.hbm %s9332_s22, 2048  ;;  %s7583_s10 = scalar_lea.hbm %s9400_s7, 8192 }
 0x3e2   : > { %p7580_p13 = scmp.ne.s32.totalorder %s9332_s22, %s7579_s13  ;;  %p7584_p3 = scmp.lt.u32.totalorder %s9332_s22, %s9400_s7 }
 0x3e3   : > { %p7585_p8 = scmp.lt.u32.totalorder %s7583_s10, %s7579_s13  ;;  %p7587_p12 = scmp.lt.u32.totalorder %s7579_s13, %s9332_s22 }
 0x3e4   : > { %p7581_p1 = pnand %p7580_p13, %p9430_p0 }
 0x3e5   : > { %p7586_p10 = por %p7585_p8, %p7584_p3 }
 0x3e6   : > { %p7582_p4 = pneg %p7581_p1 }
 0x3e7   : > { %p7588_p2 = por %p7587_p12, %p7586_p10 }
 0x3e9   : > { %p7589_p5 = pnand %p7588_p2, %p7582_p4 }
 0x3eb   : > { %7592 = shalt.err (!%p7589_p5)
}
 0x3ec   : > { %s7671_s19 = smov 128   ;;  %s7672_s12 = smov 8  }
 0x3ed   : > { %7139 = dma.vmem_to_hbm [thread:$0]  (%p9430_p0), %s9334_s28, 2048, %s9332_s22, %s9341_s14, %s7671_s19, %s7671_s19, %s7672_s12  }
 0x3ee PF: > { %p7151_p6 = scmp.ge.s32.totalorder %s7663_s8, 2  ;;  %s5537_s20 = sand.u32 1, %s7635_s24  }
 0x3ef   : > { %p9431_p7 = scmp.ne.s32.totalorder %s9412_s16, 0  ;;  %s5538_s18 = scalar_lea.sflag [#allocation5], %s5537_s20 }
 0x3f1   : > { %p7146_p9 = pnand %p7151_p6, %p9431_p7 }
 0x3f3   : > { %7630 = dma.done.wait (!%p7146_p9), %s5538_s18, 2048  }
 0x3f4   : > { %7632 = vsyncadd (!%p7146_p9), %s5538_s18, 4294965248  ;;  %s21_s8 = sadd.s32 1, %s7663_s8   ;;  %s9432_s15 = sld [smem:[#allocation9_spill]] }
 0x3f5   : > { %p18_p11 = scmp.ge.s32.totalorder %s21_s8, 6   ;;  %s9433_s22 = sld [smem:[#allocation10_spill]] }
 0x3f6   : > { %s9434_s24 = smov %s7639_s25  ;;  %s9435_s25 = smov %s7643_s26 }
 0x3f7   : > { %s9436_s26 = smov %s7792_s21  ;;  %s9437_s27 = smov %s7655_s29 }
 0x3f8   : > { %s9438_s28 = smov %s7659_s30  ;;  %20 = sbr.rel (!%p18_p11) target bundleno = 8 (0x8), region = 102 }
 0x3fa   : > { %s9439_s29 = smov %s9432_s15 }
 0x3fb   : > { %s9440_s30 = smov %s9433_s22 }
 0x3ff   :  { %5543 = vsyncpa [#allocation4], 1 }
 0x400   :  { %5545 = vsyncpa [#allocation4 + $0x1], 1 }
 0x401   :  { %5546 = vsyncpa [#allocation5], 1 }
 0x402   :  { %5548 = vsyncpa [#allocation5 + $0x1], 1 }

</bundles_post_ra>
